<compile_context>
chip_gen: v7x
topology: tpu7x:2x2x1
jax: 0.10.0
libtpu: 0.0.40
codegen_flags: <defaults>
</compile_context>

<pallas_src>
import math
import functools

import jax
import jax.numpy as jnp
from jax.experimental import pallas as pl
from jax.experimental.pallas import tpu as pltpu

INF = 32752.0
LN_EPS = 1e-5
LANE = 128


def _round_up(x, m):
    return ((x + m - 1) // m) * m


def _pick_batch_block(B, Np):
    """Batch elements per grid step.

    Aim for >=256 projection rows per step (amortize ~0.35us/step pipeline
    overhead and fill the MXU), but keep >=2 grid steps when B >= 2 so the
    "parallel" batch axis can still be sharded across TensorCores (v7x).
    """
    target_rows = 256
    bb = max(1, min(B, target_rows // Np))
    while bb > 1 and (B + bb - 1) // bb < 2:
        bb -= 1
    return bb


def attn_gcn_kernel(node_ref, edge_ref, wq_ref, bq_ref, wk_ref, bk_ref,
                    wc_ref, gamma_ref, beta_ref, out_ref,
                    *, d_ff, d_model, matmul_dtype):
    bb, npad, dpad = node_ref.shape

    x3 = node_ref[...]                                  # (Bb, Np, Dp) f32
    x2 = x3.reshape(bb * npad, dpad)                    # flatten: MXU-shaped LHS
    xm = x2.astype(matmul_dtype)

    # Edge-attention projections (Linear with bias); bf16 operands, f32 accumulate.
    q = jnp.dot(xm, wq_ref[...], preferred_element_type=jnp.float32) + bq_ref[...]
    k = jnp.dot(xm, wk_ref[...], preferred_element_type=jnp.float32) + bk_ref[...]

    q3 = q.reshape(bb, npad, -1).astype(matmul_dtype)
    k3 = k.reshape(bb, npad, -1).astype(matmul_dtype)

    # Scaled scores: batched contraction on the last axis of both operands
    # (transposed-RHS matmul form — no XLU transpose / k.T materialization).
    scores = jnp.einsum("bqf,bkf->bqk", q3, k3,
                        preferred_element_type=jnp.float32)
    scores = scores * (1.0 / math.sqrt(d_ff))           # d_ff = un-padded F

    # Mask: zero edges (including all padded rows/cols) get the -32752 sentinel.
    edges = edge_ref[...]                               # (Bb, Np, Np) f32
    mask = edges == 0.0
    scores = jnp.where(mask, -INF, scores)

    # Softmax over keys (torch dim=2). Fully-masked rows (padding, or inputs
    # without self-loops) stay finite: uniform exp(0) then zeroed by the
    # post-mask, matching the reference.
    # NOTE: for production-sized N, tile queries with an online softmax
    # (flash-style) so the (Np, Np) slab stays inside v7x's 64 MiB VMEM.
    m = jnp.max(scores, axis=-1, keepdims=True)
    e = jnp.exp(scores - m)
    denom = jnp.sum(e, axis=-1, keepdims=True)
    attn = e * pl.reciprocal(denom, approx=True)        # EUP vrcp slot
    attn = jnp.where(mask, 0.0, attn)

    # Context aggregation (batched) + ctx_layer projection (flattened).
    ctx3 = jnp.einsum("bqk,bkd->bqd",
                      attn.astype(matmul_dtype), x3.astype(matmul_dtype),
                      preferred_element_type=jnp.float32)       # (Bb, Np, Dp)
    ctx2 = ctx3.reshape(bb * npad, dpad).astype(matmul_dtype)
    ctx = jnp.dot(ctx2, wc_ref[...], preferred_element_type=jnp.float32)

    # Residual + exact (erf) GELU, all in f32.
    h = x2 + ctx
    h = 0.5 * h * (1.0 + jax.lax.erf(h * (1.0 / math.sqrt(2.0))))

    # LayerNorm over the *un-padded* feature dim. Padded feature columns of h
    # are exactly zero (x, wc columns zero-padded), so sums over Dp == sums
    # over D and only the 1/D normalizer needs the true width.
    inv_d = 1.0 / d_model
    mu = jnp.sum(h, axis=-1, keepdims=True) * inv_d
    var = jnp.sum(h * h, axis=-1, keepdims=True) * inv_d - mu * mu
    y = (h - mu) * jax.lax.rsqrt(var + LN_EPS)
    out = y * gamma_ref[...] + beta_ref[...]

    out_ref[...] = out.reshape(bb, npad, dpad).astype(out_ref.dtype)


def attn_gcn_layer(node_fts, rel_edges, params, *, matmul_dtype=jnp.bfloat16):
    """node_fts: (B, N, D) f32, rel_edges: (B, N, N) f32."""
    B, N, D = node_fts.shape
    F_ = params["wq_t"].shape[1]

    # Pad once in the wrapper to lane-dense / (8,128)-aligned shapes. Padded
    # rows are killed by the edge mask inside the kernel and sliced off below.
    Np = _round_up(N, LANE)
    Dp = _round_up(D, LANE)
    Fp = _round_up(F_, LANE)
    Bb = _pick_batch_block(B, Np)
    Bp = _round_up(B, Bb)

    x = jnp.pad(node_fts.astype(jnp.float32),
                ((0, Bp - B), (0, Np - N), (0, Dp - D)))
    e = jnp.pad(rel_edges.astype(jnp.float32),
                ((0, Bp - B), (0, Np - N), (0, Np - N)))

    def pad2(a, r, c):
        return jnp.pad(a, ((0, r - a.shape[0]), (0, c - a.shape[1])))

    # Weights travel in the matmul dtype (halves their HBM/VMEM traffic);
    # biases / LN params stay f32 (added after f32 accumulation).
    wq = pad2(params["wq_t"], Dp, Fp).astype(matmul_dtype)
    wk = pad2(params["wk_t"], Dp, Fp).astype(matmul_dtype)
    wc = pad2(params["wc_t"], Dp, Dp).astype(matmul_dtype)
    bq = jnp.pad(params["bq"], (0, Fp - F_)).reshape(1, Fp).astype(jnp.float32)
    bk = jnp.pad(params["bk"], (0, Fp - F_)).reshape(1, Fp).astype(jnp.float32)
    gamma = jnp.pad(params["ln_gamma"], (0, Dp - D)).reshape(1, Dp).astype(jnp.float32)
    beta = jnp.pad(params["ln_beta"], (0, Dp - D)).reshape(1, Dp).astype(jnp.float32)

    kernel = functools.partial(attn_gcn_kernel, d_ff=F_, d_model=D,
                               matmul_dtype=matmul_dtype)

    def run(weight_mode):
        wkw = {} if weight_mode is None else {"pipeline_mode": weight_mode}

        def wspec(shape):
            # Grid-invariant operands: block index never changes.
            return pl.BlockSpec(shape, lambda b: (0,) * len(shape), **wkw)

        grid_spec = pltpu.PrefetchScalarGridSpec(
            num_scalar_prefetch=0,
            grid=(Bp // Bb,),
            in_specs=[
                pl.BlockSpec((Bb, Np, Dp), lambda b: (b, 0, 0)),   # node_fts
                pl.BlockSpec((Bb, Np, Np), lambda b: (b, 0, 0)),   # rel_edges
                wspec((Dp, Fp)),    # Wq^T
                wspec((1, Fp)),     # bq
                wspec((Dp, Fp)),    # Wk^T
                wspec((1, Fp)),     # bk
                wspec((Dp, Dp)),    # Wc^T
                wspec((1, Dp)),     # ln gamma
                wspec((1, Dp)),     # ln beta
            ],
            out_specs=pl.BlockSpec((Bb, Np, Dp), lambda b: (b, 0, 0)),
        )
        return pl.pallas_call(
            kernel,
            out_shape=jax.ShapeDtypeStruct((Bp, Np, Dp), node_fts.dtype),
            grid_spec=grid_spec,
            compiler_params=pltpu.CompilerParams(
                dimension_semantics=("parallel",),
                vmem_limit_bytes=64 * 1024 * 1024),
        )(x, e, wq, bq, wk, bk, wc, gamma, beta)

    try:
        # Weights/biases never change across grid steps: single-buffer them so a
        # production-sized Wc does not burn 2x VMEM on a dead double buffer.
        out = run(pl.Buffered(1))
    except Exception:  # pragma: no cover — older jax w/o pipeline_mode support
        out = run(None)

    return out[:B, :N, :D]


def init_params(key, embed_size, d_ff):
    ks = jax.random.split(key, 5)
    scale_e = 1.0 / math.sqrt(embed_size)
    return {
        # stored transposed: (in, out)
        "wq_t": jax.random.uniform(ks[0], (embed_size, d_ff), jnp.float32, -scale_e, scale_e),
        "bq": jax.random.uniform(ks[1], (d_ff,), jnp.float32, -scale_e, scale_e),
        "wk_t": jax.random.uniform(ks[2], (embed_size, d_ff), jnp.float32, -scale_e, scale_e),
        "bk": jax.random.uniform(ks[3], (d_ff,), jnp.float32, -scale_e, scale_e),
        "wc_t": jax.random.uniform(ks[4], (embed_size, embed_size), jnp.float32, -scale_e, scale_e),
        "ln_gamma": jnp.ones((embed_size,), jnp.float32),
        "ln_beta": jnp.zeros((embed_size,), jnp.float32),
    }


def reference_forward(node_fts, rel_edges, params, matmul_dtype=jnp.float32):
    """Pure-JAX reference mirroring the PyTorch forward (eval mode).

    With matmul_dtype=float32 this is the exact module; with bfloat16 it applies
    the same operand rounding as the kernel (f32 accumulation everywhere).
    """
    c = lambda a: a.astype(matmul_dtype)
    d_ff = params["wq_t"].shape[1]

    q = jnp.einsum("bnd,df->bnf", c(node_fts), c(params["wq_t"]),
                   preferred_element_type=jnp.float32) + params["bq"]
    k = jnp.einsum("bnd,df->bnf", c(node_fts), c(params["wk_t"]),
                   preferred_element_type=jnp.float32) + params["bk"]
    scores = jnp.einsum("bod,bid->boi", c(q), c(k),
                        preferred_element_type=jnp.float32) / math.sqrt(d_ff)
    mask = rel_edges == 0
    scores = jnp.where(mask, -INF, scores)
    attn = jax.nn.softmax(scores, axis=2)
    attn = jnp.where(mask, 0.0, attn)
    ctx = jnp.einsum("boi,bid->bod", c(attn), c(node_fts),
                     preferred_element_type=jnp.float32)
    ctx = jnp.einsum("bnd,de->bne", c(ctx), c(params["wc_t"]),
                     preferred_element_type=jnp.float32)
    h = jax.nn.gelu(node_fts + ctx, approximate=False)
    mu = jnp.mean(h, axis=-1, keepdims=True)
    var = jnp.mean((h - mu) ** 2, axis=-1, keepdims=True)
    y = (h - mu) / jnp.sqrt(var + LN_EPS)
    return y * params["ln_gamma"] + params["ln_beta"]


if __name__ == "__main__":
    batch, num_nodes, embed_size, d_ff = 2, 8, 32, 16

    key = jax.random.PRNGKey(0)
    k_node, k_edge, k_param = jax.random.split(key, 3)

    node_fts = jax.random.normal(k_node, (batch, num_nodes, embed_size), jnp.float32)
    # Sparse-ish 0/1 adjacency with guaranteed self-loops.
    edge_probs = jax.random.uniform(k_edge, (batch, num_nodes, num_nodes))
    rel_edges = (edge_probs > 0.5).astype(jnp.float32)
    rel_edges = jnp.maximum(rel_edges, jnp.eye(num_nodes, dtype=jnp.float32)[None])

    params = init_params(k_param, embed_size, d_ff)

    out = attn_gcn_layer(node_fts, rel_edges, params)      # bf16 MXU, f32 accumulate
    out = jax.block_until_ready(out)
    assert out.shape == (batch, num_nodes, embed_size)

    # Primary check: precision-matched reference (same bf16 operand rounding).
    ref_bf16 = reference_forward(node_fts, rel_edges, params, matmul_dtype=jnp.bfloat16)
    assert jnp.allclose(out, ref_bf16, atol=1e-2, rtol=1e-2), "mismatch vs bf16-matched reference"

    # Sanity check vs exact f32 module semantics (loose: bf16 MXU rounding only).
    ref_f32 = reference_forward(node_fts, rel_edges, params, matmul_dtype=jnp.float32)
    assert jnp.allclose(out, ref_f32, atol=1e-1, rtol=1e-1), "mismatch vs f32 reference"

    print("KERNEL_OK")
</pallas_src>

<mosaic_0001>
module attributes {stable_mosaic.version = 11 : i64} {
  func.func @attn_gcn_kernel(%arg0: i32, %arg1: memref<1x128x128xf32, #tpu.memory_space<vmem>>, %arg2: memref<1x128x128xf32, #tpu.memory_space<vmem>>, %arg3: memref<128x128xbf16, #tpu.memory_space<vmem>>, %arg4: memref<1x128xf32, #tpu.memory_space<vmem>>, %arg5: memref<128x128xbf16, #tpu.memory_space<vmem>>, %arg6: memref<1x128xf32, #tpu.memory_space<vmem>>, %arg7: memref<128x128xbf16, #tpu.memory_space<vmem>>, %arg8: memref<1x128xf32, #tpu.memory_space<vmem>>, %arg9: memref<1x128xf32, #tpu.memory_space<vmem>>, %arg10: memref<1x128x128xf32, #tpu.memory_space<vmem>>) attributes {dimension_semantics = [#tpu.dimension_semantics<parallel>], iteration_bounds = array<i64: 2>, scalar_prefetch = 0 : i64, scratch_operands = 0 : i64, tpu.core_type = #tpu.core_type<tc>, window_params = [{transform_indices = @transform_0, window_bounds = array<i64: 1, 128, 128>}, {transform_indices = @transform_1, window_bounds = array<i64: 1, 128, 128>}, {pipeline_mode = #tpu.pipeline_mode<synchronous>, transform_indices = @transform_2, window_bounds = array<i64: 128, 128>}, {pipeline_mode = #tpu.pipeline_mode<synchronous>, transform_indices = @transform_3, window_bounds = array<i64: 1, 128>}, {pipeline_mode = #tpu.pipeline_mode<synchronous>, transform_indices = @transform_4, window_bounds = array<i64: 128, 128>}, {pipeline_mode = #tpu.pipeline_mode<synchronous>, transform_indices = @transform_5, window_bounds = array<i64: 1, 128>}, {pipeline_mode = #tpu.pipeline_mode<synchronous>, transform_indices = @transform_6, window_bounds = array<i64: 128, 128>}, {pipeline_mode = #tpu.pipeline_mode<synchronous>, transform_indices = @transform_7, window_bounds = array<i64: 1, 128>}, {pipeline_mode = #tpu.pipeline_mode<synchronous>, transform_indices = @transform_8, window_bounds = array<i64: 1, 128>}, {transform_indices = @transform_9, window_bounds = array<i64: 1, 128, 128>}]} {
    %c0 = arith.constant 0 : index
    %c0_0 = arith.constant 0 : index
    %c0_1 = arith.constant 0 : index
    %0 = vector.load %arg1[%c0, %c0_0, %c0_1] : memref<1x128x128xf32, #tpu.memory_space<vmem>>, vector<1x128x128xf32>
    %1 = vector.shape_cast %0 : vector<1x128x128xf32> to vector<128x128xf32>
    %2 = arith.truncf %1 : vector<128x128xf32> to vector<128x128xbf16>
    %c0_2 = arith.constant 0 : index
    %c0_3 = arith.constant 0 : index
    %3 = vector.load %arg3[%c0_2, %c0_3] : memref<128x128xbf16, #tpu.memory_space<vmem>>, vector<128x128xbf16>
    %cst = arith.constant dense<0.000000e+00> : vector<128x128xf32>
    %4 = tpu.matmul %2, %3, %cst {dimension_numbers = #tpu.dot_dimension_numbers<[1], [0], [0], [1], [0, 0, 1, 1], [], []>} : vector<128x128xbf16>, vector<128x128xbf16>, vector<128x128xf32> -> vector<128x128xf32>
    %c0_4 = arith.constant 0 : index
    %c0_5 = arith.constant 0 : index
    %5 = vector.load %arg4[%c0_4, %c0_5] : memref<1x128xf32, #tpu.memory_space<vmem>>, vector<1x128xf32>
    %6 = vector.broadcast %5 : vector<1x128xf32> to vector<128x128xf32>
    %7 = arith.addf %4, %6 : vector<128x128xf32>
    %c0_6 = arith.constant 0 : index
    %c0_7 = arith.constant 0 : index
    %8 = vector.load %arg5[%c0_6, %c0_7] : memref<128x128xbf16, #tpu.memory_space<vmem>>, vector<128x128xbf16>
    %cst_8 = arith.constant dense<0.000000e+00> : vector<128x128xf32>
    %9 = tpu.matmul %2, %8, %cst_8 {dimension_numbers = #tpu.dot_dimension_numbers<[1], [0], [0], [1], [0, 0, 1, 1], [], []>} : vector<128x128xbf16>, vector<128x128xbf16>, vector<128x128xf32> -> vector<128x128xf32>
    %c0_9 = arith.constant 0 : index
    %c0_10 = arith.constant 0 : index
    %10 = vector.load %arg6[%c0_9, %c0_10] : memref<1x128xf32, #tpu.memory_space<vmem>>, vector<1x128xf32>
    %11 = vector.broadcast %10 : vector<1x128xf32> to vector<128x128xf32>
    %12 = arith.addf %9, %11 : vector<128x128xf32>
    %13 = vector.shape_cast %7 : vector<128x128xf32> to vector<1x128x128xf32>
    %14 = arith.truncf %13 : vector<1x128x128xf32> to vector<1x128x128xbf16>
    %15 = vector.shape_cast %12 : vector<128x128xf32> to vector<1x128x128xf32>
    %16 = arith.truncf %15 : vector<1x128x128xf32> to vector<1x128x128xbf16>
    "tpu.trace_start"() <{level = 10 : i32, message = "bqf,bkf->bqk"}> : () -> ()
    %cst_11 = arith.constant dense<0.000000e+00> : vector<1x128x128xf32>
    %17 = tpu.matmul %14, %16, %cst_11 {dimension_numbers = #tpu.dot_dimension_numbers<[2], [2], [1], [1], [0, 0, 0, 1, 1, 1], [0], [0]>} : vector<1x128x128xbf16>, vector<1x128x128xbf16>, vector<1x128x128xf32> -> vector<1x128x128xf32>
    "tpu.trace_stop"() : () -> ()
    %cst_12 = arith.constant 2.500000e-01 : f32
    %18 = vector.broadcast %cst_12 : f32 to vector<1x128x128xf32>
    %19 = arith.mulf %17, %18 : vector<1x128x128xf32>
    %c0_13 = arith.constant 0 : index
    %c0_14 = arith.constant 0 : index
    %c0_15 = arith.constant 0 : index
    %20 = vector.load %arg2[%c0_13, %c0_14, %c0_15] : memref<1x128x128xf32, #tpu.memory_space<vmem>>, vector<1x128x128xf32>
    %cst_16 = arith.constant 0.000000e+00 : f32
    %21 = vector.broadcast %cst_16 : f32 to vector<1x128x128xf32>
    %22 = arith.cmpf oeq, %20, %21 : vector<1x128x128xf32>
    %cst_17 = arith.constant -3.275200e+04 : f32
    %23 = vector.broadcast %cst_17 : f32 to vector<1x128x128xf32>
    %24 = arith.select %22, %23, %19 : vector<1x128x128xi1>, vector<1x128x128xf32>
    %cst_18 = arith.constant dense<0xFF800000> : vector<1x128xf32>
    %25 = vector.multi_reduction <maximumf>, %24, %cst_18 [2] : vector<1x128x128xf32> to vector<1x128xf32>
    %26 = vector.shape_cast %25 : vector<1x128xf32> to vector<1x128x1xf32>
    %27 = vector.broadcast %26 : vector<1x128x1xf32> to vector<1x128x128xf32>
    %28 = arith.subf %24, %27 : vector<1x128x128xf32>
    %29 = math.exp %28 : vector<1x128x128xf32>
    %cst_19 = arith.constant dense<0.000000e+00> : vector<1x128xf32>
    %30 = vector.multi_reduction <add>, %29, %cst_19 [2] : vector<1x128x128xf32> to vector<1x128xf32>
    %31 = vector.shape_cast %30 : vector<1x128xf32> to vector<1x128x1xf32>
    %32 = tpu.reciprocal %31 {approx = true} : vector<1x128x1xf32> -> vector<1x128x1xf32>
    %33 = vector.broadcast %32 : vector<1x128x1xf32> to vector<1x128x128xf32>
    %34 = arith.mulf %29, %33 : vector<1x128x128xf32>
    %cst_20 = arith.constant 0.000000e+00 : f32
    %35 = vector.broadcast %cst_20 : f32 to vector<1x128x128xf32>
    %36 = arith.select %22, %35, %34 : vector<1x128x128xi1>, vector<1x128x128xf32>
    %37 = arith.truncf %36 : vector<1x128x128xf32> to vector<1x128x128xbf16>
    %38 = arith.truncf %0 : vector<1x128x128xf32> to vector<1x128x128xbf16>
    "tpu.trace_start"() <{level = 10 : i32, message = "bqk,bkd->bqd"}> : () -> ()
    %cst_21 = arith.constant dense<0.000000e+00> : vector<1x128x128xf32>
    %39 = tpu.matmul %37, %38, %cst_21 {dimension_numbers = #tpu.dot_dimension_numbers<[2], [1], [1], [2], [0, 0, 0, 1, 1, 2], [0], [0]>} : vector<1x128x128xbf16>, vector<1x128x128xbf16>, vector<1x128x128xf32> -> vector<1x128x128xf32>
    "tpu.trace_stop"() : () -> ()
    %40 = vector.shape_cast %39 : vector<1x128x128xf32> to vector<128x128xf32>
    %41 = arith.truncf %40 : vector<128x128xf32> to vector<128x128xbf16>
    %c0_22 = arith.constant 0 : index
    %c0_23 = arith.constant 0 : index
    %42 = vector.load %arg7[%c0_22, %c0_23] : memref<128x128xbf16, #tpu.memory_space<vmem>>, vector<128x128xbf16>
    %cst_24 = arith.constant dense<0.000000e+00> : vector<128x128xf32>
    %43 = tpu.matmul %41, %42, %cst_24 {dimension_numbers = #tpu.dot_dimension_numbers<[1], [0], [0], [1], [0, 0, 1, 1], [], []>} : vector<128x128xbf16>, vector<128x128xbf16>, vector<128x128xf32> -> vector<128x128xf32>
    %44 = arith.addf %1, %43 : vector<128x128xf32>
    %cst_25 = arith.constant 5.000000e-01 : f32
    %45 = vector.broadcast %cst_25 : f32 to vector<128x128xf32>
    %46 = arith.mulf %45, %44 : vector<128x128xf32>
    %cst_26 = arith.constant 0.707106769 : f32
    %47 = vector.broadcast %cst_26 : f32 to vector<128x128xf32>
    %48 = arith.mulf %44, %47 : vector<128x128xf32>
    %49 = math.erf %48 : vector<128x128xf32>
    %cst_27 = arith.constant 1.000000e+00 : f32
    %50 = vector.broadcast %cst_27 : f32 to vector<128x128xf32>
    %51 = arith.addf %50, %49 : vector<128x128xf32>
    %52 = arith.mulf %46, %51 : vector<128x128xf32>
    %cst_28 = arith.constant dense<0.000000e+00> : vector<128xf32>
    %53 = vector.multi_reduction <add>, %52, %cst_28 [1] : vector<128x128xf32> to vector<128xf32>
    %54 = vector.shape_cast %53 : vector<128xf32> to vector<128x1xf32>
    %cst_29 = arith.constant 3.125000e-02 : f32
    %55 = vector.broadcast %cst_29 : f32 to vector<128x1xf32>
    %56 = arith.mulf %54, %55 : vector<128x1xf32>
    %57 = arith.mulf %52, %52 : vector<128x128xf32>
    %cst_30 = arith.constant dense<0.000000e+00> : vector<128xf32>
    %58 = vector.multi_reduction <add>, %57, %cst_30 [1] : vector<128x128xf32> to vector<128xf32>
    %59 = vector.shape_cast %58 : vector<128xf32> to vector<128x1xf32>
    %cst_31 = arith.constant 3.125000e-02 : f32
    %60 = vector.broadcast %cst_31 : f32 to vector<128x1xf32>
    %61 = arith.mulf %59, %60 : vector<128x1xf32>
    %62 = arith.mulf %56, %56 : vector<128x1xf32>
    %63 = arith.subf %61, %62 : vector<128x1xf32>
    %64 = vector.broadcast %56 : vector<128x1xf32> to vector<128x128xf32>
    %65 = arith.subf %52, %64 : vector<128x128xf32>
    %cst_32 = arith.constant 9.99999974E-6 : f32
    %66 = vector.broadcast %cst_32 : f32 to vector<128x1xf32>
    %67 = arith.addf %63, %66 : vector<128x1xf32>
    %68 = math.rsqrt %67 : vector<128x1xf32>
    %69 = vector.broadcast %68 : vector<128x1xf32> to vector<128x128xf32>
    %70 = arith.mulf %65, %69 : vector<128x128xf32>
    %c0_33 = arith.constant 0 : index
    %c0_34 = arith.constant 0 : index
    %71 = vector.load %arg8[%c0_33, %c0_34] : memref<1x128xf32, #tpu.memory_space<vmem>>, vector<1x128xf32>
    %72 = vector.broadcast %71 : vector<1x128xf32> to vector<128x128xf32>
    %73 = arith.mulf %70, %72 : vector<128x128xf32>
    %c0_35 = arith.constant 0 : index
    %c0_36 = arith.constant 0 : index
    %74 = vector.load %arg9[%c0_35, %c0_36] : memref<1x128xf32, #tpu.memory_space<vmem>>, vector<1x128xf32>
    %75 = vector.broadcast %74 : vector<1x128xf32> to vector<128x128xf32>
    %76 = arith.addf %73, %75 : vector<128x128xf32>
    %77 = vector.shape_cast %76 : vector<128x128xf32> to vector<1x128x128xf32>
    %c0_37 = arith.constant 0 : index
    %c0_38 = arith.constant 0 : index
    %c0_39 = arith.constant 0 : index
    %78 = vector.load %arg10[%c0_37, %c0_38, %c0_39] : memref<1x128x128xf32, #tpu.memory_space<vmem>>, vector<1x128x128xf32>
    tpu.vector_store %arg10[%c0_37, %c0_38, %c0_39], %77 {strides = array<i32>} : memref<1x128x128xf32, #tpu.memory_space<vmem>>, vector<1x128x128xf32>,
    return
  }
  func.func @transform_0(%arg0: i32) -> (i32, i32, i32) {
    %c0_i32 = arith.constant 0 : i32
    %c0_i32_0 = arith.constant 0 : i32
    %c0_i32_1 = arith.constant 0 : i32
    return %arg0, %c0_i32, %c0_i32_0 : i32, i32, i32
  }
  func.func @transform_1(%arg0: i32) -> (i32, i32, i32) {
    %c0_i32 = arith.constant 0 : i32
    %c0_i32_0 = arith.constant 0 : i32
    %c0_i32_1 = arith.constant 0 : i32
    return %arg0, %c0_i32, %c0_i32_0 : i32, i32, i32
  }
  func.func @transform_2(%arg0: i32) -> (i32, i32) {
    %c0_i32 = arith.constant 0 : i32
    %c0_i32_0 = arith.constant 0 : i32
    %c0_i32_1 = arith.constant 0 : i32
    return %c0_i32, %c0_i32_0 : i32, i32
  }
  func.func @transform_3(%arg0: i32) -> (i32, i32) {
    %c0_i32 = arith.constant 0 : i32
    %c0_i32_0 = arith.constant 0 : i32
    %c0_i32_1 = arith.constant 0 : i32
    return %c0_i32, %c0_i32_0 : i32, i32
  }
  func.func @transform_4(%arg0: i32) -> (i32, i32) {
    %c0_i32 = arith.constant 0 : i32
    %c0_i32_0 = arith.constant 0 : i32
    %c0_i32_1 = arith.constant 0 : i32
    return %c0_i32, %c0_i32_0 : i32, i32
  }
  func.func @transform_5(%arg0: i32) -> (i32, i32) {
    %c0_i32 = arith.constant 0 : i32
    %c0_i32_0 = arith.constant 0 : i32
    %c0_i32_1 = arith.constant 0 : i32
    return %c0_i32, %c0_i32_0 : i32, i32
  }
  func.func @transform_6(%arg0: i32) -> (i32, i32) {
    %c0_i32 = arith.constant 0 : i32
    %c0_i32_0 = arith.constant 0 : i32
    %c0_i32_1 = arith.constant 0 : i32
    return %c0_i32, %c0_i32_0 : i32, i32
  }
  func.func @transform_7(%arg0: i32) -> (i32, i32) {
    %c0_i32 = arith.constant 0 : i32
    %c0_i32_0 = arith.constant 0 : i32
    %c0_i32_1 = arith.constant 0 : i32
    return %c0_i32, %c0_i32_0 : i32, i32
  }
  func.func @transform_8(%arg0: i32) -> (i32, i32) {
    %c0_i32 = arith.constant 0 : i32
    %c0_i32_0 = arith.constant 0 : i32
    %c0_i32_1 = arith.constant 0 : i32
    return %c0_i32, %c0_i32_0 : i32, i32
  }
  func.func @transform_9(%arg0: i32) -> (i32, i32, i32) {
    %c0_i32 = arith.constant 0 : i32
    %c0_i32_0 = arith.constant 0 : i32
    %c0_i32_1 = arith.constant 0 : i32
    return %arg0, %c0_i32, %c0_i32_0 : i32, i32, i32
  }
}

module attributes {stable_mosaic.version = 11 : i64} {
  func.func @attn_gcn_kernel(%arg0: i32, %arg1: memref<1x128x128xf32, #tpu.memory_space<vmem>>, %arg2: memref<1x128x128xf32, #tpu.memory_space<vmem>>, %arg3: memref<128x128xbf16, #tpu.memory_space<vmem>>, %arg4: memref<1x128xf32, #tpu.memory_space<vmem>>, %arg5: memref<128x128xbf16, #tpu.memory_space<vmem>>, %arg6: memref<1x128xf32, #tpu.memory_space<vmem>>, %arg7: memref<128x128xbf16, #tpu.memory_space<vmem>>, %arg8: memref<1x128xf32, #tpu.memory_space<vmem>>, %arg9: memref<1x128xf32, #tpu.memory_space<vmem>>, %arg10: memref<1x128x128xf32, #tpu.memory_space<vmem>>) attributes {dimension_semantics = [#tpu.dimension_semantics<parallel>], iteration_bounds = array<i64: 2>, scalar_prefetch = 0 : i64, scratch_operands = 0 : i64, tpu.core_type = #tpu.core_type<tc>, window_params = [{transform_indices = @transform_0, window_bounds = array<i64: 1, 128, 128>}, {transform_indices = @transform_1, window_bounds = array<i64: 1, 128, 128>}, {pipeline_mode = #tpu.pipeline_mode<synchronous>, transform_indices = @transform_2, window_bounds = array<i64: 128, 128>}, {pipeline_mode = #tpu.pipeline_mode<synchronous>, transform_indices = @transform_3, window_bounds = array<i64: 1, 128>}, {pipeline_mode = #tpu.pipeline_mode<synchronous>, transform_indices = @transform_4, window_bounds = array<i64: 128, 128>}, {pipeline_mode = #tpu.pipeline_mode<synchronous>, transform_indices = @transform_5, window_bounds = array<i64: 1, 128>}, {pipeline_mode = #tpu.pipeline_mode<synchronous>, transform_indices = @transform_6, window_bounds = array<i64: 128, 128>}, {pipeline_mode = #tpu.pipeline_mode<synchronous>, transform_indices = @transform_7, window_bounds = array<i64: 1, 128>}, {pipeline_mode = #tpu.pipeline_mode<synchronous>, transform_indices = @transform_8, window_bounds = array<i64: 1, 128>}, {transform_indices = @transform_9, window_bounds = array<i64: 1, 128, 128>}]} {
    %c0 = arith.constant 0 : index
    %c0_0 = arith.constant 0 : index
    %c0_1 = arith.constant 0 : index
    %0 = vector.load %arg1[%c0, %c0_0, %c0_1] : memref<1x128x128xf32, #tpu.memory_space<vmem>>, vector<1x128x128xf32>
    %1 = vector.shape_cast %0 : vector<1x128x128xf32> to vector<128x128xf32>
    %2 = arith.truncf %1 : vector<128x128xf32> to vector<128x128xbf16>
    %c0_2 = arith.constant 0 : index
    %c0_3 = arith.constant 0 : index
    %3 = vector.load %arg3[%c0_2, %c0_3] : memref<128x128xbf16, #tpu.memory_space<vmem>>, vector<128x128xbf16>
    %cst = arith.constant dense<0.000000e+00> : vector<128x128xf32>
    %4 = tpu.matmul %2, %3, %cst {dimension_numbers = #tpu.dot_dimension_numbers<[1], [0], [0], [1], [0, 0, 1, 1], [], []>} : vector<128x128xbf16>, vector<128x128xbf16>, vector<128x128xf32> -> vector<128x128xf32>
    %c0_4 = arith.constant 0 : index
    %c0_5 = arith.constant 0 : index
    %5 = vector.load %arg4[%c0_4, %c0_5] : memref<1x128xf32, #tpu.memory_space<vmem>>, vector<1x128xf32>
    %6 = vector.broadcast %5 : vector<1x128xf32> to vector<128x128xf32>
    %7 = arith.addf %4, %6 : vector<128x128xf32>
    %c0_6 = arith.constant 0 : index
    %c0_7 = arith.constant 0 : index
    %8 = vector.load %arg5[%c0_6, %c0_7] : memref<128x128xbf16, #tpu.memory_space<vmem>>, vector<128x128xbf16>
    %cst_8 = arith.constant dense<0.000000e+00> : vector<128x128xf32>
    %9 = tpu.matmul %2, %8, %cst_8 {dimension_numbers = #tpu.dot_dimension_numbers<[1], [0], [0], [1], [0, 0, 1, 1], [], []>} : vector<128x128xbf16>, vector<128x128xbf16>, vector<128x128xf32> -> vector<128x128xf32>
    %c0_9 = arith.constant 0 : index
    %c0_10 = arith.constant 0 : index
    %10 = vector.load %arg6[%c0_9, %c0_10] : memref<1x128xf32, #tpu.memory_space<vmem>>, vector<1x128xf32>
    %11 = vector.broadcast %10 : vector<1x128xf32> to vector<128x128xf32>
    %12 = arith.addf %9, %11 : vector<128x128xf32>
    %13 = vector.shape_cast %7 : vector<128x128xf32> to vector<1x128x128xf32>
    %14 = arith.truncf %13 : vector<1x128x128xf32> to vector<1x128x128xbf16>
    %15 = vector.shape_cast %12 : vector<128x128xf32> to vector<1x128x128xf32>
    %16 = arith.truncf %15 : vector<1x128x128xf32> to vector<1x128x128xbf16>
    "tpu.trace_start"() <{level = 10 : i32, message = "bqf,bkf->bqk"}> : () -> ()
    %cst_11 = arith.constant dense<0.000000e+00> : vector<1x128x128xf32>
    %17 = tpu.matmul %14, %16, %cst_11 {dimension_numbers = #tpu.dot_dimension_numbers<[2], [2], [1], [1], [0, 0, 0, 1, 1, 1], [0], [0]>} : vector<1x128x128xbf16>, vector<1x128x128xbf16>, vector<1x128x128xf32> -> vector<1x128x128xf32>
    "tpu.trace_stop"() : () -> ()
    %cst_12 = arith.constant 2.500000e-01 : f32
    %18 = vector.broadcast %cst_12 : f32 to vector<1x128x128xf32>
    %19 = arith.mulf %17, %18 : vector<1x128x128xf32>
    %c0_13 = arith.constant 0 : index
    %c0_14 = arith.constant 0 : index
    %c0_15 = arith.constant 0 : index
    %20 = vector.load %arg2[%c0_13, %c0_14, %c0_15] : memref<1x128x128xf32, #tpu.memory_space<vmem>>, vector<1x128x128xf32>
    %cst_16 = arith.constant 0.000000e+00 : f32
    %21 = vector.broadcast %cst_16 : f32 to vector<1x128x128xf32>
    %22 = arith.cmpf oeq, %20, %21 : vector<1x128x128xf32>
    %cst_17 = arith.constant -3.275200e+04 : f32
    %23 = vector.broadcast %cst_17 : f32 to vector<1x128x128xf32>
    %24 = arith.select %22, %23, %19 : vector<1x128x128xi1>, vector<1x128x128xf32>
    %cst_18 = arith.constant dense<0xFF800000> : vector<1x128xf32>
    %25 = vector.multi_reduction <maximumf>, %24, %cst_18 [2] : vector<1x128x128xf32> to vector<1x128xf32>
    %26 = vector.shape_cast %25 : vector<1x128xf32> to vector<1x128x1xf32>
    %27 = vector.broadcast %26 : vector<1x128x1xf32> to vector<1x128x128xf32>
    %28 = arith.subf %24, %27 : vector<1x128x128xf32>
    %29 = math.exp %28 : vector<1x128x128xf32>
    %cst_19 = arith.constant dense<0.000000e+00> : vector<1x128xf32>
    %30 = vector.multi_reduction <add>, %29, %cst_19 [2] : vector<1x128x128xf32> to vector<1x128xf32>
    %31 = vector.shape_cast %30 : vector<1x128xf32> to vector<1x128x1xf32>
    %32 = tpu.reciprocal %31 {approx = true} : vector<1x128x1xf32> -> vector<1x128x1xf32>
    %33 = vector.broadcast %32 : vector<1x128x1xf32> to vector<1x128x128xf32>
    %34 = arith.mulf %29, %33 : vector<1x128x128xf32>
    %cst_20 = arith.constant 0.000000e+00 : f32
    %35 = vector.broadcast %cst_20 : f32 to vector<1x128x128xf32>
    %36 = arith.select %22, %35, %34 : vector<1x128x128xi1>, vector<1x128x128xf32>
    %37 = arith.truncf %36 : vector<1x128x128xf32> to vector<1x128x128xbf16>
    %38 = arith.truncf %0 : vector<1x128x128xf32> to vector<1x128x128xbf16>
    "tpu.trace_start"() <{level = 10 : i32, message = "bqk,bkd->bqd"}> : () -> ()
    %cst_21 = arith.constant dense<0.000000e+00> : vector<1x128x128xf32>
    %39 = tpu.matmul %37, %38, %cst_21 {dimension_numbers = #tpu.dot_dimension_numbers<[2], [1], [1], [2], [0, 0, 0, 1, 1, 2], [0], [0]>} : vector<1x128x128xbf16>, vector<1x128x128xbf16>, vector<1x128x128xf32> -> vector<1x128x128xf32>
    "tpu.trace_stop"() : () -> ()
    %40 = vector.shape_cast %39 : vector<1x128x128xf32> to vector<128x128xf32>
    %41 = arith.truncf %40 : vector<128x128xf32> to vector<128x128xbf16>
    %c0_22 = arith.constant 0 : index
    %c0_23 = arith.constant 0 : index
    %42 = vector.load %arg7[%c0_22, %c0_23] : memref<128x128xbf16, #tpu.memory_space<vmem>>, vector<128x128xbf16>
    %cst_24 = arith.constant dense<0.000000e+00> : vector<128x128xf32>
    %43 = tpu.matmul %41, %42, %cst_24 {dimension_numbers = #tpu.dot_dimension_numbers<[1], [0], [0], [1], [0, 0, 1, 1], [], []>} : vector<128x128xbf16>, vector<128x128xbf16>, vector<128x128xf32> -> vector<128x128xf32>
    %44 = arith.addf %1, %43 : vector<128x128xf32>
    %cst_25 = arith.constant 5.000000e-01 : f32
    %45 = vector.broadcast %cst_25 : f32 to vector<128x128xf32>
    %46 = arith.mulf %45, %44 : vector<128x128xf32>
    %cst_26 = arith.constant 0.707106769 : f32
    %47 = vector.broadcast %cst_26 : f32 to vector<128x128xf32>
    %48 = arith.mulf %44, %47 : vector<128x128xf32>
    %49 = math.erf %48 : vector<128x128xf32>
    %cst_27 = arith.constant 1.000000e+00 : f32
    %50 = vector.broadcast %cst_27 : f32 to vector<128x128xf32>
    %51 = arith.addf %50, %49 : vector<128x128xf32>
    %52 = arith.mulf %46, %51 : vector<128x128xf32>
    %cst_28 = arith.constant dense<0.000000e+00> : vector<128xf32>
    %53 = vector.multi_reduction <add>, %52, %cst_28 [1] : vector<128x128xf32> to vector<128xf32>
    %54 = vector.shape_cast %53 : vector<128xf32> to vector<128x1xf32>
    %cst_29 = arith.constant 3.125000e-02 : f32
    %55 = vector.broadcast %cst_29 : f32 to vector<128x1xf32>
    %56 = arith.mulf %54, %55 : vector<128x1xf32>
    %57 = arith.mulf %52, %52 : vector<128x128xf32>
    %cst_30 = arith.constant dense<0.000000e+00> : vector<128xf32>
    %58 = vector.multi_reduction <add>, %57, %cst_30 [1] : vector<128x128xf32> to vector<128xf32>
    %59 = vector.shape_cast %58 : vector<128xf32> to vector<128x1xf32>
    %cst_31 = arith.constant 3.125000e-02 : f32
    %60 = vector.broadcast %cst_31 : f32 to vector<128x1xf32>
    %61 = arith.mulf %59, %60 : vector<128x1xf32>
    %62 = arith.mulf %56, %56 : vector<128x1xf32>
    %63 = arith.subf %61, %62 : vector<128x1xf32>
    %64 = vector.broadcast %56 : vector<128x1xf32> to vector<128x128xf32>
    %65 = arith.subf %52, %64 : vector<128x128xf32>
    %cst_32 = arith.constant 9.99999974E-6 : f32
    %66 = vector.broadcast %cst_32 : f32 to vector<128x1xf32>
    %67 = arith.addf %63, %66 : vector<128x1xf32>
    %68 = math.rsqrt %67 : vector<128x1xf32>
    %69 = vector.broadcast %68 : vector<128x1xf32> to vector<128x128xf32>
    %70 = arith.mulf %65, %69 : vector<128x128xf32>
    %c0_33 = arith.constant 0 : index
    %c0_34 = arith.constant 0 : index
    %71 = vector.load %arg8[%c0_33, %c0_34] : memref<1x128xf32, #tpu.memory_space<vmem>>, vector<1x128xf32>
    %72 = vector.broadcast %71 : vector<1x128xf32> to vector<128x128xf32>
    %73 = arith.mulf %70, %72 : vector<128x128xf32>
    %c0_35 = arith.constant 0 : index
    %c0_36 = arith.constant 0 : index
    %74 = vector.load %arg9[%c0_35, %c0_36] : memref<1x128xf32, #tpu.memory_space<vmem>>, vector<1x128xf32>
    %75 = vector.broadcast %74 : vector<1x128xf32> to vector<128x128xf32>
    %76 = arith.addf %73, %75 : vector<128x128xf32>
    %77 = vector.shape_cast %76 : vector<128x128xf32> to vector<1x128x128xf32>
    %c0_37 = arith.constant 0 : index
    %c0_38 = arith.constant 0 : index
    %c0_39 = arith.constant 0 : index
    %78 = vector.load %arg10[%c0_37, %c0_38, %c0_39] : memref<1x128x128xf32, #tpu.memory_space<vmem>>, vector<1x128x128xf32>
    tpu.vector_store %arg10[%c0_37, %c0_38, %c0_39], %77 {strides = array<i32>} : memref<1x128x128xf32, #tpu.memory_space<vmem>>, vector<1x128x128xf32>,
    return
  }
  func.func @transform_0(%arg0: i32) -> (i32, i32, i32) {
    %c0_i32 = arith.constant 0 : i32
    %c0_i32_0 = arith.constant 0 : i32
    %c0_i32_1 = arith.constant 0 : i32
    return %arg0, %c0_i32, %c0_i32_0 : i32, i32, i32
  }
  func.func @transform_1(%arg0: i32) -> (i32, i32, i32) {
    %c0_i32 = arith.constant 0 : i32
    %c0_i32_0 = arith.constant 0 : i32
    %c0_i32_1 = arith.constant 0 : i32
    return %arg0, %c0_i32, %c0_i32_0 : i32, i32, i32
  }
  func.func @transform_2(%arg0: i32) -> (i32, i32) {
    %c0_i32 = arith.constant 0 : i32
    %c0_i32_0 = arith.constant 0 : i32
    %c0_i32_1 = arith.constant 0 : i32
    return %c0_i32, %c0_i32_0 : i32, i32
  }
  func.func @transform_3(%arg0: i32) -> (i32, i32) {
    %c0_i32 = arith.constant 0 : i32
    %c0_i32_0 = arith.constant 0 : i32
    %c0_i32_1 = arith.constant 0 : i32
    return %c0_i32, %c0_i32_0 : i32, i32
  }
  func.func @transform_4(%arg0: i32) -> (i32, i32) {
    %c0_i32 = arith.constant 0 : i32
    %c0_i32_0 = arith.constant 0 : i32
    %c0_i32_1 = arith.constant 0 : i32
    return %c0_i32, %c0_i32_0 : i32, i32
  }
  func.func @transform_5(%arg0: i32) -> (i32, i32) {
    %c0_i32 = arith.constant 0 : i32
    %c0_i32_0 = arith.constant 0 : i32
    %c0_i32_1 = arith.constant 0 : i32
    return %c0_i32, %c0_i32_0 : i32, i32
  }
  func.func @transform_6(%arg0: i32) -> (i32, i32) {
    %c0_i32 = arith.constant 0 : i32
    %c0_i32_0 = arith.constant 0 : i32
    %c0_i32_1 = arith.constant 0 : i32
    return %c0_i32, %c0_i32_0 : i32, i32
  }
  func.func @transform_7(%arg0: i32) -> (i32, i32) {
    %c0_i32 = arith.constant 0 : i32
    %c0_i32_0 = arith.constant 0 : i32
    %c0_i32_1 = arith.constant 0 : i32
    return %c0_i32, %c0_i32_0 : i32, i32
  }
  func.func @transform_8(%arg0: i32) -> (i32, i32) {
    %c0_i32 = arith.constant 0 : i32
    %c0_i32_0 = arith.constant 0 : i32
    %c0_i32_1 = arith.constant 0 : i32
    return %c0_i32, %c0_i32_0 : i32, i32
  }
  func.func @transform_9(%arg0: i32) -> (i32, i32, i32) {
    %c0_i32 = arith.constant 0 : i32
    %c0_i32_0 = arith.constant 0 : i32
    %c0_i32_1 = arith.constant 0 : i32
    return %arg0, %c0_i32, %c0_i32_0 : i32, i32, i32
  }
}

</mosaic_0001>

<bundles_post_ra>
// kernel: tpu_custom_call.1
= control target key start
LH: loop header
LB: loop body
LE: loop exit
PB: predicated region body
PF: predicated region fallthrough
CT: control target
= control target key end

     0   :  { %s4108_s0 = inlined_call_operand.hbm [shape: f32[2,128,128], index: 0, kind: input, shape index: {}]   ;;  %s4109_s1 = inlined_call_operand.hbm [shape: f32[2,128,128], index: 1, kind: input, shape index: {}]   ;;  %s4110_s2 = inlined_call_operand.hbm [shape: bf16[128,128], index: 2, kind: input, shape index: {}]   ;;  %s4111_s3 = inlined_call_operand.hbm [shape: f32[1,128], index: 3, kind: input, shape index: {}]   ;;  %s4112_s4 = inlined_call_operand.hbm [shape: bf16[128,128], index: 4, kind: input, shape index: {}]   ;;  %s4113_s5 = inlined_call_operand.hbm [shape: f32[1,128], index: 5, kind: input, shape index: {}]   ;;  %s4114_s6 = inlined_call_operand.hbm [shape: bf16[128,128], index: 6, kind: input, shape index: {}]   ;;  %s4115_s7 = inlined_call_operand.hbm [shape: f32[1,128], index: 7, kind: input, shape index: {}]   ;;  %s4116_s8 = inlined_call_operand.hbm [shape: f32[1,128], index: 8, kind: input, shape index: {}]   ;;  %s4117_s9 = inlined_call_operand.hbm [shape: f32[2,128,128], index: 9, kind: output, shape index: {}]  }
   0x1   :  { %4128 = sst [smem:[#allocation25_spill]] %s4108_s0 }
   0x2   :  { %4129 = sst [smem:[#allocation26_spill]] %s4110_s2 }
   0x3   :  { %4130 = sst [smem:[#allocation27_spill]] %s4111_s3 }
   0x4   :  { %4131 = sst [smem:[#allocation28_spill]] %s4112_s4 }
   0x5   :  { %4132 = sst [smem:[#allocation29_spill]] %s4113_s5 }
   0x6   :  { %4133 = sst [smem:[#allocation30_spill]] %s4117_s9 }
   0x7   :  { %14 = vsyncpa [#allocation3], 0 }
   0x8   :  { %16 = vsyncpa [#allocation3 + $0x1], 0 }
   0x9   :  { %17 = vsyncpa [#allocation6], 0 }
   0xa   :  { %19 = vsyncpa [#allocation6 + $0x1], 0 }
   0xb   :  { %20 = vsyncpa [#allocation9], 0 }
   0xc   :  { %21 = vsyncpa [#allocation12], 0 }
   0xd   :  { %22 = vsyncpa [#allocation15], 0 }
   0xe   :  { %23 = vsyncpa [#allocation4], 0 }
   0xf   :  { %25 = vsyncpa [#allocation4 + $0x1], 0  ;;  %s3047_s30 = smov 0   ;;  %s3049_s10 = smov 0  }
  0x10   :  { %s3051_s11 = smov 0   ;;  %s3053_s12 = smov 0  }
  0x11 LB: > { %s2981_s13 = smov [#allocation7]   ;;  %s3068_s15 = sadd.s32 4294967295, %s2979_s12   ;;  %s2979_s12 = sphi %s3053_s12, %s4198_s12   ;;  %s2975_s11 = sphi %s3051_s11, %s4197_s11   ;;  %s2971_s10 = sphi %s3049_s10, %s4196_s10   ;;  %s2967_s30 = sphi %s3047_s30, %s4195_s30  }
  0x12   : > { %s273_s14 = sshll.u32 %s2981_s13, 4  ;;  %p1999_p0 = scmp.ge.s32.totalorder %s2979_s12, 1  ;;  %s3073_s14 = int_to_ptr.vmem [resolvable:$true] %s273_s14 }
  0x13   : > { %p4121_p1 = scmp.eq.s32.totalorder %s3068_s15, 0  ;;  %p261_p2 = scmp.lt.s32.totalorder %s2979_s12, 3 }
  0x14   : > { %s2982_s17 = smov [#allocation8]   ;;  %s2983_s20 = smov [#allocation11]  }
  0x15   : > { %p3075_p3 = pnand %p1999_p0, %p261_p2  ;;  %s287_s18 = sshll.u32 %s2982_s17, 4  ;;  %s3088_s18 = int_to_ptr.vmem [resolvable:$true] %s287_s18 }
  0x16   : > { %s311_s21 = sshll.u32 %s2983_s20, 4  ;;  %s4136_s2 = sld [smem:[#allocation26_spill]]  ;;  %s3090_s21 = int_to_ptr.vmem [resolvable:$true] %s311_s21 }
  0x17   : > { %s4134_s16 = scalar_select %p3075_p3, 1, 0 }
  0x18   : > { %p2375_p5 = pneg %p3075_p3 }
  0x1a   : > { %p3084_p6 = pnand %p2375_p5, %p4121_p1 }
  0x1c   : > { %s2637_s24 = scalar_lea.hbm %s4136_s2, 1024  ;;  %p3100_p8 = pneg %p3084_p6 }
  0x1d   : > { %p2638_p7 = scmp.ne.s32.totalorder %s4136_s2, %s2637_s24  ;;  %p2644_p11 = scmp.lt.u32.totalorder %s2637_s24, %s4136_s2 }
  0x1f   : > { %p2640_p9 = pnand %p3100_p8, %p2638_p7 }
  0x21   : > { %p2641_p10 = pneg %p2640_p9 }
  0x23   : > { %p2646_p12 = pnand %p2644_p11, %p2641_p10 }
  0x25   : > { %2649 = shalt.err (!%p2646_p12)
}
  0x26   : > { %s2650_s13 = scalar_lea.vmem %s3073_s14, 1024  ;;  %p2658_p5 = scmp.lt.s32.totalorder %s3073_s14, %s3073_s14 }
  0x27   : > { %p2651_p13 = scmp.ne.s32.totalorder %s3073_s14, %s2650_s13  ;;  %p2659_p4 = scmp.lt.s32.totalorder %s2650_s13, %s2650_s13 }
  0x29   : > { %p2653_p0 = pnand %p2651_p13, %p3100_p8  ;;  %p2660_p7 = por %p2659_p4, %p2658_p5 }
  0x2b   : > { %p2654_p2 = pneg %p2653_p0 }
  0x2d   : > { %p2661_p9 = pnand %p2660_p7, %p2654_p2 }
  0x2f   : > { %2664 = shalt.err (!%p2661_p9)
}
  0x30   : > { %s4119_s17 = smov 64   ;;  %s2985_s20 = smov 4  }
  0x31   : > { %2378 = dma.hbm_to_vmem [thread:$0]  (!%p3084_p6), %s4136_s2, 1024, %s3073_s14, [#allocation6], %s4119_s17, %s4119_s17, %s2985_s20  }
  0x32   : > { %s4138_s3 = sld [smem:[#allocation27_spill]] }
  0x38   : > { %s2665_s26 = scalar_lea.hbm %s4138_s3, 16 }
  0x39   : > { %p2666_p4 = scmp.ne.s32.totalorder %s4138_s3, %s2665_s26  ;;  %p2672_p12 = scmp.lt.u32.totalorder %s2665_s26, %s4138_s3 }
  0x3b   : > { %p2668_p10 = pnand %p2666_p4, %p3100_p8 }
  0x3d   : > { %p2669_p11 = pneg %p2668_p10 }
  0x3f   : > { %p2674_p13 = pnand %p2672_p12, %p2669_p11 }
  0x41   : > { %2677 = shalt.err (!%p2674_p13)
}
  0x42   : > { %s2678_s14 = scalar_lea.vmem %s3088_s18, 16  ;;  %s2685_s22 = scalar_lea.vmem %s3088_s18, 32 }
  0x43   : > { %p2679_p0 = scmp.ne.s32.totalorder %s3088_s18, %s2678_s14  ;;  %p2686_p7 = scmp.lt.s32.totalorder %s3088_s18, %s3088_s18 }
  0x44   : > { %p2687_p9 = scmp.lt.s32.totalorder %s2685_s22, %s2678_s14 }
  0x45   : > { %p2681_p2 = pnand %p2679_p0, %p3100_p8 }
  0x46   : > { %p2688_p4 = por %p2687_p9, %p2686_p7 }
  0x47   : > { %p2682_p5 = pneg %p2681_p2 }
  0x49   : > { %p2689_p10 = pnand %p2688_p4, %p2682_p5 }
  0x4b   : > { %2692 = shalt.err (!%p2689_p10)
}
  0x4c   : > { %2381 = dma.hbm_to_vmem [thread:$0]  (!%p3084_p6), %s4138_s3, 16, %s3088_s18, [#allocation9]  }
  0x4d   : > { %s4139_s5 = sld [smem:[#allocation29_spill]] }
  0x53   : > { %s2693_s26 = scalar_lea.hbm %s4139_s5, 16 }
  0x54   : > { %p2694_p11 = scmp.ne.s32.totalorder %s4139_s5, %s2693_s26  ;;  %p2700_p0 = scmp.lt.u32.totalorder %s2693_s26, %s4139_s5 }
  0x56   : > { %p2696_p12 = pnand %p2694_p11, %p3100_p8 }
  0x58   : > { %p2697_p13 = pneg %p2696_p12 }
  0x5a   : > { %p2702_p2 = pnand %p2700_p0, %p2697_p13 }
  0x5c   : > { %2705 = shalt.err (!%p2702_p2)
}
  0x5d   : > { %s2706_s18 = scalar_lea.vmem %s3090_s21, 16  ;;  %s2713_s22 = scalar_lea.vmem %s3090_s21, 32 }
  0x5e   : > { %p2707_p5 = scmp.ne.s32.totalorder %s3090_s21, %s2706_s18  ;;  %p2714_p4 = scmp.lt.s32.totalorder %s3090_s21, %s3090_s21 }
  0x5f   : > { %p2715_p10 = scmp.lt.s32.totalorder %s2713_s22, %s2706_s18 }
  0x60   : > { %p2709_p7 = pnand %p2707_p5, %p3100_p8 }
  0x61   : > { %p2716_p11 = por %p2715_p10, %p2714_p4 }
  0x62   : > { %p2710_p9 = pneg %p2709_p7 }
  0x64   : > { %p2717_p12 = pnand %p2716_p11, %p2710_p9 }
  0x66   : > { %2720 = shalt.err (!%p2717_p12)
}
  0x67   : > { %2387 = dma.hbm_to_vmem [thread:$0]  (!%p3084_p6), %s4139_s5, 16, %s3090_s21, [#allocation12]  }
  0x68   : > { %s2986_s24 = smov [#allocation14]   ;;  %s2987_s26 = smov [#allocation10]  }
  0x69   : > { %s335_s25 = sshll.u32 %s2986_s24, 4  ;;  %s297_s28 = sshll.u32 %s2987_s26, 4  ;;  %s336_s25 = int_to_ptr.vmem [resolvable:$true] %s335_s25  ;;  %s298_s28 = int_to_ptr.vmem [resolvable:$true] %s297_s28 }
  0x6a   : > { %s2721_s14 = scalar_lea.hbm %s4115_s7, 16 }
  0x6b   : > { %p2722_p13 = scmp.ne.s32.totalorder %s4115_s7, %s2721_s14  ;;  %p2728_p5 = scmp.lt.u32.totalorder %s2721_s14, %s4115_s7 }
  0x6d   : > { %p2724_p0 = pnand %p2722_p13, %p3100_p8 }
  0x6f   : > { %p2725_p2 = pneg %p2724_p0 }
  0x71   : > { %p2730_p7 = pnand %p2728_p5, %p2725_p2 }
  0x73   : > { %2733 = shalt.err (!%p2730_p7)
}
  0x74   : > { %s2734_s21 = scalar_lea.vmem %s336_s25, 16  ;;  %s2741_s23 = scalar_lea.vmem %s336_s25, 32 }
  0x75   : > { %p2735_p9 = scmp.ne.s32.totalorder %s336_s25, %s2734_s21  ;;  %p2742_p11 = scmp.lt.s32.totalorder %s336_s25, %s336_s25 }
  0x76   : > { %p2743_p12 = scmp.lt.s32.totalorder %s2741_s23, %s2734_s21 }
  0x77   : > { %p2737_p4 = pnand %p2735_p9, %p3100_p8 }
  0x78   : > { %p2744_p1 = por %p2743_p12, %p2742_p11 }
  0x79   : > { %p2738_p10 = pneg %p2737_p4 }
  0x7b   : > { %p2745_p3 = pnand %p2744_p1, %p2738_p10 }
  0x7d   : > { %2748 = shalt.err (!%p2745_p3)
}
  0x7e   : > { %2393 = dma.hbm_to_vmem [thread:$0]  (!%p3084_p6), %s4115_s7, 16, %s336_s25, [#allocation15]  }
  0x7f   : > { %s4140_s4 = sld [smem:[#allocation28_spill]] }
  0x85   : > { %s2749_s13 = scalar_lea.hbm %s4140_s4, 1024 }
  0x86   : > { %p2750_p13 = scmp.ne.s32.totalorder %s4140_s4, %s2749_s13  ;;  %p2756_p3 = scmp.lt.u32.totalorder %s2749_s13, %s4140_s4 }
  0x88   : > { %p2752_p0 = pnand %p2750_p13, %p3100_p8 }
  0x8a   : > { %p2753_p1 = pneg %p2752_p0 }
  0x8c   : > { %p2758_p2 = pnand %p2756_p3, %p2753_p1 }
  0x8e   : > { %2761 = shalt.err (!%p2758_p2)
}
  0x8f   : > { %s2762_s21 = scalar_lea.vmem %s298_s28, 1024  ;;  %p2770_p4 = scmp.lt.s32.totalorder %s298_s28, %s298_s28 }
  0x90   : > { %p2763_p5 = scmp.ne.s32.totalorder %s298_s28, %s2762_s21  ;;  %p2771_p10 = scmp.lt.s32.totalorder %s2762_s21, %s2762_s21 }
  0x92   : > { %p2765_p7 = pnand %p2763_p5, %p3100_p8  ;;  %p2772_p11 = por %p2771_p10, %p2770_p4 }
  0x94   : > { %p2766_p9 = pneg %p2765_p7 }
  0x96   : > { %p2773_p12 = pnand %p2772_p11, %p2766_p9 }
  0x98   : > { %2776 = shalt.err (!%p2773_p12)
}
  0x99   : > { %s4141_s25 = smov 64   ;;  %s2988_s26 = smov [#allocation13]  }
  0x9a   : > { %2384 = dma.hbm_to_vmem [thread:$0]  (!%p3084_p6), %s4140_s4, 1024, %s298_s28, [#allocation9], %s4141_s25, %s4141_s25, %s2985_s20  }
  0x9b   : > { %s321_s17 = sshll.u32 %s2988_s26, 4  ;;  %s2989_s29 = smov [#allocation16]   ;;  %s322_s17 = int_to_ptr.vmem [resolvable:$true] %s321_s17 }
  0x9c   : > { %s346_s13 = sshll.u32 %s2989_s29, 4  ;;  %s2777_s22 = scalar_lea.hbm %s4114_s6, 1024  ;;  %s347_s13 = int_to_ptr.vmem [resolvable:$true] %s346_s13 }
  0x9d   : > { %p2778_p13 = scmp.ne.s32.totalorder %s4114_s6, %s2777_s22  ;;  %p2784_p3 = scmp.lt.u32.totalorder %s2777_s22, %s4114_s6 }
  0x9f   : > { %p2780_p0 = pnand %p2778_p13, %p3100_p8 }
  0xa1   : > { %p2781_p1 = pneg %p2780_p0 }
  0xa3   : > { %p2786_p2 = pnand %p2784_p3, %p2781_p1 }
  0xa5   : > { %2789 = shalt.err (!%p2786_p2)
}
  0xa6   : > { %s2790_s28 = scalar_lea.vmem %s322_s17, 1024  ;;  %p2798_p4 = scmp.lt.s32.totalorder %s322_s17, %s322_s17 }
  0xa7   : > { %p2791_p5 = scmp.ne.s32.totalorder %s322_s17, %s2790_s28  ;;  %p2799_p10 = scmp.lt.s32.totalorder %s2790_s28, %s2790_s28 }
  0xa9   : > { %p2793_p7 = pnand %p2791_p5, %p3100_p8  ;;  %p2800_p11 = por %p2799_p10, %p2798_p4 }
  0xab   : > { %p2794_p9 = pneg %p2793_p7 }
  0xad   : > { %p2801_p12 = pnand %p2800_p11, %p2794_p9 }
  0xaf   : > { %2804 = shalt.err (!%p2801_p12)
}
  0xb0   : > { %2390 = dma.hbm_to_vmem [thread:$0]  (!%p3084_p6), %s4114_s6, 1024, %s322_s17, [#allocation12], %s4141_s25, %s4141_s25, %s2985_s20  }
  0xb1   : > { %s2805_s14 = scalar_lea.hbm %s4116_s8, 16 }
  0xb2   : > { %p2806_p13 = scmp.ne.s32.totalorder %s4116_s8, %s2805_s14  ;;  %p2812_p3 = scmp.lt.u32.totalorder %s2805_s14, %s4116_s8 }
  0xb4   : > { %p2808_p0 = pnand %p2806_p13, %p3100_p8 }
  0xb6   : > { %p2809_p1 = pneg %p2808_p0 }
  0xb8   : > { %p2814_p2 = pnand %p2812_p3, %p2809_p1 }
  0xba   : > { %2817 = shalt.err (!%p2814_p2)
}
  0xbb   : > { %s2818_s23 = scalar_lea.vmem %s347_s13, 16  ;;  %s2825_s20 = scalar_lea.vmem %s347_s13, 32 }
  0xbc   : > { %p2819_p5 = scmp.ne.s32.totalorder %s347_s13, %s2818_s23  ;;  %p2826_p4 = scmp.lt.s32.totalorder %s347_s13, %s347_s13 }
  0xbd   : > { %p2827_p10 = scmp.lt.s32.totalorder %s2825_s20, %s2818_s23 }
  0xbe   : > { %p2821_p7 = pnand %p2819_p5, %p3100_p8 }
  0xbf   : > { %p2828_p11 = por %p2827_p10, %p2826_p4 }
  0xc0   : > { %p2822_p9 = pneg %p2821_p7 }
  0xc2   : > { %p2829_p12 = pnand %p2828_p11, %p2822_p9 }
  0xc4   : > { %2832 = shalt.err (!%p2829_p12)
}
  0xc5   : > { %2396 = dma.hbm_to_vmem [thread:$0]  (!%p3084_p6), %s4116_s8, 16, %s347_s13, [#allocation15]  }
  0xc6   : > { %s1998_s27 = sadd.s32 4294967294, %s2979_s12   ;;  %s3252_s19 = sadd.s32 1, %s2979_s12  }
  0xc7   : > { %s38_s28 = sadd.s32 1, %s2975_s11  ;;  %s35_s2 = ssub.s32 %s2979_s12, %s3252_s19 }
  0xc8   : > { %p45_p8 = scmp.ne.s32.totalorder %s2975_s11, %s2971_s10  ;;  %p36_p13 = scmp.eq.s32.totalorder %s35_s2, 0 }
  0xc9   : > { %p46_p0 = scmp.eq.s32.totalorder %s2979_s12, 0  ;;  %p51_p1 = scmp.ne.s32.totalorder %s2971_s10, %s2967_s30 }
  0xca   : > { %p248_p3 = scmp.eq.s32.totalorder %s3068_s15, 1  ;;  %p4142_p5 = scmp.eq.s32.totalorder %s3068_s15, 0 }
  0xcb   : > { %s3264_s24 = scalar_select %p36_p13, %s2975_s11, %s38_s28  }
  0xcc   : > { %p47_p2 = por %p46_p0, %p45_p8  ;;  %p3268_p7 = por %p4142_p5, %p51_p1 }
  0xcd   : > { %p3272_p6 = por %p248_p3, %p45_p8  ;;  %p254_p9 = scmp.eq.s32.totalorder %s1998_s27, 1 }
  0xce   : > { %p2415_p4 = scmp.lt.s32.totalorder %s2979_s12, 2  ;;  %s357_s29 = sand.u32 1, %s2975_s11  }
  0xcf   : > { %s4144_s26 = scalar_select %p3272_p6, 1, 0 }
  0xd0   : > { %p3278_p10 = por %p254_p9, %p51_p1  ;;  %s3282_s18 = sshll.u32 %s357_s29, 7 }
  0xd1   : > { %s4123_s22 = sshll.u32 %s2979_s12, 11  ;;  %s4146_s0 = sld [smem:[#allocation25_spill]] }
  0xd2   : > { %s4145_s14 = scalar_select %p3278_p10, 1, 0 }
  0xd3   : > { %s361_s20 = scalar_lea.vmem [#allocation2], %s3282_s18  ;;  %p3293_p11 = pnand %p2415_p4, %p47_p2 }
  0xd4   : > { %s368_s25 = sshll.u32 %s361_s20, 4  ;;  %s3299_s27 = scalar_lea.sflag [#allocation3], %s357_s29  ;;  %s3297_s25 = int_to_ptr.vmem [resolvable:$true] %s368_s25 }
  0xd5   : > { %p2835_p8 = pneg %p3293_p11 }
  0xd7   : > { %s3290_s23 = scalar_lea.hbm %s4146_s0, %s4123_s22  ;;  %s2838_s21 = scalar_lea.hbm %s4146_s0, 4096 }
  0xd8   : > { %s2833_s28 = scalar_lea.hbm %s3290_s23, 2048  ;;  %p2839_p1 = scmp.lt.u32.totalorder %s3290_s23, %s4146_s0 }
  0xd9   : > { %p2834_p12 = scmp.ne.s32.totalorder %s3290_s23, %s2833_s28  ;;  %p2840_p3 = scmp.lt.u32.totalorder %s2838_s21, %s2833_s28 }
  0xda   : > { %p2842_p5 = scmp.lt.u32.totalorder %s2833_s28, %s3290_s23 }
  0xdb   : > { %p2836_p13 = pnand %p2835_p8, %p2834_p12  ;;  %p2841_p2 = por %p2840_p3, %p2839_p1 }
  0xdd   : > { %p2837_p0 = pneg %p2836_p13  ;;  %p2843_p9 = por %p2842_p5, %p2841_p2 }
  0xdf   : > { %p2844_p4 = pnand %p2843_p9, %p2837_p0 }
  0xe1   : > { %2847 = shalt.err (!%p2844_p4)
}
  0xe2   : > { %s2848_s29 = scalar_lea.vmem %s3297_s25, 2048  ;;  %s2990_s2 = smov [#allocation2]  }
  0xe3   : > { %p2849_p12 = scmp.ne.s32.totalorder %s3297_s25, %s2848_s29  ;;  %s2853_s9 = sshll.u32 %s2990_s2, 4  ;;  %s2854_s9 = int_to_ptr.vmem [resolvable:$false] %s2853_s9 }
  0xe4   : > { %s2855_s22 = scalar_lea.vmem %s2854_s9, 4096  ;;  %p2856_p6 = scmp.lt.s32.totalorder %s3297_s25, %s2854_s9 }
  0xe5   : > { %p2851_p13 = pnand %p2849_p12, %p2835_p8  ;;  %p2857_p1 = scmp.lt.s32.totalorder %s2855_s22, %s2848_s29 }
  0xe7   : > { %p2852_p10 = pneg %p2851_p13  ;;  %p2858_p3 = por %p2857_p1, %p2856_p6 }
  0xe9   : > { %p2859_p2 = pnand %p2858_p3, %p2852_p10 }
  0xeb   : > { %2862 = shalt.err (!%p2859_p2)
}
  0xec   : > { %s2991_s28 = smov 128   ;;  %s2992_s21 = smov 8  }
  0xed   : > { %2400 = dma.hbm_to_vmem [thread:$0]  (!%p3293_p11), %s3290_s23, 2048, %s3297_s25, %s3299_s27, %s2991_s28, %s2991_s28, %s2992_s21  }
  0xee   : > { %s4148_s20 = sshll.u32 %s2979_s12, 11  ;;  %s382_s22 = scalar_lea.vmem [#allocation5], %s3282_s18 }
  0xef   : > { %s3335_s9 = scalar_lea.hbm %s4109_s1, %s4148_s20  ;;  %s389_s0 = sshll.u32 %s382_s22, 4  ;;  %s3339_s0 = int_to_ptr.vmem [resolvable:$true] %s389_s0 }
  0xf0   : > { %s378_s3 = sand.u32 1, %s2979_s12   ;;  %s2863_s5 = scalar_lea.hbm %s3335_s9, 2048 }
  0xf1   : > { %s3341_s4 = scalar_lea.sflag [#allocation6], %s378_s3  ;;  %p2864_p6 = scmp.ne.s32.totalorder %s3335_s9, %s2863_s5 }
  0xf2   : > { %s2868_s27 = scalar_lea.hbm %s4109_s1, 4096  ;;  %p2869_p5 = scmp.lt.u32.totalorder %s3335_s9, %s4109_s1 }
  0xf3   : > { %p2866_p10 = pnand %p2864_p6, %p2835_p8  ;;  %p2870_p9 = scmp.lt.u32.totalorder %s2868_s27, %s2863_s5 }
  0xf4   : > { %p2872_p12 = scmp.lt.u32.totalorder %s2863_s5, %s3335_s9 }
  0xf5   : > { %p2867_p0 = pneg %p2866_p10  ;;  %p2871_p4 = por %p2870_p9, %p2869_p5 }
  0xf7   : > { %p2873_p13 = por %p2872_p12, %p2871_p4 }
  0xf9   : > { %p2874_p1 = pnand %p2873_p13, %p2867_p0 }
  0xfb   : > { %2877 = shalt.err (!%p2874_p1)
}
  0xfc   : > { %s2878_s3 = scalar_lea.vmem %s3339_s0, 2048  ;;  %s2993_s18 = smov [#allocation5]  }
  0xfd   : > { %p2879_p3 = scmp.ne.s32.totalorder %s3339_s0, %s2878_s3  ;;  %s2883_s2 = sshll.u32 %s2993_s18, 4  ;;  %s2884_s2 = int_to_ptr.vmem [resolvable:$false] %s2883_s2 }
  0xfe   : > { %s2885_s22 = scalar_lea.vmem %s2884_s2, 4096  ;;  %p2886_p10 = scmp.lt.s32.totalorder %s3339_s0, %s2884_s2 }
  0xff   : > { %p2881_p2 = pnand %p2879_p3, %p2835_p8  ;;  %p2887_p5 = scmp.lt.s32.totalorder %s2885_s22, %s2878_s3 }
 0x101   : > { %p2882_p6 = pneg %p2881_p2  ;;  %p2888_p9 = por %p2887_p5, %p2886_p10 }
 0x103   : > { %p2889_p4 = pnand %p2888_p9, %p2882_p6 }
 0x105   : > { %2892 = shalt.err (!%p2889_p4)
}
 0x106   : > { %2403 = dma.hbm_to_vmem [thread:$0]  (!%p3293_p11), %s3335_s9, 2048, %s3339_s0, %s3341_s4, %s2991_s28, %s2991_s28, %s2992_s21  }
 0x107   : > { %p4149_p8 = scmp.ne.s32.totalorder %s4134_s16, 0 }
 0x108   : > { %s3373_s5 = sand.u32 (!%p4149_p8), 1, %s2971_s10  }
 0x109   : > { %401 = sbr.rel (%p4149_p8) target bundleno = 1834 (0x72a), region = 56  ;;  %s3376_s23 = sshll.u32 (!%p4149_p8), %s3373_s5, 7 }
 0x10a   : > { %s404_s17 = scalar_lea.sflag (!%p4149_p8), [#allocation3], %s3373_s5  ;;  %s3380_s25 = scalar_lea.vmem (!%p4149_p8), [#allocation2], %s3376_s23 }
 0x110   : > { %2938 = dma.done.wait (%p3268_p7), %s404_s17, 2048  }
 0x111   : > { %2940 = vsyncadd (%p3268_p7), %s404_s17, 4294965248  ;;  %s412_s0 = sand.u32 1, %s3068_s15   ;;  %s3388_s16 = scalar_lea.vmem [#allocation5], %s3376_s23 }
 0x112   : > { %s413_s4 = scalar_lea.sflag [#allocation6], %s412_s0 }
 0x113   : > { %2942 = dma.done.wait (%p3268_p7), %s413_s4, 2048  }
 0x114   : > { %2944 = vsyncadd (%p3268_p7), %s413_s4, 4294965248  ;;  %p4150_p11 = scmp.eq.s32.totalorder %s3068_s15, 0 }
 0x116   : > { %2946 = dma.done.wait (%p4150_p11), [#allocation6], 1024   ;;  %p4151_p0 = pmov %p4150_p11 }
 0x118   : > { %2948 = vsyncadd (%p4151_p0), [#allocation6], 4294966272  ;;  %p4152_p12 = pmov %p4151_p0 }
 0x119   : > { %p4153_p13 = pmov %p4151_p0 }
 0x11a   : > { %2950 = dma.done.wait (%p4152_p12), [#allocation9], 1040  }
 0x11b   : > { %2952 = vsyncadd (%p4153_p13), [#allocation9], 4294966256  ;;  %p4154_p1 = pmov %p4151_p0 }
 0x11c   : > { %p4155_p3 = pmov %p4151_p0 }
 0x11d   : > { %2954 = dma.done.wait (%p4154_p1), [#allocation12], 1040  }
 0x11e   : > { %2956 = vsyncadd (%p4155_p3), [#allocation12], 4294966256  ;;  %p4156_p7 = pmov %p4151_p0 }
 0x11f   : > { %p4157_p2 = pmov %p4151_p0 }
 0x120   : > { %2958 = dma.done.wait (%p4156_p7), [#allocation15], 32  }
 0x121   : > { %2960 = vsyncadd (%p4157_p2), [#allocation15], 4294967264  ;;  %v2469_v0 = vld [vmem:[#allocation10] sm:$0xff]   ;;  %v2470_v1 = vld [vmem:[#allocation10 + $0x8] sm:$0xff]   ;;  %s3974_s13 = scalar_lea.vmem [#allocation17], %s3376_s23  ;;  %s2100_s28 = sshll.u32 %s3068_s15, 11 }
 0x122   : > { %2213 = vmatprep.subr.bf16.mxu1 %v2469_v0  ;;  %v2471_v2 = vld [vmem:[#allocation10 + $0x10] sm:$0xff]   ;;  %v2472_v3 = vld [vmem:[#allocation10 + $0x18] sm:$0xff]   ;;  %v486_v5 = vld [vmem:[%s3380_s25 + $0x8] sm:$0xff]  ;;  %s1836_s21 = sshll.u32 %s3974_s13, 4  ;;  %s4191_s20 = sld [smem:[#allocation30_spill]]  ;;  %s4061_s21 = int_to_ptr.vmem [resolvable:$true] %s1836_s21 }
 0x123   : > { %2214 = vmatpush3.bf16.msra.mxu1 %v2469_v0  ;;  %v485_v4 = vld [vmem:[%s3380_s25] sm:$0xff]  ;;  %v2478_v9 = vld [vmem:[#allocation7 + $0x8] sm:$0xff]   ;;  %v2479_v10 = vld [vmem:[#allocation7 + $0x10] sm:$0xff]   ;;  %s1823_s15 = scalar_lea.sflag [#allocation4], %s3373_s5  ;;  %s2893_s3 = scalar_lea.vmem %s4061_s21, 2048 }
 0x124   : > { %2215 = vmatprep.subr.bf16.mxu1 %v2470_v1  ;;  %v501_v6 = vpack.c.bf16 %v486_v5, %v485_v4  ;;  %v2477_v7 = vld [vmem:[#allocation7] sm:$0xff]   ;;  %v2474_v11 = vld [vmem:[#allocation10 + $0x28] sm:$0xff]   ;;  %v2480_v12 = vld [vmem:[#allocation7 + $0x18] sm:$0xff]   ;;  %p2894_p6 = scmp.ne.s32.totalorder %s4061_s21, %s2893_s3  ;;  %p4192_p10 = scmp.ne.s32.totalorder %s4144_s26, 0 }
 0x125   : > { %v2473_v8 = vld [vmem:[#allocation10 + $0x20] sm:$0xff]   ;;  %2181 = vmatprep.subr.bf16.mxu0 %v2477_v7  ;;  %v2475_v13 = vld [vmem:[#allocation10 + $0x30] sm:$0xff]   ;;  %v2476_v15 = vld [vmem:[#allocation10 + $0x38] sm:$0xff]   ;;  %s2994_s18 = smov [#allocation17]  }
 0x126   : > { %2229 = vmatprep.mubr.bf16.mxu1 %v501_v6  ;;  %2197 = vmatprep.mubr.bf16.mxu0 %v501_v6  ;;  %v2481_v14 = vld [vmem:[#allocation7 + $0x20] sm:$0xff]   ;;  %v487_v16 = vld [vmem:[%s3380_s25 + $0x10] sm:$0xff]  ;;  %v488_v17 = vld [vmem:[%s3380_s25 + $0x18] sm:$0xff]  ;;  %p2895_p5 = pnand %p2894_p6, %p4192_p10  ;;  %s2897_s2 = sshll.u32 %s2994_s18, 4  ;;  %s2898_s2 = int_to_ptr.vmem [resolvable:$false] %s2897_s2 }
 0x127   : > { %2216 = vmatpush3.bf16.msra.mxu1 %v2470_v1  ;;  %2182 = vmatpush3.bf16.msra.mxu0 %v2477_v7  ;;  %v2482_v18 = vld [vmem:[#allocation7 + $0x28] sm:$0xff]   ;;  %v489_v19 = vld [vmem:[%s3380_s25 + $0x20] sm:$0xff]  ;;  %v502_v21 = vpack.c.bf16 %v488_v17, %v487_v16  ;;  %v2483_v23 = vld [vmem:[#allocation7 + $0x30] sm:$0xff]   ;;  %s2899_s22 = scalar_lea.vmem %s2898_s2, 4096  ;;  %p2900_p4 = scmp.lt.s32.totalorder %s4061_s21, %s2898_s2 }
 0x128   : > { %2217 = vmatprep.subr.bf16.mxu1 %v2471_v2  ;;  %2183 = vmatprep.subr.bf16.mxu0 %v2478_v9  ;;  %v490_v20 = vld [vmem:[%s3380_s25 + $0x28] sm:$0xff]  ;;  %v491_v24 = vld [vmem:[%s3380_s25 + $0x30] sm:$0xff]  ;;  %v492_v25 = vld [vmem:[%s3380_s25 + $0x38] sm:$0xff]  ;;  %s4059_s29 = scalar_lea.hbm %s4191_s20, %s2100_s28  ;;  %p2896_p9 = pneg %p2895_p5 }
 0x129   : > { %v503_v22 = vpack.c.bf16 %v490_v20, %v489_v19  ;;  %v2484_v26 = vld [vmem:[#allocation7 + $0x38] sm:$0xff]   ;;  %v493_v27 = vld [vmem:[%s3380_s25 + $0x40] sm:$0xff]  ;;  %v494_v28 = vld [vmem:[%s3380_s25 + $0x48] sm:$0xff]  ;;  %v504_v29 = vpack.c.bf16 %v492_v25, %v491_v24  ;;  %p2901_p8 = scmp.lt.s32.totalorder %s2899_s22, %s2893_s3 }
 0x12a   : > { %v505_v30 = vpack.c.bf16 %v494_v28, %v493_v27  ;;  %v495_v31 = vld [vmem:[%s3380_s25 + $0x50] sm:$0xff]  ;;  %v496_v32 = vld [vmem:[%s3380_s25 + $0x58] sm:$0xff]  ;;  %v497_v33 = vld [vmem:[%s3380_s25 + $0x60] sm:$0xff] }
 0x12b   : > { %2218 = vmatpush3.bf16.msra.mxu1 %v2471_v2  ;;  %2184 = vmatpush3.bf16.msra.mxu0 %v2478_v9  ;;  %v498_v34 = vld [vmem:[%s3380_s25 + $0x68] sm:$0xff]  ;;  %v506_v35 = vpack.c.bf16 %v496_v32, %v495_v31  ;;  %v499_v37 = vld [vmem:[%s3380_s25 + $0x70] sm:$0xff]  ;;  %v500_v38 = vld [vmem:[%s3380_s25 + $0x78] sm:$0xff]  ;;  %p2902_p11 = por %p2901_p8, %p2900_p4 }
 0x12c   : > { %2219 = vmatprep.subr.bf16.mxu1 %v2472_v3  ;;  %2185 = vmatprep.subr.bf16.mxu0 %v2479_v10  ;;  %v507_v36 = vpack.c.bf16 %v498_v34, %v497_v33  ;;  %v508_v39 = vpack.c.bf16 %v500_v38, %v499_v37  ;;  %v3426_v41 = vld [vmem:[#allocation11] ss:$0 sm:$0xff]  ;;  %v3433_v54 = vld [vmem:[#allocation8] ss:$0 sm:$0xff] }
 0x12d   : > { %p2903_p0 = pnand %p2902_p11, %p2896_p9 }
 0x12f   : > { %2220 = vmatpush3.bf16.msra.mxu1 %v2472_v3  ;;  %2186 = vmatpush3.bf16.msra.mxu0 %v2479_v10 }
 0x130   : > { %2221 = vmatprep.subr.bf16.mxu1 %v2473_v8  ;;  %2187 = vmatprep.subr.bf16.mxu0 %v2480_v12 }
 0x133   : > { %2222 = vmatpush3.bf16.msra.mxu1 %v2473_v8  ;;  %2188 = vmatpush3.bf16.msra.mxu0 %v2480_v12 }
 0x134   : > { %2223 = vmatprep.subr.bf16.mxu1 %v2474_v11  ;;  %2189 = vmatprep.subr.bf16.mxu0 %v2481_v14 }
 0x137   : > { %2224 = vmatpush3.bf16.msra.mxu1 %v2474_v11  ;;  %2190 = vmatpush3.bf16.msra.mxu0 %v2481_v14 }
 0x138   : > { %2225 = vmatprep.subr.bf16.mxu1 %v2475_v13  ;;  %2191 = vmatprep.subr.bf16.mxu0 %v2482_v18 }
 0x13b   : > { %2226 = vmatpush3.bf16.msra.mxu1 %v2475_v13  ;;  %2192 = vmatpush3.bf16.msra.mxu0 %v2482_v18 }
 0x13c   : > { %2227 = vmatprep.subr.bf16.mxu1 %v2476_v15  ;;  %2193 = vmatprep.subr.bf16.mxu0 %v2483_v23 }
 0x13f   : > { %2228 = vmatpush3.bf16.msra.mxu1 %v2476_v15  ;;  %2194 = vmatpush3.bf16.msra.mxu0 %v2483_v23 }
 0x140   : > { %2277 = vmatprep.subr.bf16.mxu1 %v501_v6  ;;  %2195 = vmatprep.subr.bf16.mxu0 %v2484_v26 }
 0x142   : > { %2230 = vmatmul.mubr.bf16.vlgmr.msra.gmra.mrb[0].mxu1 %v502_v21 }
 0x143   : > { %2233 = vmatprep.mubr.bf16.mxu1 %v503_v22  ;;  %2278 = vmatpush3.bf16.msra.mxu1 %v501_v6 }
 0x144   : > { %2279 = vmatprep.subr.bf16.mxu1 %v502_v21  ;;  %2196 = vmatpush3.bf16.msra.mxu0 %v2484_v26 }
 0x147   : > { %2280 = vmatpush3.bf16.msra.mxu1 %v502_v21  ;;  %2198 = vmatmul.mubr.bf16.vlgmr.msra.gmra.mrb[0].mxu0 %v502_v21 }
 0x148   : > { %2281 = vmatprep.subr.bf16.mxu1 %v503_v22  ;;  %2201 = vmatprep.mubr.bf16.mxu0 %v503_v22 }
 0x14a   : > { %2234 = vmatmul.mubr.bf16.gmra.mrb[4].mxu1 %v504_v29 }
 0x14b   : > { %2237 = vmatprep.mubr.bf16.mxu1 %v505_v30  ;;  %2282 = vmatpush3.bf16.msra.mxu1 %v503_v22 }
 0x14c   : > { %2283 = vmatprep.subr.bf16.mxu1 %v504_v29 }
 0x14f   : > { %2284 = vmatpush3.bf16.msra.mxu1 %v504_v29  ;;  %2202 = vmatmul.mubr.bf16.gmra.mrb[4].mxu0 %v504_v29 }
 0x150   : > { %2285 = vmatprep.subr.bf16.mxu1 %v505_v30  ;;  %2205 = vmatprep.mubr.bf16.mxu0 %v505_v30 }
 0x152   : > { %2238 = vmatmul.mubr.bf16.gmra.mrb[8].mxu1 %v506_v35 }
 0x153   : > { %2241 = vmatprep.mubr.bf16.mxu1 %v507_v36  ;;  %2286 = vmatpush3.bf16.msra.mxu1 %v505_v30 }
 0x154   : > { %2287 = vmatprep.subr.bf16.mxu1 %v506_v35 }
 0x157   : > { %2288 = vmatpush3.bf16.msra.mxu1 %v506_v35  ;;  %2206 = vmatmul.mubr.bf16.gmra.mrb[8].mxu0 %v506_v35 }
 0x158   : > { %2289 = vmatprep.subr.bf16.mxu1 %v507_v36  ;;  %2209 = vmatprep.mubr.bf16.mxu0 %v507_v36 }
 0x15a   : > { %2242 = vmatmul.mubr.bf16.gmra.mrb[12].mxu1 %v508_v39 }
 0x15b   : > { %2290 = vmatpush3.bf16.msra.mxu1 %v507_v36 }
 0x15c   : > { %2291 = vmatprep.subr.bf16.mxu1 %v508_v39 }
 0x15f   : > { %2292 = vmatpush3.bf16.msra.mxu1 %v508_v39  ;;  %2210 = vmatmul.mubr.bf16.gmra.mrb[12].mxu0 %v508_v39 }
 0x215   : > { %v2231_v40 = vpop.f32.mrb[0].mxu1 }
 0x216   : > { %v782_v42 = vpop.f32.mrb[1].mxu1  ;;  %v791_v44 = vadd.f32 %v2231_v40, %v3426_v41 }
 0x217   : > { %v2232_v43 = vpop.f32.mrb[2].mxu1  ;;  %v783_v47 = vadd.f32 %v3426_v41, %v782_v42 }
 0x218   : > { %v794_v45 = vadd.f32 %v2232_v43, %v3426_v41  ;;  %v785_v46 = vpop.f32.mrb[3].mxu1 }
 0x219   : > { %v786_v48 = vadd.f32 %v3426_v41, %v785_v46 }
 0x21a   : > { %v854_v49 = vpack.c.bf16 %v794_v45, %v791_v44  ;;  %v2199_v59 = vpop.f32.mrb[0].mxu0 }
 0x21b   : > { %v853_v50 = vpack.c.bf16 %v786_v48, %v783_v47  ;;  %v3439_v61 = vadd.f32 %v2199_v59, %v3433_v54  ;;  %v614_v62 = vpop.f32.mrb[1].mxu0  ;;  %v3475_v59 = vld [vmem:[%s3388_s16] sm:$0xff] }
 0x21c   : > { %v615_v0 = vadd.f32 %v3433_v54, %v614_v62  ;;  %v2200_v1 = vpop.f32.mrb[2].mxu0  ;;  %vm990_vm1 = vcmp.eq.f32.partialorder %v3475_v59, 0.0 }
 0x21d   : > { %2245 = vmatprep.subr.bf16.mxu0 %v853_v50  ;;  %v2235_v51 = vpop.f32.mrb[4].mxu1  ;;  %v3443_v3 = vadd.f32 %v2200_v1, %v3433_v54  ;;  %v617_v4 = vpop.f32.mrb[3].mxu0 }
 0x21e   : > { %2246 = vmatpush3.bf16.xpose.msra.mxu0 %v853_v50  ;;  %v807_v52 = vadd.f32 %v2235_v51, %v3426_v41  ;;  %v798_v53 = vpop.f32.mrb[5].mxu1  ;;  %v618_v5 = vadd.f32 %v3433_v54, %v617_v4 }
 0x21f   : > { %2247 = vmatprep.subr.bf16.mxu0 %v854_v49  ;;  %v799_v55 = vadd.f32 %v3426_v41, %v798_v53  ;;  %v2236_v56 = vpop.f32.mrb[6].mxu1  ;;  %v846_v7 = vpack.c.bf16 %v3443_v3, %v3439_v61  ;;  %v3480_v61 = vld [vmem:[%s3388_s16 + $0x18] sm:$0xff] }
 0x220   : > { %v810_v57 = vadd.f32 %v2236_v56, %v3426_v41  ;;  %v801_v58 = vpop.f32.mrb[7].mxu1  ;;  %v845_v10 = vpack.c.bf16 %v618_v5, %v615_v0  ;;  %vm993_vm2 = vcmp.eq.f32.partialorder %v3480_v61, 0.0 }
 0x221   : > { %v802_v60 = vadd.f32 %v3426_v41, %v801_v58 }
 0x222   : > { %v856_v63 = vpack.c.bf16 %v810_v57, %v807_v52  ;;  %2261 = vmatprep.mubr.bf16.mxu0 %v845_v10  ;;  %v2203_v15 = vpop.f32.mrb[4].mxu0 }
 0x223   : > { %v855_v2 = vpack.c.bf16 %v802_v60, %v799_v55  ;;  %v639_v17 = vadd.f32 %v2203_v15, %v3433_v54  ;;  %v630_v18 = vpop.f32.mrb[5].mxu0 }
 0x224   : > { %v631_v20 = vadd.f32 %v3433_v54, %v630_v18  ;;  %v2204_v21 = vpop.f32.mrb[6].mxu0  ;;  %v3518_v18 = vld [vmem:[%s3388_s16 + $0x38] sm:$0xff] }
 0x225   : > { %v2239_v6 = vpop.f32.mrb[8].mxu1  ;;  %v642_v23 = vadd.f32 %v2204_v21, %v3433_v54  ;;  %v633_v24 = vpop.f32.mrb[7].mxu0  ;;  %vm997_vm7 = vcmp.eq.f32.partialorder %v3518_v18, 0.0 }
 0x226   : > { %2248 = vmatpush3.bf16.xpose.msra.mxu0 %v854_v49  ;;  %v823_v8 = vadd.f32 %v2239_v6, %v3426_v41  ;;  %v814_v9 = vpop.f32.mrb[9].mxu1  ;;  %v634_v25 = vadd.f32 %v3433_v54, %v633_v24 }
 0x227   : > { %2249 = vmatprep.subr.bf16.mxu0 %v855_v2  ;;  %v815_v11 = vadd.f32 %v3426_v41, %v814_v9  ;;  %v2240_v12 = vpop.f32.mrb[10].mxu1  ;;  %v848_v27 = vpack.c.bf16 %v642_v23, %v639_v17 }
 0x228   : > { %v826_v13 = vadd.f32 %v2240_v12, %v3426_v41  ;;  %v817_v14 = vpop.f32.mrb[11].mxu1  ;;  %v847_v30 = vpack.c.bf16 %v634_v25, %v631_v20  ;;  %v3510_v12 = vld [vmem:[%s3388_s16 + $0x28] sm:$0xff]  ;;  %v3537_v25 = vld [vmem:[%s3388_s16 + $0x40] sm:$0xff] }
 0x229   : > { %v818_v16 = vadd.f32 %v3426_v41, %v817_v14  ;;  %vm995_vm5 = vcmp.eq.f32.partialorder %v3510_v12, 0.0  ;;  %vm998_vm8 = vcmp.eq.f32.partialorder %v3537_v25, 0.0  ;;  %v2623_v25 = vld [vmem:[%s3380_s25 + $0x18] sm:$0xff] }
 0x22a   : > { %v858_v19 = vpack.c.bf16 %v826_v13, %v823_v8  ;;  %v2207_v35 = vpop.f32.mrb[8].mxu0  ;;  %v3498_v8 = vld [vmem:[%s3388_s16 + $0x20] sm:$0xff]  ;;  %v3513_v13 = vld [vmem:[%s3388_s16 + $0x30] sm:$0xff] }
 0x22b   : > { %v857_v22 = vpack.c.bf16 %v818_v16, %v815_v11  ;;  %v655_v37 = vadd.f32 %v2207_v35, %v3433_v54  ;;  %v646_v38 = vpop.f32.mrb[9].mxu0  ;;  %vm994_vm4 = vcmp.eq.f32.partialorder %v3498_v8, 0.0  ;;  %vm996_vm6 = vcmp.eq.f32.partialorder %v3513_v13, 0.0 }
 0x22c   : > { %v647_v40 = vadd.f32 %v3433_v54, %v646_v38  ;;  %v2208_v42 = vpop.f32.mrb[10].mxu0 }
 0x22d   : > { %v2243_v26 = vpop.f32.mrb[12].mxu1  ;;  %v658_v44 = vadd.f32 %v2208_v42, %v3433_v54  ;;  %v649_v45 = vpop.f32.mrb[11].mxu0  ;;  %v3573_v42 = vld [vmem:[%s3388_s16 + $0x60] sm:$0xff] }
 0x22e   : > { %2250 = vmatpush3.bf16.xpose.msra.mxu0 %v855_v2  ;;  %v839_v28 = vadd.f32 %v2243_v26, %v3426_v41  ;;  %v830_v29 = vpop.f32.mrb[13].mxu1  ;;  %v650_v46 = vadd.f32 %v3433_v54, %v649_v45  ;;  %v3483_v2 = vld [vmem:[%s3388_s16 + $0x8] sm:$0xff]  ;;  %vm1002_vm12 = vcmp.eq.f32.partialorder %v3573_v42, 0.0  ;;  %v2627_v42 = vld [vmem:[%s3380_s25 + $0x20] sm:$0xff] }
 0x22f   : > { %2251 = vmatprep.subr.bf16.mxu0 %v856_v63  ;;  %v831_v31 = vadd.f32 %v3426_v41, %v830_v29  ;;  %v2244_v32 = vpop.f32.mrb[14].mxu1  ;;  %v850_v47 = vpack.c.bf16 %v658_v44, %v655_v37  ;;  %vm991_vm3 = vcmp.eq.f32.partialorder %v3483_v2, 0.0  ;;  %v3548_v29 = vld [vmem:[%s3388_s16 + $0x50] sm:$0xff]  ;;  %v3581_v45 = vld [vmem:[%s3388_s16 + $0x68] sm:$0xff] }
 0x230   : > { %v842_v33 = vadd.f32 %v2244_v32, %v3426_v41  ;;  %v833_v34 = vpop.f32.mrb[15].mxu1  ;;  %v849_v48 = vpack.c.bf16 %v650_v46, %v647_v40  ;;  %vm1000_vm10 = vcmp.eq.f32.partialorder %v3548_v29, 0.0  ;;  %v3584_v46 = vld [vmem:[%s3388_s16 + $0x70] sm:$0xff]  ;;  %vm4127_vm13 = vcmp.eq.f32.partialorder %v3581_v45, 0.0 }
 0x231   : > { %v834_v36 = vadd.f32 %v3426_v41, %v833_v34  ;;  %v3553_v34 = vld [vmem:[%s3388_s16 + $0x58] sm:$0xff]  ;;  %vm4126_vm14 = vcmp.eq.f32.partialorder %v3584_v46, 0.0  ;;  %v2625_v29 = vld [vmem:[%s3380_s25 + $0x30] sm:$0xff] }
 0x232   : > { %v860_v39 = vpack.c.bf16 %v842_v33, %v839_v28  ;;  %v2211_v49 = vpop.f32.mrb[12].mxu0  ;;  %v3545_v28 = vld [vmem:[%s3388_s16 + $0x48] sm:$0xff]  ;;  %vm1001_vm11 = vcmp.eq.f32.partialorder %v3553_v34, 0.0 }
 0x233   : > { %v859_v43 = vpack.c.bf16 %v834_v36, %v831_v31  ;;  %v671_v41 = vadd.f32 %v2211_v49, %v3433_v54  ;;  %v662_v50 = vpop.f32.mrb[13].mxu0  ;;  %vm999_vm9 = vcmp.eq.f32.partialorder %v3545_v28, 0.0 }
 0x234   : > { %v663_v51 = vadd.f32 %v3433_v54, %v662_v50  ;;  %v2212_v52 = vpop.f32.mrb[14].mxu0  ;;  %v3589_v50 = vld [vmem:[%s3388_s16 + $0x78] sm:$0xff] }
 0x235   : > { %v674_v53 = vadd.f32 %v2212_v52, %v3433_v54  ;;  %v665_v55 = vpop.f32.mrb[15].mxu0  ;;  %vm4125_vm15 = vcmp.eq.f32.partialorder %v3589_v50, 0.0 }
 0x236   : > { %2252 = vmatpush3.bf16.xpose.msra.mxu0 %v856_v63  ;;  %v666_v56 = vadd.f32 %v3433_v54, %v665_v55  ;;  %v3472_v54 = vld [vmem:[%s3388_s16 + $0x10] sm:$0xff] }
 0x237   : > { %2253 = vmatprep.subr.bf16.mxu0 %v857_v22  ;;  %v852_v57 = vpack.c.bf16 %v674_v53, %v671_v41  ;;  %vm992_vm0 = vcmp.eq.f32.partialorder %v3472_v54, 0.0 }
 0x238   : > { %v851_v58 = vpack.c.bf16 %v666_v56, %v663_v51 }
 0x23e   : > { %2254 = vmatpush3.bf16.xpose.msra.mxu0 %v857_v22 }
 0x23f   : > { %2255 = vmatprep.subr.bf16.mxu0 %v858_v19 }
 0x246   : > { %2256 = vmatpush3.bf16.xpose.msra.mxu0 %v858_v19 }
 0x247   : > { %2257 = vmatprep.subr.bf16.mxu0 %v859_v43 }
 0x24e   : > { %2258 = vmatpush3.bf16.xpose.msra.mxu0 %v859_v43 }
 0x24f   : > { %2259 = vmatprep.subr.bf16.mxu0 %v860_v39 }
 0x256   : > { %2260 = vmatpush3.bf16.xpose.msra.mxu0 %v860_v39 }
 0x25d   : > { %2262 = vmatmul.mubr.bf16.vlgmr.msra.gmra.mrb[16].mxu0 %v846_v7 }
 0x25e   : > { %2265 = vmatprep.mubr.bf16.mxu0 %v847_v30 }
 0x265   : > { %2266 = vmatmul.mubr.bf16.gmra.mrb[20].mxu0 %v848_v27 }
 0x266   : > { %2269 = vmatprep.mubr.bf16.mxu0 %v849_v48 }
 0x26d   : > { %2270 = vmatmul.mubr.bf16.gmra.mrb[24].mxu0 %v850_v47 }
 0x26e   : > { %2273 = vmatprep.mubr.bf16.mxu0 %v851_v58 }
 0x275   : > { %2274 = vmatmul.mubr.bf16.gmra.mrb[28].mxu0 %v852_v57 }
 0x330   : > { %v2263_v60 = vpop.f32.mrb[16].mxu0 }
 0x331   : > { %v960_v62 = vmul.f32 0.25, %v2263_v60  ;;  %v895_v63 = vpop.f32.mrb[17].mxu0 }
 0x332   : > { %v958_v0 = vmul.f32 0.25, %v895_v63  ;;  %v2264_v1 = vpop.f32.mrb[18].mxu0 }
 0x333   : > { %v961_v3 = vmul.f32 0.25, %v2264_v1  ;;  %v898_v4 = vpop.f32.mrb[19].mxu0  ;;  %v3487_v5 = vsel %vm992_vm0, -32752.0, %v960_v62 }
 0x334   : > { %v959_v6 = vmul.f32 0.25, %v898_v4  ;;  %1026 = vmax.xlane.f32.xlu1 %v3487_v5  ;;  %v3492_v7 = vsel %vm990_vm1, -32752.0, %v958_v0 }
 0x335   : > { %1022 = vmax.xlane.f32.xlu0 %v3492_v7  ;;  %v3502_v9 = vsel %vm993_vm2, -32752.0, %v961_v3 }
 0x336   : > { %v3507_v11 = vsel %vm991_vm3, -32752.0, %v959_v6 }
 0x338   : > { %1028 = vmax.xlane.f32.xlu1 %v3502_v9  ;;  %v2267_v10 = vpop.f32.mrb[20].mxu0 }
 0x339   : > { %1024 = vmax.xlane.f32.xlu0 %v3507_v11  ;;  %v911_v14 = vpop.f32.mrb[21].mxu0  ;;  %v964_v15 = vmul.f32 0.25, %v2267_v10 }
 0x33a   : > { %v962_v16 = vmul.f32 0.25, %v911_v14  ;;  %v2268_v17 = vpop.f32.mrb[22].mxu0 }
 0x33b   : > { %v914_v19 = vpop.f32.mrb[23].mxu0  ;;  %v965_v20 = vmul.f32 0.25, %v2268_v17  ;;  %v3534_v24 = vsel %vm996_vm6, -32752.0, %v964_v15 }
 0x33c   : > { %v963_v21 = vmul.f32 0.25, %v914_v19  ;;  %v3524_v22 = vsel %vm994_vm4, -32752.0, %v962_v16 }
 0x33d   : > { %1030 = vmax.xlane.f32.xlu0 %v3524_v22  ;;  %v3542_v27 = vsel %vm997_vm7, -32752.0, %v965_v20 }
 0x33e   : > { %v3530_v23 = vsel %vm995_vm5, -32752.0, %v963_v21 }
 0x33f   : > { %1032 = vmax.xlane.f32.xlu1 %v3530_v23 }
 0x340   : > { %v2271_v26 = vpop.f32.mrb[24].mxu0 }
 0x341   : > { %1034 = vmax.xlane.f32.xlu0 %v3534_v24  ;;  %v927_v30 = vpop.f32.mrb[25].mxu0  ;;  %v968_v31 = vmul.f32 0.25, %v2271_v26 }
 0x342   : > { %v966_v32 = vmul.f32 0.25, %v927_v30  ;;  %v2272_v33 = vpop.f32.mrb[26].mxu0 }
 0x343   : > { %1036 = vmax.xlane.f32.xlu1 %v3542_v27  ;;  %v930_v35 = vpop.f32.mrb[27].mxu0  ;;  %v969_v36 = vmul.f32 0.25, %v2272_v33  ;;  %v3570_v40 = vsel %vm1000_vm10, -32752.0, %v968_v31 }
 0x344   : > { %v967_v37 = vmul.f32 0.25, %v930_v35  ;;  %v3560_v38 = vsel %vm998_vm8, -32752.0, %v966_v32 }
 0x345   : > { %1038 = vmax.xlane.f32.xlu0 %v3560_v38  ;;  %v3578_v44 = vsel %vm1001_vm11, -32752.0, %v969_v36 }
 0x346   : > { %v3566_v39 = vsel %vm999_vm9, -32752.0, %v967_v37 }
 0x347   : > { %1040 = vmax.xlane.f32.xlu1 %v3566_v39 }
 0x348   : > { %v2275_v43 = vpop.f32.mrb[28].mxu0 }
 0x349   : > { %1042 = vmax.xlane.f32.xlu0 %v3570_v40  ;;  %v943_v47 = vpop.f32.mrb[29].mxu0  ;;  %v972_v48 = vmul.f32 0.25, %v2275_v43 }
 0x34a   : > { %v970_v49 = vmul.f32 0.25, %v943_v47  ;;  %v2276_v41 = vpop.f32.mrb[30].mxu0 }
 0x34b   : > { %1044 = vmax.xlane.f32.xlu1 %v3578_v44  ;;  %v946_v51 = vpop.f32.mrb[31].mxu0  ;;  %v973_v52 = vmul.f32 0.25, %v2276_v41  ;;  %v3606_v57 = vsel %vm4126_vm14, -32752.0, %v972_v48  ;;  %vm3687_vm14 = vmneg %vm991_vm3 }
 0x34c   : > { %v971_v53 = vmul.f32 0.25, %v946_v51  ;;  %v3596_v55 = vsel %vm1002_vm12, -32752.0, %v970_v49  ;;  %vm3717_vm3 = vmneg %vm994_vm4 }
 0x34d   : > { %1046 = vmax.xlane.f32.xlu0 %v3596_v55  ;;  %v3611_v58 = vsel %vm4125_vm15, -32752.0, %v973_v52  ;;  %vm3681_vm15 = vmneg %vm990_vm1 }
 0x34e   : > { %v3602_v56 = vsel %vm4127_vm13, -32752.0, %v971_v53  ;;  %vm3693_vm13 = vmneg %vm992_vm0 }
 0x34f   : > { %1048 = vmax.xlane.f32.xlu1 %v3602_v56  ;;  %vm3699_vm1 = vmneg %vm993_vm2 }
 0x350   : > { %vm2045_vm0 = vmpackc.low %vm3687_vm14, %vm3681_vm15 }
 0x351   : > { %1050 = vmax.xlane.f32.xlu0 %v3606_v57  ;;  %vm2050_vm2 = vmpackc.low %vm3699_vm1, %vm3693_vm13 }
 0x352   : > { %vm3723_vm14 = vmneg %vm995_vm5 }
 0x353   : > { %1052 = vmax.xlane.f32.xlu1 %v3611_v58  ;;  %vm3729_vm13 = vmneg %vm996_vm6 }
 0x354   : > { %vm2055_vm4 = vmpackc.low %vm3723_vm14, %vm3717_vm3 }
 0x355   : > { %vm3741_vm5 = vmneg %vm997_vm7 }
 0x356   : > { %vm3747_vm6 = vmneg %vm998_vm8 }
 0x357   : > { %vm2060_vm7 = vmpackc.low %vm3741_vm5, %vm3729_vm13  ;;  %vm4190_vm13 = vcmp.eq.f32.partialorder %v3589_v50, 0.0 }
 0x358   : > { %vm3759_vm15 = vmneg %vm999_vm9 }
 0x359   : > { %vm3765_vm8 = vmneg %vm1000_vm10 }
 0x35a   : > { %vm2065_vm9 = vmpackc.low %vm3759_vm15, %vm3747_vm6 }
 0x35b   : > { %vm3777_vm1 = vmneg %vm1001_vm11 }
 0x35c   : > { %vm3783_vm10 = vmneg %vm1002_vm12  ;;  %vm4187_vm12 = vcmp.eq.f32.partialorder %v3584_v46, 0.0 }
 0x35d   : > { %vm2070_vm11 = vmpackc.low %vm3777_vm1, %vm3765_vm8 }
 0x35e   : > { %vm3801_vm3 = vmneg %vm4187_vm12 }
 0x3c1   : > { %v1027_v60 = vpop.xlane.xlu1 %1026 }
 0x3c2   : > { %v1056_v62 = vsub.f32 %v3487_v5, %v1027_v60  ;;  %v1023_v63 = vpop.xlane.xlu0 %1022 }
 0x3c3   : > { %v1054_v0 = vsub.f32 %v3492_v7, %v1023_v63 }
 0x3c4   : > { %v1074_v4 = vmul.f32 1.442695, %v1056_v62 }
 0x3c5   : > { %v1070_v1 = vmul.f32 1.442695, %v1054_v0  ;;  %v1029_v3 = vpop.xlane.xlu1 %1028 }
 0x3c6   : > { %v1057_v6 = vsub.f32 %v3502_v9, %v1029_v3  ;;  %v1025_v10 = vpop.xlane.xlu0 %1024 }
 0x3c7   : > { %2493 = vpow2.f32 %v1070_v1  ;;  %v1055_v14 = vsub.f32 %v3507_v11, %v1025_v10 }
 0x3c8   : > { %2495 = vpow2.f32 %v1074_v4  ;;  %v1076_v16 = vmul.f32 1.442695, %v1057_v6 }
 0x3c9   : > { %v1072_v15 = vmul.f32 1.442695, %v1055_v14 }
 0x3ca   : > { %v1031_v17 = vpop.xlane.xlu0 %1030 }
 0x3cb   : > { %2497 = vpow2.f32 %v1072_v15  ;;  %v1058_v19 = vsub.f32 %v3524_v22, %v1031_v17 }
 0x3cc   : > { %v1033_v5 = vpop.xlane.xlu1 %1032  ;;  %2499 = vpow2.f32 %v1076_v16 }
 0x3cd   : > { %v1078_v20 = vmul.f32 1.442695, %v1058_v19  ;;  %v1059_v7 = vsub.f32 %v3530_v23, %v1033_v5 }
 0x3ce   : > { %v1035_v21 = vpop.xlane.xlu0 %1034 }
 0x3cf   : > { %2501 = vpow2.f32 %v1078_v20  ;;  %v1080_v26 = vmul.f32 1.442695, %v1059_v7  ;;  %v1060_v9 = vsub.f32 %v3534_v24, %v1035_v21  ;;  %v2485_v7 = vld [vmem:[#allocation13] sm:$0xff]  }
 0x3d0   : > { %v1037_v30 = vpop.xlane.xlu1 %1036  ;;  %2309 = vmatprep.subr.bf16.mxu1 %v2485_v7 }
 0x3d1   : > { %v3622_v31 = vpop.eup %2493  ;;  %v1082_v11 = vmul.f32 1.442695, %v1060_v9  ;;  %v1061_v32 = vsub.f32 %v3542_v27, %v1037_v30  ;;  %2503 = vpow2.f32 %v1080_v26 }
 0x3d2   : > { %v1039_v33 = vpop.xlane.xlu0 %1038  ;;  %1102 = vadd.xlane.f32.xlu0 %v3622_v31  ;;  %v3627_v35 = vpop.eup %2495 }
 0x3d3   : > { %2505 = vpow2.f32 %v1082_v11  ;;  %v1084_v22 = vmul.f32 1.442695, %v1061_v32  ;;  %v1062_v23 = vsub.f32 %v3560_v38, %v1039_v33 }
 0x3d4   : > { %v1041_v36 = vpop.xlane.xlu1 %1040 }
 0x3d5   : > { %v3629_v37 = vpop.eup %2497  ;;  %v1086_v24 = vmul.f32 1.442695, %v1062_v23  ;;  %v1063_v43 = vsub.f32 %v3566_v39, %v1041_v36  ;;  %2507 = vpow2.f32 %v1084_v22 }
 0x3d6   : > { %v1043_v47 = vpop.xlane.xlu0 %1042  ;;  %1106 = vadd.xlane.f32.xlu0 %v3627_v35  ;;  %1104 = vadd.xlane.f32.xlu1 %v3629_v37  ;;  %v3635_v49 = vpop.eup %2499 }
 0x3d7   : > { %2509 = vpow2.f32 %v1086_v24  ;;  %v1088_v27 = vmul.f32 1.442695, %v1063_v43  ;;  %v1064_v48 = vsub.f32 %v3570_v40, %v1043_v47 }
 0x3d8   : > { %v1045_v38 = vpop.xlane.xlu1 %1044 }
 0x3d9   : > { %v3637_v41 = vpop.eup %2501  ;;  %v1090_v51 = vmul.f32 1.442695, %v1064_v48  ;;  %v1065_v52 = vsub.f32 %v3578_v44, %v1045_v38  ;;  %2511 = vpow2.f32 %v1088_v27  ;;  %v2491_v27 = vld [vmem:[#allocation13 + $0x30] sm:$0xff]  }
 0x3da   : > { %1110 = vadd.xlane.f32.xlu0 %v3637_v41  ;;  %v1047_v39 = vpop.xlane.xlu0 %1046  ;;  %1108 = vadd.xlane.f32.xlu1 %v3635_v49 }
 0x3db   : > { %2513 = vpow2.f32 %v1090_v51  ;;  %v1092_v53 = vmul.f32 1.442695, %v1065_v52  ;;  %v1066_v60 = vsub.f32 %v3596_v55, %v1047_v39  ;;  %v3643_v62 = vpop.eup %2503 }
 0x3dc   : > { %v1049_v40 = vpop.xlane.xlu1 %1048 }
 0x3dd   : > { %v3645_v63 = vpop.eup %2505  ;;  %v1094_v0 = vmul.f32 1.442695, %v1066_v60  ;;  %v1067_v1 = vsub.f32 %v3602_v56, %v1049_v40  ;;  %2515 = vpow2.f32 %v1092_v53 }
 0x3de   : > { %1114 = vadd.xlane.f32.xlu0 %v3645_v63  ;;  %v1051_v44 = vpop.xlane.xlu0 %1050  ;;  %1112 = vadd.xlane.f32.xlu1 %v3643_v62 }
 0x3df   : > { %2517 = vpow2.f32 %v1094_v0  ;;  %v1096_v3 = vmul.f32 1.442695, %v1067_v1  ;;  %v1068_v4 = vsub.f32 %v3606_v57, %v1051_v44  ;;  %v3651_v6 = vpop.eup %2507  ;;  %v2486_v0 = vld [vmem:[#allocation13 + $0x8] sm:$0xff]  }
 0x3e0   : > { %v1053_v55 = vpop.xlane.xlu1 %1052 }
 0x3e1   : > { %v3653_v10 = vpop.eup %2509  ;;  %v1098_v14 = vmul.f32 1.442695, %v1068_v4  ;;  %v1069_v15 = vsub.f32 %v3611_v58, %v1053_v55  ;;  %2519 = vpow2.f32 %v1096_v3  ;;  %v2487_v55 = vld [vmem:[#allocation13 + $0x10] sm:$0xff]  }
 0x3e2   : > { %1118 = vadd.xlane.f32.xlu0 %v3653_v10  ;;  %1116 = vadd.xlane.f32.xlu1 %v3651_v6 }
 0x3e3   : > { %2521 = vpow2.f32 %v1098_v14  ;;  %v1100_v56 = vmul.f32 1.442695, %v1069_v15  ;;  %v3658_v16 = vpop.eup %2511  ;;  %v2622_v15 = vld [vmem:[%s3380_s25] sm:$0xff] }
 0x3e5   : > { %v3660_v17 = vpop.eup %2513  ;;  %2523 = vpow2.f32 %v1100_v56 }
 0x3e6   : > { %1122 = vadd.xlane.f32.xlu0 %v3660_v17  ;;  %1120 = vadd.xlane.f32.xlu1 %v3658_v16 }
 0x3e7   : > { %v3664_v57 = vpop.eup %2515 }
 0x3e9   : > { %v3666_v19 = vpop.eup %2517 }
 0x3ea   : > { %1126 = vadd.xlane.f32.xlu0 %v3666_v19  ;;  %1124 = vadd.xlane.f32.xlu1 %v3664_v57 }
 0x3eb   : > { %v3670_v58 = vpop.eup %2519 }
 0x3ed   : > { %v3672_v5 = vpop.eup %2521 }
 0x3ee   : > { %1130 = vadd.xlane.f32.xlu0 %v3672_v5  ;;  %1128 = vadd.xlane.f32.xlu1 %v3670_v58 }
 0x3ef   : > { %v3676_v20 = vpop.eup %2523 }
 0x3f2   : > { %1132 = vadd.xlane.f32.xlu1 %v3676_v20 }
 0x45f   : > { %v1103_v21 = vpop.xlane.xlu0 %1102 }
 0x460   : > { %2525 = vrcp.f32 %v1103_v21 }
 0x463   : > { %v1107_v26 = vpop.xlane.xlu0 %1106  ;;  %v1105_v9 = vpop.xlane.xlu1 %1104 }
 0x464   : > { %2527 = vrcp.f32 %v1105_v9 }
 0x465   : > { %2529 = vrcp.f32 %v1107_v26 }
 0x467   : > { %v1111_v30 = vpop.xlane.xlu0 %1110  ;;  %v1109_v11 = vpop.xlane.xlu1 %1108 }
 0x468   : > { %2531 = vrcp.f32 %v1109_v11 }
 0x469   : > { %2533 = vrcp.f32 %v1111_v30 }
 0x46a   : > { %v2526_v22 = vpop.eup %2525 }
 0x46b   : > { %v1115_v32 = vpop.xlane.xlu0 %1114  ;;  %v1113_v33 = vpop.xlane.xlu1 %1112  ;;  %v1150_v2 = vmul.f32 %v2526_v22, %v3622_v31 }
 0x46c   : > { %2535 = vrcp.f32 %v1113_v33  ;;  %v2489_v33 = vld [vmem:[#allocation13 + $0x20] sm:$0xff]  }
 0x46d   : > { %2537 = vrcp.f32 %v1115_v32 }
 0x46e   : > { %v2528_v24 = vpop.eup %2527 }
 0x46f   : > { %v1119_v59 = vpop.xlane.xlu0 %1118  ;;  %v1117_v47 = vpop.xlane.xlu1 %1116  ;;  %v1151_v48 = vmul.f32 %v2528_v24, %v3629_v37  ;;  %v2490_v24 = vld [vmem:[#allocation13 + $0x28] sm:$0xff]  }
 0x470   : > { %v2530_v38 = vpop.eup %2529  ;;  %2539 = vrcp.f32 %v1117_v47 }
 0x471   : > { %v2046_v54 = vpack.c.bf16 %v1151_v48, %v1150_v2  ;;  %2541 = vrcp.f32 %v1119_v59  ;;  %v1152_v31 = vmul.f32 %v2530_v38, %v3627_v35 }
 0x472   : > { %v2532_v51 = vpop.eup %2531 }
 0x473   : > { %v1123_v52 = vpop.xlane.xlu0 %1122  ;;  %v1121_v61 = vpop.xlane.xlu1 %1120  ;;  %v1153_v37 = vmul.f32 %v2532_v51, %v3635_v49  ;;  %2293 = vmatprep.mubr.msk.bf16.mxu1 %vm2045_vm0, %v2046_v54  ;;  %vm4184_vm0 = vcmp.eq.f32.partialorder %v3581_v45, 0.0 }
 0x474   : > { %v2534_v39 = vpop.eup %2533  ;;  %2543 = vrcp.f32 %v1121_v61 }
 0x475   : > { %v2051_v40 = vpack.c.bf16 %v1153_v37, %v1152_v31  ;;  %2545 = vrcp.f32 %v1123_v52  ;;  %v1154_v44 = vmul.f32 %v2534_v39, %v3637_v41 }
 0x476   : > { %v2536_v35 = vpop.eup %2535 }
 0x477   : > { %v1127_v49 = vpop.xlane.xlu0 %1126  ;;  %v1125_v1 = vpop.xlane.xlu1 %1124  ;;  %2294 = vmatmul.mubr.msk.bf16.vlgmr.msra.gmra.mrb[16].mxu1 %vm2050_vm2, %v2051_v40  ;;  %v1155_v12 = vmul.f32 %v2536_v35, %v3643_v62  ;;  %vm3795_vm2 = vmneg %vm4184_vm0 }
 0x478   : > { %v2538_v3 = vpop.eup %2537  ;;  %2547 = vrcp.f32 %v1125_v1  ;;  %2310 = vmatpush3.bf16.msra.mxu1 %v2485_v7  ;;  %vm2075_vm14 = vmpackc.low %vm3795_vm2, %vm3783_vm10 }
 0x479   : > { %v2056_v4 = vpack.c.bf16 %v1155_v12, %v1154_v44  ;;  %2311 = vmatprep.subr.bf16.mxu1 %v2486_v0  ;;  %2549 = vrcp.f32 %v1127_v49  ;;  %v1156_v18 = vmul.f32 %v2538_v3, %v3645_v63  ;;  %v2488_v63 = vld [vmem:[#allocation13 + $0x18] sm:$0xff]  }
 0x47a   : > { %v2540_v41 = vpop.eup %2539 }
 0x47b   : > { %v1131_v62 = vpop.xlane.xlu0 %1130  ;;  %v1129_v14 = vpop.xlane.xlu1 %1128  ;;  %2297 = vmatprep.mubr.msk.bf16.mxu1 %vm2055_vm4, %v2056_v4  ;;  %v1157_v56 = vmul.f32 %v2540_v41, %v3651_v6  ;;  %vm2078_vm4 = vmneg %vm4190_vm13  ;;  %v2621_v41 = vld [vmem:[%s3380_s25 + $0x10] sm:$0xff] }
 0x47c   : > { %v2542_v7 = vpop.eup %2541  ;;  %2551 = vrcp.f32 %v1129_v14  ;;  %2312 = vmatpush3.bf16.msra.mxu1 %v2486_v0  ;;  %vm2080_vm5 = vmpackc.low %vm2078_vm4, %vm3801_vm3 }
 0x47d   : > { %2553 = vrcp.f32 %v1131_v62  ;;  %v2061_v21 = vpack.c.bf16 %v1157_v56, %v1156_v18  ;;  %2313 = vmatprep.subr.bf16.mxu1 %v2487_v55  ;;  %v1158_v28 = vmul.f32 %v2542_v7, %v3653_v10  ;;  %v2626_v10 = vld [vmem:[%s3380_s25 + $0x38] sm:$0xff] }
 0x47e   : > { %v2544_v26 = vpop.eup %2543 }
 0x47f   : > { %v1133_v6 = vpop.xlane.xlu1 %1132  ;;  %2298 = vmatmul.mubr.msk.bf16.gmra.mrb[20].mxu1 %vm2060_vm7, %v2061_v21  ;;  %v1159_v30 = vmul.f32 %v2544_v26, %v3658_v16  ;;  %v2546_v11 = vpop.eup %2545 }
 0x480   : > { %2555 = vrcp.f32 %v1133_v6  ;;  %2314 = vmatpush3.bf16.msra.mxu1 %v2487_v55  ;;  %v1160_v16 = vmul.f32 %v2546_v11, %v3660_v17  ;;  %v2624_v6 = vld [vmem:[%s3380_s25 + $0x8] sm:$0xff] }
 0x481   : > { %v2066_v32 = vpack.c.bf16 %v1159_v30, %v1158_v28  ;;  %2315 = vmatprep.subr.bf16.mxu1 %v2488_v63 }
 0x482   : > { %v2548_v22 = vpop.eup %2547 }
 0x483   : > { %2301 = vmatprep.mubr.msk.bf16.mxu1 %vm2065_vm9, %v2066_v32  ;;  %v1161_v23 = vmul.f32 %v2548_v22, %v3664_v57  ;;  %v2550_v34 = vpop.eup %2549 }
 0x484   : > { %2316 = vmatpush3.bf16.msra.mxu1 %v2488_v63  ;;  %v1162_v59 = vmul.f32 %v2550_v34, %v3666_v19 }
 0x485   : > { %v2071_v36 = vpack.c.bf16 %v1161_v23, %v1160_v16  ;;  %2317 = vmatprep.subr.bf16.mxu1 %v2489_v33 }
 0x486   : > { %v2552_v43 = vpop.eup %2551 }
 0x487   : > { %v2554_v17 = vpop.eup %2553  ;;  %2302 = vmatmul.mubr.msk.bf16.gmra.mrb[24].mxu1 %vm2070_vm11, %v2071_v36  ;;  %v1163_v45 = vmul.f32 %v2552_v43, %v3670_v58  ;;  %v2492_v58 = vld [vmem:[#allocation13 + $0x38] sm:$0xff]  }
 0x488   : > { %2318 = vmatpush3.bf16.msra.mxu1 %v2489_v33  ;;  %v1164_v2 = vmul.f32 %v2554_v17, %v3672_v5  ;;  %v2628_v17 = vld [vmem:[%s3380_s25 + $0x28] sm:$0xff] }
 0x489   : > { %v2076_v46 = vpack.c.bf16 %v1163_v45, %v1162_v59  ;;  %2319 = vmatprep.subr.bf16.mxu1 %v2490_v24 }
 0x48a   : > { %v2556_v47 = vpop.eup %2555 }
 0x48b   : > { %v1165_v48 = vmul.f32 %v2556_v47, %v3676_v20  ;;  %2305 = vmatprep.mubr.msk.bf16.mxu1 %vm2075_vm14, %v2076_v46 }
 0x48c   : > { %2320 = vmatpush3.bf16.msra.mxu1 %v2490_v24 }
 0x48d   : > { %v2081_v19 = vpack.c.bf16 %v1165_v48, %v1164_v2  ;;  %2321 = vmatprep.subr.bf16.mxu1 %v2491_v27 }
 0x48f   : > { %2306 = vmatmul.mubr.msk.bf16.gmra.mrb[28].mxu1 %vm2080_vm5, %v2081_v19 }
 0x490   : > { %2322 = vmatpush3.bf16.msra.mxu1 %v2491_v27 }
 0x491   : > { %2323 = vmatprep.subr.bf16.mxu1 %v2492_v58 }
 0x494   : > { %2324 = vmatpush3.bf16.msra.mxu1 %v2492_v58 }
 0x54a   : > { %v2295_v50 = vpop.f32.mrb[16].mxu1 }
 0x54b   : > { %v1224_v38 = vpop.f32.mrb[17].mxu1 }
 0x54c   : > { %v2296_v54 = vpop.f32.mrb[18].mxu1 }
 0x54d   : > { %v1288_v51 = vpack.c.bf16 %v2296_v54, %v2295_v50  ;;  %v1227_v52 = vpop.f32.mrb[19].mxu1 }
 0x54e   : > { %v1287_v5 = vpack.c.bf16 %v1227_v52, %v1224_v38 }
 0x550   : > { %2325 = vmatprep.mubr.bf16.mxu1 %v1287_v5 }
 0x551   : > { %2326 = vmatmul.mubr.bf16.vlgmr.msra.gmra.mrb[32].mxu1 %v1288_v51 }
 0x552   : > { %v2299_v20 = vpop.f32.mrb[20].mxu1 }
 0x553   : > { %v1240_v61 = vpop.f32.mrb[21].mxu1 }
 0x554   : > { %v2300_v31 = vpop.f32.mrb[22].mxu1 }
 0x555   : > { %v1290_v37 = vpack.c.bf16 %v2300_v31, %v2299_v20  ;;  %v1243_v39 = vpop.f32.mrb[23].mxu1 }
 0x556   : > { %v1289_v53 = vpack.c.bf16 %v1243_v39, %v1240_v61 }
 0x558   : > { %2329 = vmatprep.mubr.bf16.mxu1 %v1289_v53 }
 0x559   : > { %2330 = vmatmul.mubr.bf16.gmra.mrb[36].mxu1 %v1290_v37 }
 0x55a   : > { %v2303_v60 = vpop.f32.mrb[24].mxu1 }
 0x55b   : > { %v1256_v40 = vpop.f32.mrb[25].mxu1 }
 0x55c   : > { %v2304_v0 = vpop.f32.mrb[26].mxu1 }
 0x55d   : > { %v1292_v35 = vpack.c.bf16 %v2304_v0, %v2303_v60  ;;  %v1259_v49 = vpop.f32.mrb[27].mxu1 }
 0x55e   : > { %v1291_v1 = vpack.c.bf16 %v1259_v49, %v1256_v40  ;;  %v2629_v40 = vld [vmem:[%s3380_s25 + $0x50] sm:$0xff] }
 0x560   : > { %2333 = vmatprep.mubr.bf16.mxu1 %v1291_v1 }
 0x561   : > { %2334 = vmatmul.mubr.bf16.gmra.mrb[40].mxu1 %v1292_v35 }
 0x562   : > { %v2307_v8 = vpop.f32.mrb[28].mxu1 }
 0x563   : > { %v1272_v44 = vpop.f32.mrb[29].mxu1 }
 0x564   : > { %v2308_v12 = vpop.f32.mrb[30].mxu1 }
 0x565   : > { %v1294_v3 = vpack.c.bf16 %v2308_v12, %v2307_v8  ;;  %v1275_v13 = vpop.f32.mrb[31].mxu1 }
 0x566   : > { %v1293_v4 = vpack.c.bf16 %v1275_v13, %v1272_v44  ;;  %v2630_v44 = vld [vmem:[%s3380_s25 + $0x58] sm:$0xff] }
 0x568   : > { %2337 = vmatprep.mubr.bf16.mxu1 %v1293_v4 }
 0x569   : > { %2338 = vmatmul.mubr.bf16.gmra.mrb[44].mxu1 %v1294_v3 }
 0x624   : > { %v2327_v55 = vpop.f32.mrb[32].mxu1 }
 0x625   : > { %v1458_v62 = vadd.f32 %v2621_v41, %v2327_v55  ;;  %v1393_v14 = vpop.f32.mrb[33].mxu1  ;;  %v2631_v41 = vld [vmem:[%s3380_s25 + $0x40] sm:$0xff] }
 0x626   : > { %v1456_v18 = vadd.f32 %v2622_v15, %v1393_v14  ;;  %v2328_v56 = vpop.f32.mrb[34].mxu1 }
 0x627   : > { %v1490_v7 = vmul.f32 0.70710677, %v1458_v62  ;;  %v1459_v21 = vadd.f32 %v2623_v25, %v2328_v56  ;;  %v1396_v63 = vpop.f32.mrb[35].mxu1  ;;  %v1474_v45 = vmul.f32 0.5, %v1458_v62 }
 0x628   : > { %v1488_v26 = vmul.f32 0.70710677, %v1456_v18  ;;  %v1457_v9 = vadd.f32 %v2624_v6, %v1396_v63  ;;  %v1472_v20 = vmul.f32 0.5, %v1456_v18 }
 0x629   : > { %2557 = verf.f32 %v1490_v7  ;;  %v1491_v28 = vmul.f32 0.70710677, %v1459_v21  ;;  %v1475_v50 = vmul.f32 0.5, %v1459_v21  ;;  %v2632_v7 = vld [vmem:[%s3380_s25 + $0x48] sm:$0xff] }
 0x62a   : > { %2559 = verf.f32 %v1488_v26  ;;  %v1489_v30 = vmul.f32 0.70710677, %v1457_v9  ;;  %v1473_v37 = vmul.f32 0.5, %v1457_v9 }
 0x62b   : > { %2561 = verf.f32 %v1491_v28 }
 0x62c   : > { %2563 = verf.f32 %v1489_v30  ;;  %v2331_v11 = vpop.f32.mrb[36].mxu1 }
 0x62d   : > { %v3822_v32 = vadd.f32 %v2625_v29, %v2331_v11  ;;  %v1409_v33 = vpop.f32.mrb[37].mxu1 }
 0x62e   : > { %v2332_v22 = vpop.f32.mrb[38].mxu1  ;;  %v3829_v36 = vadd.f32 %v2627_v42, %v1409_v33 }
 0x62f   : > { %v3825_v16 = vadd.f32 %v2626_v10, %v2332_v22  ;;  %v1412_v23 = vpop.f32.mrb[39].mxu1  ;;  %v1494_v34 = vmul.f32 0.70710677, %v3822_v32  ;;  %v1478_v21 = vmul.f32 0.5, %v3822_v32 }
 0x630   : > { %v3833_v57 = vadd.f32 %v2628_v17, %v1412_v23  ;;  %v1492_v2 = vmul.f32 0.70710677, %v3829_v36  ;;  %v1476_v32 = vmul.f32 0.5, %v3829_v36 }
 0x631   : > { %v1495_v43 = vmul.f32 0.70710677, %v3825_v16  ;;  %2565 = verf.f32 %v1494_v34  ;;  %v1479_v30 = vmul.f32 0.5, %v3825_v16  ;;  %v2633_v34 = vld [vmem:[%s3380_s25 + $0x70] sm:$0xff] }
 0x632   : > { %v1493_v52 = vmul.f32 0.70710677, %v3833_v57  ;;  %v1477_v10 = vmul.f32 0.5, %v3833_v57 }
 0x633   : > { %v2558_v24 = vpop.eup %2557  ;;  %2567 = verf.f32 %v1495_v43  ;;  %v2634_v43 = vld [vmem:[%s3380_s25 + $0x78] sm:$0xff] }
 0x634   : > { %v2560_v59 = vpop.eup %2559  ;;  %v1522_v47 = vadd.f32 1.0, %v2558_v24  ;;  %v2335_v46 = vpop.f32.mrb[40].mxu1  ;;  %2569 = verf.f32 %v1492_v2 }
 0x635   : > { %v2562_v27 = vpop.eup %2561  ;;  %v1425_v48 = vpop.f32.mrb[41].mxu1  ;;  %v1520_v58 = vadd.f32 1.0, %v2560_v59  ;;  %2571 = verf.f32 %v1493_v52  ;;  %v3849_v0 = vadd.f32 %v2629_v40, %v2335_v46 }
 0x636   : > { %v2564_v19 = vpop.eup %2563  ;;  %v1523_v38 = vadd.f32 1.0, %v2562_v27  ;;  %v2336_v54 = vpop.f32.mrb[42].mxu1  ;;  %v3836_v51 = vmul.f32 %v1522_v47, %v1474_v45  ;;  %v3861_v62 = vadd.f32 %v2631_v41, %v1425_v48  ;;  %v2635_v47 = vld [vmem:[%s3380_s25 + $0x60] sm:$0xff] }
 0x637   : > { %v1428_v5 = vpop.f32.mrb[43].mxu1  ;;  %v1521_v61 = vadd.f32 1.0, %v2564_v19  ;;  %v3843_v39 = vmul.f32 %v1520_v58, %v1472_v20  ;;  %v3855_v12 = vadd.f32 %v2630_v44, %v2336_v54  ;;  %v1498_v55 = vmul.f32 0.70710677, %v3849_v0  ;;  %v2636_v58 = vld [vmem:[%s3380_s25 + $0x68] sm:$0xff] }
 0x638   : > { %1556 = vadd.xlane.f32.xlu0 %v3836_v51  ;;  %v3840_v31 = vmul.f32 %v1523_v38, %v1475_v50  ;;  %v1602_v1 = vmul.f32 %v3836_v51, %v3836_v51  ;;  %v1465_v25 = vadd.f32 %v2632_v7, %v1428_v5  ;;  %v1496_v9 = vmul.f32 0.70710677, %v3861_v62 }
 0x639   : > { %v3846_v60 = vmul.f32 %v1521_v61, %v1473_v37  ;;  %v1600_v15 = vmul.f32 %v3843_v39, %v3843_v39  ;;  %v1499_v56 = vmul.f32 0.70710677, %v3855_v12  ;;  %2573 = verf.f32 %v1498_v55 }
 0x63a   : > { %1558 = vadd.xlane.f32.xlu1 %v3840_v31  ;;  %v1603_v13 = vmul.f32 %v3840_v31, %v3840_v31  ;;  %v1497_v29 = vmul.f32 0.70710677, %v1465_v25  ;;  %v1482_v38 = vmul.f32 0.5, %v3849_v0  ;;  %v1483_v37 = vmul.f32 0.5, %v3855_v12 }
 0x63b   : > { %v2566_v8 = vpop.eup %2565  ;;  %v1601_v26 = vmul.f32 %v3846_v60, %v3846_v60  ;;  %2575 = verf.f32 %v1499_v56 }
 0x63c   : > { %1552 = vadd.xlane.f32.xlu0 %v3843_v39  ;;  %v2339_v53 = vpop.f32.mrb[44].mxu1  ;;  %v1526_v14 = vadd.f32 1.0, %v2566_v8  ;;  %2577 = verf.f32 %v1496_v9 }
 0x63d   : > { %v1441_v35 = vpop.f32.mrb[45].mxu1  ;;  %v2568_v4 = vpop.eup %2567  ;;  %2579 = verf.f32 %v1497_v29  ;;  %v1470_v42 = vadd.f32 %v2633_v34, %v2339_v53 }
 0x63e   : > { %1554 = vadd.xlane.f32.xlu1 %v3846_v60  ;;  %v2340_v49 = vpop.f32.mrb[46].mxu1  ;;  %v2570_v18 = vpop.eup %2569  ;;  %v1527_v63 = vadd.f32 1.0, %v2568_v4  ;;  %v3872_v11 = vmul.f32 %v1526_v14, %v1478_v21  ;;  %v1468_v46 = vadd.f32 %v2635_v47, %v1441_v35  ;;  %v1480_v35 = vmul.f32 0.5, %v3861_v62 }
 0x63f   : > { %v1444_v3 = vpop.f32.mrb[47].mxu1  ;;  %v2572_v6 = vpop.eup %2571  ;;  %v1524_v28 = vadd.f32 1.0, %v2570_v18  ;;  %v1471_v17 = vadd.f32 %v2634_v43, %v2340_v49  ;;  %v1502_v45 = vmul.f32 0.70710677, %v1470_v42  ;;  %v1486_v14 = vmul.f32 0.5, %v1470_v42 }
 0x640   : > { %1620 = vadd.xlane.f32.xlu0 %v1602_v1  ;;  %v1525_v33 = vadd.f32 1.0, %v2572_v6  ;;  %v3876_v22 = vmul.f32 %v1527_v63, %v1479_v30  ;;  %v1606_v36 = vmul.f32 %v3872_v11, %v3872_v11  ;;  %v1469_v50 = vadd.f32 %v2636_v58, %v1444_v3 }
 0x641   : > { %v3880_v16 = vmul.f32 %v1524_v28, %v1476_v32  ;;  %v1503_v19 = vmul.f32 0.70710677, %v1471_v17  ;;  %2581 = verf.f32 %v1502_v45  ;;  %v1500_v20 = vmul.f32 0.70710677, %v1468_v46 }
 0x642   : > { %1622 = vadd.xlane.f32.xlu1 %v1603_v13  ;;  %v3883_v23 = vmul.f32 %v1525_v33, %v1477_v10  ;;  %v1607_v57 = vmul.f32 %v3876_v22, %v3876_v22  ;;  %v1501_v40 = vmul.f32 0.70710677, %v1469_v50  ;;  %v1481_v1 = vmul.f32 0.5, %v1465_v25 }
 0x643   : > { %v2574_v24 = vpop.eup %2573  ;;  %v1604_v2 = vmul.f32 %v3880_v16, %v3880_v16  ;;  %2583 = verf.f32 %v1503_v19  ;;  %v1487_v25 = vmul.f32 0.5, %v1471_v17  ;;  %v1484_v63 = vmul.f32 0.5, %v1468_v46 }
 0x644   : > { %1616 = vadd.xlane.f32.xlu0 %v1600_v15  ;;  %v1530_v27 = vadd.f32 1.0, %v2574_v24  ;;  %v1605_v52 = vmul.f32 %v3883_v23, %v3883_v23  ;;  %2585 = verf.f32 %v1500_v20  ;;  %v1485_v9 = vmul.f32 0.5, %v1469_v50 }
 0x645   : > { %v2576_v59 = vpop.eup %2575  ;;  %2587 = verf.f32 %v1501_v40 }
 0x646   : > { %1618 = vadd.xlane.f32.xlu1 %v1601_v26  ;;  %v2578_v48 = vpop.eup %2577  ;;  %v1531_v54 = vadd.f32 1.0, %v2576_v59  ;;  %v3900_v53 = vmul.f32 %v1530_v27, %v1482_v38 }
 0x647   : > { %v2580_v5 = vpop.eup %2579  ;;  %v1528_v61 = vadd.f32 1.0, %v2578_v48 }
 0x648   : > { %1564 = vadd.xlane.f32.xlu0 %v3872_v11  ;;  %v1529_v49 = vadd.f32 1.0, %v2580_v5  ;;  %v3904_v0 = vmul.f32 %v1531_v54, %v1483_v37  ;;  %v1610_v12 = vmul.f32 %v3900_v53, %v3900_v53 }
 0x649   : > { %v3907_v8 = vmul.f32 %v1528_v61, %v1480_v35 }
 0x64a   : > { %1566 = vadd.xlane.f32.xlu1 %v3876_v22  ;;  %v3910_v44 = vmul.f32 %v1529_v49, %v1481_v1  ;;  %v1611_v13 = vmul.f32 %v3904_v0, %v3904_v0 }
 0x64b   : > { %v2582_v3 = vpop.eup %2581  ;;  %v1608_v41 = vmul.f32 %v3907_v8, %v3907_v8 }
 0x64c   : > { %1560 = vadd.xlane.f32.xlu0 %v3880_v16  ;;  %v1534_v55 = vadd.f32 1.0, %v2582_v3  ;;  %v1609_v18 = vmul.f32 %v3910_v44, %v3910_v44 }
 0x64d   : > { %v2584_v4 = vpop.eup %2583 }
 0x64e   : > { %1562 = vadd.xlane.f32.xlu1 %v3883_v23  ;;  %v2586_v62 = vpop.eup %2585  ;;  %v1535_v15 = vadd.f32 1.0, %v2584_v4  ;;  %v3921_v21 = vmul.f32 %v1534_v55, %v1486_v14 }
 0x64f   : > { %v2588_v56 = vpop.eup %2587  ;;  %v1532_v7 = vadd.f32 1.0, %v2586_v62 }
 0x650   : > { %1628 = vadd.xlane.f32.xlu0 %v1606_v36  ;;  %v1533_v26 = vadd.f32 1.0, %v2588_v56  ;;  %v3924_v6 = vmul.f32 %v1535_v15, %v1487_v25  ;;  %v1614_v33 = vmul.f32 %v3921_v21, %v3921_v21 }
 0x651   : > { %v3927_v28 = vmul.f32 %v1532_v7, %v1484_v63 }
 0x652   : > { %1630 = vadd.xlane.f32.xlu1 %v1607_v57  ;;  %v3930_v30 = vmul.f32 %v1533_v26, %v1485_v9  ;;  %v1615_v10 = vmul.f32 %v3924_v6, %v3924_v6 }
 0x653   : > { %v1612_v29 = vmul.f32 %v3927_v28, %v3927_v28 }
 0x654   : > { %1624 = vadd.xlane.f32.xlu0 %v1604_v2  ;;  %v1613_v32 = vmul.f32 %v3930_v30, %v3930_v30 }
 0x656   : > { %1626 = vadd.xlane.f32.xlu1 %v1605_v52 }
 0x658   : > { %1572 = vadd.xlane.f32.xlu0 %v3900_v53 }
 0x65a   : > { %1574 = vadd.xlane.f32.xlu1 %v3904_v0 }
 0x65c   : > { %1568 = vadd.xlane.f32.xlu0 %v3907_v8 }
 0x65e   : > { %1570 = vadd.xlane.f32.xlu1 %v3910_v44 }
 0x660   : > { %1636 = vadd.xlane.f32.xlu0 %v1610_v12 }
 0x662   : > { %1638 = vadd.xlane.f32.xlu1 %v1611_v13 }
 0x664   : > { %1632 = vadd.xlane.f32.xlu0 %v1608_v41 }
 0x666   : > { %1634 = vadd.xlane.f32.xlu1 %v1609_v18  ;;  %v3950_v18 = vld [vmem:[#allocation14] ss:$0 sm:$0xff] }
 0x668   : > { %1580 = vadd.xlane.f32.xlu0 %v3921_v21 }
 0x66a   : > { %1582 = vadd.xlane.f32.xlu1 %v3924_v6 }
 0x66c   : > { %1576 = vadd.xlane.f32.xlu0 %v3927_v28 }
 0x66e   : > { %1578 = vadd.xlane.f32.xlu1 %v3930_v30 }
 0x670   : > { %1640 = vadd.xlane.f32.xlu0 %v1612_v29 }
 0x672   : > { %1642 = vadd.xlane.f32.xlu1 %v1613_v32 }
 0x674   : > { %1644 = vadd.xlane.f32.xlu0 %v1614_v33  ;;  %v3959_v33 = vld [vmem:[#allocation16] ss:$0 sm:$0xff] }
 0x676   : > { %1646 = vadd.xlane.f32.xlu1 %v1615_v10 }
 0x6c5   : > { %v1557_v34 = vpop.xlane.xlu0 %1556 }
 0x6c6   : > { %v1586_v24 = vmul.f32 0.03125, %v1557_v34 }
 0x6c7   : > { %v1559_v42 = vpop.xlane.xlu1 %1558 }
 0x6c8   : > { %v1587_v17 = vmul.f32 0.03125, %v1559_v42  ;;  %v1666_v59 = vmul.f32 %v1586_v24, %v1586_v24  ;;  %v1698_v62 = vsub.f32 %v3836_v51, %v1586_v24 }
 0x6c9   : > { %v1553_v36 = vpop.xlane.xlu0 %1552 }
 0x6ca   : > { %v1584_v45 = vmul.f32 0.03125, %v1553_v36  ;;  %v1667_v2 = vmul.f32 %v1587_v17, %v1587_v17  ;;  %v1699_v63 = vsub.f32 %v3840_v31, %v1587_v17 }
 0x6cb   : > { %v1555_v43 = vpop.xlane.xlu1 %1554 }
 0x6cc   : > { %v3941_v46 = vmul.f32 0.03125, %v1555_v43  ;;  %v1664_v50 = vmul.f32 %v1584_v45, %v1584_v45  ;;  %v1696_v42 = vsub.f32 %v3843_v39, %v1584_v45 }
 0x6cd   : > { %v1621_v57 = vpop.xlane.xlu0 %1620 }
 0x6ce   : > { %v1650_v47 = vmul.f32 0.03125, %v1621_v57  ;;  %v1665_v5 = vmul.f32 %v3941_v46, %v3941_v46  ;;  %v1697_v36 = vsub.f32 %v3846_v60, %v3941_v46 }
 0x6cf   : > { %v1623_v27 = vpop.xlane.xlu1 %1622 }
 0x6d0   : > { %v1682_v48 = vsub.f32 %v1650_v47, %v1666_v59  ;;  %v1651_v19 = vmul.f32 0.03125, %v1623_v27 }
 0x6d1   : > { %v1617_v58 = vpop.xlane.xlu0 %1616 }
 0x6d2   : > { %v1714_v38 = vadd.f32 1e-05, %v1682_v48  ;;  %v1683_v54 = vsub.f32 %v1651_v19, %v1667_v2  ;;  %v1648_v52 = vmul.f32 0.03125, %v1617_v58 }
 0x6d3   : > { %v1619_v20 = vpop.xlane.xlu1 %1618 }
 0x6d4   : > { %2589 = vrsqrt.f32 %v1714_v38  ;;  %v1715_v61 = vadd.f32 1e-05, %v1683_v54  ;;  %v1680_v37 = vsub.f32 %v1648_v52, %v1664_v50  ;;  %v1649_v40 = vmul.f32 0.03125, %v1619_v20 }
 0x6d5   : > { %v1565_v35 = vpop.xlane.xlu0 %1564 }
 0x6d6   : > { %2591 = vrsqrt.f32 %v1715_v61  ;;  %v1712_v49 = vadd.f32 1e-05, %v1680_v37  ;;  %v1681_v1 = vsub.f32 %v1649_v40, %v1665_v5  ;;  %v3945_v4 = vmul.f32 0.03125, %v1565_v35 }
 0x6d7   : > { %v1567_v12 = vpop.xlane.xlu1 %1566 }
 0x6d8   : > { %2593 = vrsqrt.f32 %v1712_v49  ;;  %v1713_v3 = vadd.f32 1e-05, %v1681_v1  ;;  %v3947_v41 = vmul.f32 0.03125, %v1567_v12  ;;  %v1670_v56 = vmul.f32 %v3945_v4, %v3945_v4 }
 0x6d9   : > { %v1561_v13 = vpop.xlane.xlu0 %1560 }
 0x6da   : > { %2595 = vrsqrt.f32 %v1713_v3  ;;  %v3954_v7 = vmul.f32 0.03125, %v1561_v13  ;;  %v1671_v51 = vmul.f32 %v3947_v41, %v3947_v41 }
 0x6db   : > { %v1563_v55 = vpop.xlane.xlu1 %1562 }
 0x6dc   : > { %v3957_v9 = vmul.f32 0.03125, %v1563_v55  ;;  %v1668_v57 = vmul.f32 %v3954_v7, %v3954_v7 }
 0x6dd   : > { %v1629_v14 = vpop.xlane.xlu0 %1628 }
 0x6de   : > { %v2590_v15 = vpop.eup %2589  ;;  %v1654_v25 = vmul.f32 0.03125, %v1629_v14  ;;  %v1669_v60 = vmul.f32 %v3957_v9, %v3957_v9 }
 0x6df   : > { %v1746_v26 = vmul.f32 %v2590_v15, %v1698_v62  ;;  %v1631_v29 = vpop.xlane.xlu1 %1630  ;;  %v1702_v62 = vsub.f32 %v3872_v11, %v3945_v4 }
 0x6e0   : > { %v2592_v32 = vpop.eup %2591  ;;  %v1686_v10 = vsub.f32 %v1654_v25, %v1670_v56  ;;  %v1655_v34 = vmul.f32 0.03125, %v1631_v29 }
 0x6e1   : > { %v1769_v24 = vmul.f32 %v3950_v18, %v1746_v26  ;;  %v1747_v31 = vmul.f32 %v2592_v32, %v1699_v63  ;;  %v1625_v43 = vpop.xlane.xlu0 %1624  ;;  %v1703_v26 = vsub.f32 %v3876_v22, %v3947_v41 }
 0x6e2   : > { %v2594_v17 = vpop.eup %2593  ;;  %v1718_v59 = vadd.f32 1e-05, %v1686_v10  ;;  %v1687_v47 = vsub.f32 %v1655_v34, %v1671_v51  ;;  %v1652_v27 = vmul.f32 0.03125, %v1625_v43 }
 0x6e3   : > { %v1792_v2 = vadd.f32 %v3959_v33, %v1769_v24  ;;  %v1770_v48 = vmul.f32 %v3950_v18, %v1747_v31  ;;  %v1744_v39 = vmul.f32 %v2594_v17, %v1696_v42  ;;  %v1627_v45 = vpop.xlane.xlu1 %1626  ;;  %v1700_v42 = vsub.f32 %v3880_v16, %v3954_v7 }
 0x6e4   : > { %v2596_v46 = vpop.eup %2595  ;;  %2597 = vrsqrt.f32 %v1718_v59  ;;  %v1719_v19 = vadd.f32 1e-05, %v1687_v47  ;;  %v1684_v58 = vsub.f32 %v1652_v27, %v1668_v57  ;;  %v1653_v50 = vmul.f32 0.03125, %v1627_v45 }
 0x6e5   : > { %1808 = vst [vmem:[%s3974_s13 + $0x10] sm:$0xff] %v1792_v2  ;;  %v1793_v38 = vadd.f32 %v3959_v33, %v1770_v48  ;;  %v1767_v54 = vmul.f32 %v3950_v18, %v1744_v39  ;;  %v1745_v52 = vmul.f32 %v2596_v46, %v1697_v36  ;;  %v1573_v5 = vpop.xlane.xlu0 %1572  ;;  %v1701_v36 = vsub.f32 %v3883_v23, %v3957_v9 }
 0x6e6   : > { %2599 = vrsqrt.f32 %v1719_v19  ;;  %v1716_v20 = vadd.f32 1e-05, %v1684_v58  ;;  %v1685_v61 = vsub.f32 %v1653_v50, %v1669_v60  ;;  %v3984_v3 = vmul.f32 0.03125, %v1573_v5 }
 0x6e7   : > { %1809 = vst [vmem:[%s3974_s13 + $0x18] sm:$0xff] %v1793_v38  ;;  %v1790_v37 = vadd.f32 %v3959_v33, %v1767_v54  ;;  %v1768_v40 = vmul.f32 %v3950_v18, %v1745_v52  ;;  %v1575_v35 = vpop.xlane.xlu1 %1574 }
 0x6e8   : > { %2601 = vrsqrt.f32 %v1716_v20  ;;  %v1717_v49 = vadd.f32 1e-05, %v1685_v61  ;;  %v3987_v55 = vmul.f32 0.03125, %v1575_v35  ;;  %v1674_v56 = vmul.f32 %v3984_v3, %v3984_v3 }
 0x6e9   : > { %1806 = vst [vmem:[%s3974_s13] sm:$0xff] %v1790_v37  ;;  %v1791_v1 = vadd.f32 %v3959_v33, %v1768_v40  ;;  %v1569_v12 = vpop.xlane.xlu0 %1568 }
 0x6ea   : > { %2603 = vrsqrt.f32 %v1717_v49  ;;  %v3993_v25 = vmul.f32 0.03125, %v1569_v12  ;;  %v1675_v34 = vmul.f32 %v3987_v55, %v3987_v55  ;;  %v1706_v49 = vsub.f32 %v3900_v53, %v3984_v3 }
 0x6eb   : > { %1807 = vst [vmem:[%s3974_s13 + $0x8] sm:$0xff] %v1791_v1  ;;  %v1571_v13 = vpop.xlane.xlu1 %1570 }
 0x6ec   : > { %v3997_v32 = vmul.f32 0.03125, %v1571_v13  ;;  %v1672_v43 = vmul.f32 %v3993_v25, %v3993_v25 }
 0x6ed   : > { %v1637_v14 = vpop.xlane.xlu0 %1636 }
 0x6ee   : > { %v2598_v15 = vpop.eup %2597  ;;  %v1658_v63 = vmul.f32 0.03125, %v1637_v14  ;;  %v1673_v23 = vmul.f32 %v3997_v32, %v3997_v32  ;;  %v1705_v53 = vsub.f32 %v3910_v44, %v3997_v32 }
 0x6ef   : > { %v1750_v29 = vmul.f32 %v2598_v15, %v1702_v62  ;;  %v1639_v51 = vpop.xlane.xlu1 %1638  ;;  %v1707_v15 = vsub.f32 %v3904_v0, %v3987_v55 }
 0x6f0   : > { %v2600_v10 = vpop.eup %2599  ;;  %v1690_v11 = vsub.f32 %v1658_v63, %v1674_v56  ;;  %v1659_v4 = vmul.f32 0.03125, %v1639_v51 }
 0x6f1   : > { %v1773_v24 = vmul.f32 %v3950_v18, %v1750_v29  ;;  %v1751_v31 = vmul.f32 %v2600_v10, %v1703_v26  ;;  %v1633_v22 = vpop.xlane.xlu0 %1632 }
 0x6f2   : > { %v2602_v41 = vpop.eup %2601  ;;  %v1722_v17 = vadd.f32 1e-05, %v1690_v11  ;;  %v1691_v57 = vsub.f32 %v1659_v4, %v1675_v34  ;;  %v1656_v59 = vmul.f32 0.03125, %v1633_v22  ;;  %v1704_v11 = vsub.f32 %v3907_v8, %v3993_v25 }
 0x6f3   : > { %v1796_v47 = vadd.f32 %v3959_v33, %v1773_v24  ;;  %v1774_v27 = vmul.f32 %v3950_v18, %v1751_v31  ;;  %v1748_v16 = vmul.f32 %v2602_v41, %v1700_v42  ;;  %v1635_v7 = vpop.xlane.xlu1 %1634 }
 0x6f4   : > { %v2604_v9 = vpop.eup %2603  ;;  %2605 = vrsqrt.f32 %v1722_v17  ;;  %v1723_v2 = vadd.f32 1e-05, %v1691_v57  ;;  %v1688_v48 = vsub.f32 %v1656_v59, %v1672_v43  ;;  %v1657_v39 = vmul.f32 0.03125, %v1635_v7 }
 0x6f5   : > { %1812 = vst [vmem:[%s3974_s13 + $0x30] sm:$0xff] %v1796_v47  ;;  %v1797_v60 = vadd.f32 %v3959_v33, %v1774_v27  ;;  %v1771_v45 = vmul.f32 %v3950_v18, %v1748_v16  ;;  %v1749_v46 = vmul.f32 %v2604_v9, %v1701_v36  ;;  %v1581_v19 = vpop.xlane.xlu0 %1580 }
 0x6f6   : > { %2607 = vrsqrt.f32 %v1723_v2  ;;  %v1720_v58 = vadd.f32 1e-05, %v1688_v48  ;;  %v1689_v50 = vsub.f32 %v1657_v39, %v1673_v23  ;;  %v1598_v13 = vmul.f32 0.03125, %v1581_v19 }
 0x6f7   : > { %1813 = vst [vmem:[%s3974_s13 + $0x38] sm:$0xff] %v1797_v60  ;;  %v1794_v38 = vadd.f32 %v3959_v33, %v1771_v45  ;;  %v1772_v54 = vmul.f32 %v3950_v18, %v1749_v46  ;;  %v1583_v52 = vpop.xlane.xlu1 %1582 }
 0x6f8   : > { %2609 = vrsqrt.f32 %v1720_v58  ;;  %v1721_v5 = vadd.f32 1e-05, %v1689_v50  ;;  %v1599_v63 = vmul.f32 0.03125, %v1583_v52  ;;  %v1678_v0 = vmul.f32 %v1598_v13, %v1598_v13 }
 0x6f9   : > { %1810 = vst [vmem:[%s3974_s13 + $0x20] sm:$0xff] %v1794_v38  ;;  %v1795_v20 = vadd.f32 %v3959_v33, %v1772_v54  ;;  %v1577_v61 = vpop.xlane.xlu0 %1576  ;;  %v1710_v58 = vsub.f32 %v3921_v21, %v1598_v13 }
 0x6fa   : > { %2611 = vrsqrt.f32 %v1721_v5  ;;  %v1596_v37 = vmul.f32 0.03125, %v1577_v61  ;;  %v1679_v8 = vmul.f32 %v1599_v63, %v1599_v63  ;;  %v1711_v52 = vsub.f32 %v3924_v6, %v1599_v63 }
 0x6fb   : > { %1811 = vst [vmem:[%s3974_s13 + $0x28] sm:$0xff] %v1795_v20  ;;  %v1579_v40 = vpop.xlane.xlu1 %1578 }
 0x6fc   : > { %v1597_v35 = vmul.f32 0.03125, %v1579_v40  ;;  %v1676_v62 = vmul.f32 %v1596_v37, %v1596_v37  ;;  %v1708_v39 = vsub.f32 %v3927_v28, %v1596_v37 }
 0x6fd   : > { %v1641_v1 = vpop.xlane.xlu0 %1640 }
 0x6fe   : > { %v2606_v12 = vpop.eup %2605  ;;  %v1660_v14 = vmul.f32 0.03125, %v1641_v1  ;;  %v1677_v51 = vmul.f32 %v1597_v35, %v1597_v35  ;;  %v1709_v45 = vsub.f32 %v3930_v30, %v1597_v35 }
 0x6ff   : > { %v1754_v56 = vmul.f32 %v2606_v12, %v1706_v49  ;;  %v1643_v26 = vpop.xlane.xlu1 %1642 }
 0x700   : > { %v2608_v29 = vpop.eup %2607  ;;  %v1692_v10 = vsub.f32 %v1660_v14, %v1676_v62  ;;  %v1661_v34 = vmul.f32 0.03125, %v1643_v26 }
 0x701   : > { %v1777_v3 = vmul.f32 %v3950_v18, %v1754_v56  ;;  %v1755_v4 = vmul.f32 %v2608_v29, %v1707_v15  ;;  %v1645_v42 = vpop.xlane.xlu0 %1644 }
 0x702   : > { %v2610_v36 = vpop.eup %2609  ;;  %v1724_v55 = vadd.f32 1e-05, %v1692_v10  ;;  %v1693_v24 = vsub.f32 %v1661_v34, %v1677_v51  ;;  %v1662_v31 = vmul.f32 0.03125, %v1645_v42 }
 0x703   : > { %v1800_v22 = vadd.f32 %v3959_v33, %v1777_v3  ;;  %v1778_v41 = vmul.f32 %v3950_v18, %v1755_v4  ;;  %v1752_v43 = vmul.f32 %v2610_v36, %v1704_v11  ;;  %v1647_v25 = vpop.xlane.xlu1 %1646 }
 0x704   : > { %v2612_v17 = vpop.eup %2611  ;;  %2613 = vrsqrt.f32 %v1724_v55  ;;  %v1725_v44 = vadd.f32 1e-05, %v1693_v24  ;;  %v1694_v32 = vsub.f32 %v1662_v31, %v1678_v0  ;;  %v1663_v57 = vmul.f32 0.03125, %v1647_v25 }
 0x705   : > { %1816 = vst [vmem:[%s3974_s13 + $0x50] sm:$0xff] %v1800_v22  ;;  %v1801_v59 = vadd.f32 %v3959_v33, %v1778_v41  ;;  %v1775_v47 = vmul.f32 %v3950_v18, %v1752_v43  ;;  %v1753_v27 = vmul.f32 %v2612_v17, %v1705_v53 }
 0x706   : > { %2615 = vrsqrt.f32 %v1725_v44  ;;  %v1726_v16 = vadd.f32 1e-05, %v1694_v32  ;;  %v1695_v23 = vsub.f32 %v1663_v57, %v1679_v8 }
 0x707   : > { %1817 = vst [vmem:[%s3974_s13 + $0x58] sm:$0xff] %v1801_v59  ;;  %v1798_v7 = vadd.f32 %v3959_v33, %v1775_v47  ;;  %v1776_v9 = vmul.f32 %v3950_v18, %v1753_v27 }
 0x708   : > { %2617 = vrsqrt.f32 %v1726_v16  ;;  %v1727_v2 = vadd.f32 1e-05, %v1695_v23 }
 0x709   : > { %1814 = vst [vmem:[%s3974_s13 + $0x40] sm:$0xff] %v1798_v7  ;;  %v1799_v48 = vadd.f32 %v3959_v33, %v1776_v9 }
 0x70a   : > { %2619 = vrsqrt.f32 %v1727_v2 }
 0x70b   : > { %1815 = vst [vmem:[%s3974_s13 + $0x48] sm:$0xff] %v1799_v48 }
 0x70e   : > { %v2614_v60 = vpop.eup %2613 }
 0x70f   : > { %v1756_v46 = vmul.f32 %v2614_v60, %v1708_v39 }
 0x710   : > { %v2616_v19 = vpop.eup %2615 }
 0x711   : > { %v1779_v50 = vmul.f32 %v3950_v18, %v1756_v46  ;;  %v1757_v38 = vmul.f32 %v2616_v19, %v1709_v45 }
 0x712   : > { %v2618_v54 = vpop.eup %2617 }
 0x713   : > { %v1802_v5 = vadd.f32 %v3959_v33, %v1779_v50  ;;  %v1780_v28 = vmul.f32 %v3950_v18, %v1757_v38  ;;  %v1758_v30 = vmul.f32 %v2618_v54, %v1710_v58 }
 0x714   : > { %v2620_v20 = vpop.eup %2619 }
 0x715   : > { %1818 = vst [vmem:[%s3974_s13 + $0x60] sm:$0xff] %v1802_v5  ;;  %v1803_v61 = vadd.f32 %v3959_v33, %v1780_v28  ;;  %v1781_v21 = vmul.f32 %v3950_v18, %v1758_v30  ;;  %v1759_v37 = vmul.f32 %v2620_v20, %v1711_v52 }
 0x717   : > { %1819 = vst [vmem:[%s3974_s13 + $0x68] sm:$0xff] %v1803_v61  ;;  %v1804_v6 = vadd.f32 %v3959_v33, %v1781_v21  ;;  %v1782_v40 = vmul.f32 %v3950_v18, %v1759_v37 }
 0x719   : > { %1820 = vst [vmem:[%s3974_s13 + $0x70] sm:$0xff] %v1804_v6  ;;  %v1805_v35 = vadd.f32 %v3959_v33, %v1782_v40 }
 0x71b   : > { %1821 = vst [vmem:[%s3974_s13 + $0x78] sm:$0xff] %v1805_v35 }
 0x71c   : > { %2906 = shalt.err (!%p2903_p0)
}
 0x71d   : > { %s2907_s23 = scalar_lea.hbm %s4059_s29, 2048  ;;  %s2911_s0 = scalar_lea.hbm %s4191_s20, 4096 }
 0x71e   : > { %p2908_p12 = scmp.ne.s32.totalorder %s4059_s29, %s2907_s23  ;;  %p2912_p3 = scmp.lt.u32.totalorder %s4059_s29, %s4191_s20 }
 0x71f   : > { %p2913_p7 = scmp.lt.u32.totalorder %s2911_s0, %s2907_s23  ;;  %p2915_p6 = scmp.lt.u32.totalorder %s2907_s23, %s4059_s29 }
 0x720   : > { %p2909_p13 = pnand %p2908_p12, %p4192_p10 }
 0x721   : > { %p2914_p2 = por %p2913_p7, %p2912_p3 }
 0x722   : > { %p2910_p1 = pneg %p2909_p13 }
 0x723   : > { %p2916_p5 = por %p2915_p6, %p2914_p2 }
 0x725   : > { %p2917_p9 = pnand %p2916_p5, %p2910_p1 }
 0x727   : > { %2920 = shalt.err (!%p2917_p9)
}
 0x728   : > { %s2995_s13 = smov 128   ;;  %s2996_s28 = smov 8  }
 0x729   : > { %2373 = dma.vmem_to_hbm [thread:$0]  (%p4192_p10), %s4061_s21, 2048, %s4059_s29, %s1823_s15, %s2995_s13, %s2995_s13, %s2996_s28  }
 0x72a PF: > { %s1851_s9 = sand.u32 1, %s2967_s30   ;;  %p4193_p4 = scmp.ne.s32.totalorder %s4145_s14, 0 }
 0x72b   : > { %p4194_p8 = scmp.ge.s32.totalorder %s2979_s12, 2  ;;  %s1852_s27 = scalar_lea.sflag [#allocation4], %s1851_s9 }
 0x72d   : > { %p2405_p11 = pnand %p4194_p8, %p4193_p4 }
 0x72f   : > { %2962 = dma.done.wait (!%p2405_p11), %s1852_s27, 2048  }
 0x730   : > { %2964 = vsyncadd (!%p2405_p11), %s1852_s27, 4294965248  ;;  %p28_p0 = scmp.ge.s32.totalorder %s3252_s19, 4   ;;  %s4195_s30 = smov %s2971_s10 }
 0x731   : > { %s4196_s10 = smov %s2975_s11  ;;  %s4197_s11 = smov %s3264_s24 }
 0x732   : > { %s4198_s12 = smov %s3252_s19  ;;  %30 = sbr.rel (!%p28_p0) target bundleno = 17 (0x11), region = 142 }
 0x739   :  { %1857 = vsyncpa [#allocation3], 1 }
 0x73a   :  { %1859 = vsyncpa [#allocation3 + $0x1], 1 }
 0x73b   :  { %1860 = vsyncpa [#allocation6], 1 }
 0x73c   :  { %1862 = vsyncpa [#allocation6 + $0x1], 1 }
 0x73d   :  { %1863 = vsyncpa [#allocation9], 1 }
 0x73e   :  { %1864 = vsyncpa [#allocation12], 1 }
 0x73f   :  { %1865 = vsyncpa [#allocation15], 1 }
 0x740   :  { %1866 = vsyncpa [#allocation4], 1 }
 0x741   :  { %1868 = vsyncpa [#allocation4 + $0x1], 1 }

// kernel: tpu_custom_call.1
= control target key start
LH: loop header
LB: loop body
LE: loop exit
PB: predicated region body
PF: predicated region fallthrough
CT: control target
= control target key end

     0   :  { %s4108_s0 = inlined_call_operand.hbm [shape: f32[2,128,128], index: 0, kind: input, shape index: {}]   ;;  %s4109_s1 = inlined_call_operand.hbm [shape: f32[2,128,128], index: 1, kind: input, shape index: {}]   ;;  %s4110_s2 = inlined_call_operand.hbm [shape: bf16[128,128], index: 2, kind: input, shape index: {}]   ;;  %s4111_s3 = inlined_call_operand.hbm [shape: f32[1,128], index: 3, kind: input, shape index: {}]   ;;  %s4112_s4 = inlined_call_operand.hbm [shape: bf16[128,128], index: 4, kind: input, shape index: {}]   ;;  %s4113_s5 = inlined_call_operand.hbm [shape: f32[1,128], index: 5, kind: input, shape index: {}]   ;;  %s4114_s6 = inlined_call_operand.hbm [shape: bf16[128,128], index: 6, kind: input, shape index: {}]   ;;  %s4115_s7 = inlined_call_operand.hbm [shape: f32[1,128], index: 7, kind: input, shape index: {}]   ;;  %s4116_s8 = inlined_call_operand.hbm [shape: f32[1,128], index: 8, kind: input, shape index: {}]   ;;  %s4117_s9 = inlined_call_operand.hbm [shape: f32[2,128,128], index: 9, kind: output, shape index: {}]  }
   0x1   :  { %4128 = sst [smem:[#allocation25_spill]] %s4108_s0 }
   0x2   :  { %4129 = sst [smem:[#allocation26_spill]] %s4110_s2 }
   0x3   :  { %4130 = sst [smem:[#allocation27_spill]] %s4111_s3 }
   0x4   :  { %4131 = sst [smem:[#allocation28_spill]] %s4112_s4 }
   0x5   :  { %4132 = sst [smem:[#allocation29_spill]] %s4113_s5 }
   0x6   :  { %4133 = sst [smem:[#allocation30_spill]] %s4117_s9 }
   0x7   :  { %14 = vsyncpa [#allocation3], 0 }
   0x8   :  { %16 = vsyncpa [#allocation3 + $0x1], 0 }
   0x9   :  { %17 = vsyncpa [#allocation6], 0 }
   0xa   :  { %19 = vsyncpa [#allocation6 + $0x1], 0 }
   0xb   :  { %20 = vsyncpa [#allocation9], 0 }
   0xc   :  { %21 = vsyncpa [#allocation12], 0 }
   0xd   :  { %22 = vsyncpa [#allocation15], 0 }
   0xe   :  { %23 = vsyncpa [#allocation4], 0 }
   0xf   :  { %25 = vsyncpa [#allocation4 + $0x1], 0  ;;  %s3047_s30 = smov 0   ;;  %s3049_s10 = smov 0  }
  0x10   :  { %s3051_s11 = smov 0   ;;  %s3053_s12 = smov 0  }
  0x11 LB: > { %s2981_s13 = smov [#allocation7]   ;;  %s3068_s15 = sadd.s32 4294967295, %s2979_s12   ;;  %s2979_s12 = sphi %s3053_s12, %s4198_s12   ;;  %s2975_s11 = sphi %s3051_s11, %s4197_s11   ;;  %s2971_s10 = sphi %s3049_s10, %s4196_s10   ;;  %s2967_s30 = sphi %s3047_s30, %s4195_s30  }
  0x12   : > { %s273_s14 = sshll.u32 %s2981_s13, 4  ;;  %p1999_p0 = scmp.ge.s32.totalorder %s2979_s12, 1  ;;  %s3073_s14 = int_to_ptr.vmem [resolvable:$true] %s273_s14 }
  0x13   : > { %p4121_p1 = scmp.eq.s32.totalorder %s3068_s15, 0  ;;  %p261_p2 = scmp.lt.s32.totalorder %s2979_s12, 3 }
  0x14   : > { %s2982_s17 = smov [#allocation8]   ;;  %s2983_s20 = smov [#allocation11]  }
  0x15   : > { %p3075_p3 = pnand %p1999_p0, %p261_p2  ;;  %s287_s18 = sshll.u32 %s2982_s17, 4  ;;  %s3088_s18 = int_to_ptr.vmem [resolvable:$true] %s287_s18 }
  0x16   : > { %s311_s21 = sshll.u32 %s2983_s20, 4  ;;  %s4136_s2 = sld [smem:[#allocation26_spill]]  ;;  %s3090_s21 = int_to_ptr.vmem [resolvable:$true] %s311_s21 }
  0x17   : > { %s4134_s16 = scalar_select %p3075_p3, 1, 0 }
  0x18   : > { %p2375_p5 = pneg %p3075_p3 }
  0x1a   : > { %p3084_p6 = pnand %p2375_p5, %p4121_p1 }
  0x1c   : > { %s2637_s24 = scalar_lea.hbm %s4136_s2, 1024  ;;  %p3100_p8 = pneg %p3084_p6 }
  0x1d   : > { %p2638_p7 = scmp.ne.s32.totalorder %s4136_s2, %s2637_s24  ;;  %p2644_p11 = scmp.lt.u32.totalorder %s2637_s24, %s4136_s2 }
  0x1f   : > { %p2640_p9 = pnand %p3100_p8, %p2638_p7 }
  0x21   : > { %p2641_p10 = pneg %p2640_p9 }
  0x23   : > { %p2646_p12 = pnand %p2644_p11, %p2641_p10 }
  0x25   : > { %2649 = shalt.err (!%p2646_p12)
}
  0x26   : > { %s2650_s13 = scalar_lea.vmem %s3073_s14, 1024  ;;  %p2658_p5 = scmp.lt.s32.totalorder %s3073_s14, %s3073_s14 }
  0x27   : > { %p2651_p13 = scmp.ne.s32.totalorder %s3073_s14, %s2650_s13  ;;  %p2659_p4 = scmp.lt.s32.totalorder %s2650_s13, %s2650_s13 }
  0x29   : > { %p2653_p0 = pnand %p2651_p13, %p3100_p8  ;;  %p2660_p7 = por %p2659_p4, %p2658_p5 }
  0x2b   : > { %p2654_p2 = pneg %p2653_p0 }
  0x2d   : > { %p2661_p9 = pnand %p2660_p7, %p2654_p2 }
  0x2f   : > { %2664 = shalt.err (!%p2661_p9)
}
  0x30   : > { %s4119_s17 = smov 64   ;;  %s2985_s20 = smov 4  }
  0x31   : > { %2378 = dma.hbm_to_vmem [thread:$0]  (!%p3084_p6), %s4136_s2, 1024, %s3073_s14, [#allocation6], %s4119_s17, %s4119_s17, %s2985_s20  }
  0x32   : > { %s4138_s3 = sld [smem:[#allocation27_spill]] }
  0x38   : > { %s2665_s26 = scalar_lea.hbm %s4138_s3, 16 }
  0x39   : > { %p2666_p4 = scmp.ne.s32.totalorder %s4138_s3, %s2665_s26  ;;  %p2672_p12 = scmp.lt.u32.totalorder %s2665_s26, %s4138_s3 }
  0x3b   : > { %p2668_p10 = pnand %p2666_p4, %p3100_p8 }
  0x3d   : > { %p2669_p11 = pneg %p2668_p10 }
  0x3f   : > { %p2674_p13 = pnand %p2672_p12, %p2669_p11 }
  0x41   : > { %2677 = shalt.err (!%p2674_p13)
}
  0x42   : > { %s2678_s14 = scalar_lea.vmem %s3088_s18, 16  ;;  %s2685_s22 = scalar_lea.vmem %s3088_s18, 32 }
  0x43   : > { %p2679_p0 = scmp.ne.s32.totalorder %s3088_s18, %s2678_s14  ;;  %p2686_p7 = scmp.lt.s32.totalorder %s3088_s18, %s3088_s18 }
  0x44   : > { %p2687_p9 = scmp.lt.s32.totalorder %s2685_s22, %s2678_s14 }
  0x45   : > { %p2681_p2 = pnand %p2679_p0, %p3100_p8 }
  0x46   : > { %p2688_p4 = por %p2687_p9, %p2686_p7 }
  0x47   : > { %p2682_p5 = pneg %p2681_p2 }
  0x49   : > { %p2689_p10 = pnand %p2688_p4, %p2682_p5 }
  0x4b   : > { %2692 = shalt.err (!%p2689_p10)
}
  0x4c   : > { %2381 = dma.hbm_to_vmem [thread:$0]  (!%p3084_p6), %s4138_s3, 16, %s3088_s18, [#allocation9]  }
  0x4d   : > { %s4139_s5 = sld [smem:[#allocation29_spill]] }
  0x53   : > { %s2693_s26 = scalar_lea.hbm %s4139_s5, 16 }
  0x54   : > { %p2694_p11 = scmp.ne.s32.totalorder %s4139_s5, %s2693_s26  ;;  %p2700_p0 = scmp.lt.u32.totalorder %s2693_s26, %s4139_s5 }
  0x56   : > { %p2696_p12 = pnand %p2694_p11, %p3100_p8 }
  0x58   : > { %p2697_p13 = pneg %p2696_p12 }
  0x5a   : > { %p2702_p2 = pnand %p2700_p0, %p2697_p13 }
  0x5c   : > { %2705 = shalt.err (!%p2702_p2)
}
  0x5d   : > { %s2706_s18 = scalar_lea.vmem %s3090_s21, 16  ;;  %s2713_s22 = scalar_lea.vmem %s3090_s21, 32 }
  0x5e   : > { %p2707_p5 = scmp.ne.s32.totalorder %s3090_s21, %s2706_s18  ;;  %p2714_p4 = scmp.lt.s32.totalorder %s3090_s21, %s3090_s21 }
  0x5f   : > { %p2715_p10 = scmp.lt.s32.totalorder %s2713_s22, %s2706_s18 }
  0x60   : > { %p2709_p7 = pnand %p2707_p5, %p3100_p8 }
  0x61   : > { %p2716_p11 = por %p2715_p10, %p2714_p4 }
  0x62   : > { %p2710_p9 = pneg %p2709_p7 }
  0x64   : > { %p2717_p12 = pnand %p2716_p11, %p2710_p9 }
  0x66   : > { %2720 = shalt.err (!%p2717_p12)
}
  0x67   : > { %2387 = dma.hbm_to_vmem [thread:$0]  (!%p3084_p6), %s4139_s5, 16, %s3090_s21, [#allocation12]  }
  0x68   : > { %s2986_s24 = smov [#allocation14]   ;;  %s2987_s26 = smov [#allocation10]  }
  0x69   : > { %s335_s25 = sshll.u32 %s2986_s24, 4  ;;  %s297_s28 = sshll.u32 %s2987_s26, 4  ;;  %s336_s25 = int_to_ptr.vmem [resolvable:$true] %s335_s25  ;;  %s298_s28 = int_to_ptr.vmem [resolvable:$true] %s297_s28 }
  0x6a   : > { %s2721_s14 = scalar_lea.hbm %s4115_s7, 16 }
  0x6b   : > { %p2722_p13 = scmp.ne.s32.totalorder %s4115_s7, %s2721_s14  ;;  %p2728_p5 = scmp.lt.u32.totalorder %s2721_s14, %s4115_s7 }
  0x6d   : > { %p2724_p0 = pnand %p2722_p13, %p3100_p8 }
  0x6f   : > { %p2725_p2 = pneg %p2724_p0 }
  0x71   : > { %p2730_p7 = pnand %p2728_p5, %p2725_p2 }
  0x73   : > { %2733 = shalt.err (!%p2730_p7)
}
  0x74   : > { %s2734_s21 = scalar_lea.vmem %s336_s25, 16  ;;  %s2741_s23 = scalar_lea.vmem %s336_s25, 32 }
  0x75   : > { %p2735_p9 = scmp.ne.s32.totalorder %s336_s25, %s2734_s21  ;;  %p2742_p11 = scmp.lt.s32.totalorder %s336_s25, %s336_s25 }
  0x76   : > { %p2743_p12 = scmp.lt.s32.totalorder %s2741_s23, %s2734_s21 }
  0x77   : > { %p2737_p4 = pnand %p2735_p9, %p3100_p8 }
  0x78   : > { %p2744_p1 = por %p2743_p12, %p2742_p11 }
  0x79   : > { %p2738_p10 = pneg %p2737_p4 }
  0x7b   : > { %p2745_p3 = pnand %p2744_p1, %p2738_p10 }
  0x7d   : > { %2748 = shalt.err (!%p2745_p3)
}
  0x7e   : > { %2393 = dma.hbm_to_vmem [thread:$0]  (!%p3084_p6), %s4115_s7, 16, %s336_s25, [#allocation15]  }
  0x7f   : > { %s4140_s4 = sld [smem:[#allocation28_spill]] }
  0x85   : > { %s2749_s13 = scalar_lea.hbm %s4140_s4, 1024 }
  0x86   : > { %p2750_p13 = scmp.ne.s32.totalorder %s4140_s4, %s2749_s13  ;;  %p2756_p3 = scmp.lt.u32.totalorder %s2749_s13, %s4140_s4 }
  0x88   : > { %p2752_p0 = pnand %p2750_p13, %p3100_p8 }
  0x8a   : > { %p2753_p1 = pneg %p2752_p0 }
  0x8c   : > { %p2758_p2 = pnand %p2756_p3, %p2753_p1 }
  0x8e   : > { %2761 = shalt.err (!%p2758_p2)
}
  0x8f   : > { %s2762_s21 = scalar_lea.vmem %s298_s28, 1024  ;;  %p2770_p4 = scmp.lt.s32.totalorder %s298_s28, %s298_s28 }
  0x90   : > { %p2763_p5 = scmp.ne.s32.totalorder %s298_s28, %s2762_s21  ;;  %p2771_p10 = scmp.lt.s32.totalorder %s2762_s21, %s2762_s21 }
  0x92   : > { %p2765_p7 = pnand %p2763_p5, %p3100_p8  ;;  %p2772_p11 = por %p2771_p10, %p2770_p4 }
  0x94   : > { %p2766_p9 = pneg %p2765_p7 }
  0x96   : > { %p2773_p12 = pnand %p2772_p11, %p2766_p9 }
  0x98   : > { %2776 = shalt.err (!%p2773_p12)
}
  0x99   : > { %s4141_s25 = smov 64   ;;  %s2988_s26 = smov [#allocation13]  }
  0x9a   : > { %2384 = dma.hbm_to_vmem [thread:$0]  (!%p3084_p6), %s4140_s4, 1024, %s298_s28, [#allocation9], %s4141_s25, %s4141_s25, %s2985_s20  }
  0x9b   : > { %s321_s17 = sshll.u32 %s2988_s26, 4  ;;  %s2989_s29 = smov [#allocation16]   ;;  %s322_s17 = int_to_ptr.vmem [resolvable:$true] %s321_s17 }
  0x9c   : > { %s346_s13 = sshll.u32 %s2989_s29, 4  ;;  %s2777_s22 = scalar_lea.hbm %s4114_s6, 1024  ;;  %s347_s13 = int_to_ptr.vmem [resolvable:$true] %s346_s13 }
  0x9d   : > { %p2778_p13 = scmp.ne.s32.totalorder %s4114_s6, %s2777_s22  ;;  %p2784_p3 = scmp.lt.u32.totalorder %s2777_s22, %s4114_s6 }
  0x9f   : > { %p2780_p0 = pnand %p2778_p13, %p3100_p8 }
  0xa1   : > { %p2781_p1 = pneg %p2780_p0 }
  0xa3   : > { %p2786_p2 = pnand %p2784_p3, %p2781_p1 }
  0xa5   : > { %2789 = shalt.err (!%p2786_p2)
}
  0xa6   : > { %s2790_s28 = scalar_lea.vmem %s322_s17, 1024  ;;  %p2798_p4 = scmp.lt.s32.totalorder %s322_s17, %s322_s17 }
  0xa7   : > { %p2791_p5 = scmp.ne.s32.totalorder %s322_s17, %s2790_s28  ;;  %p2799_p10 = scmp.lt.s32.totalorder %s2790_s28, %s2790_s28 }
  0xa9   : > { %p2793_p7 = pnand %p2791_p5, %p3100_p8  ;;  %p2800_p11 = por %p2799_p10, %p2798_p4 }
  0xab   : > { %p2794_p9 = pneg %p2793_p7 }
  0xad   : > { %p2801_p12 = pnand %p2800_p11, %p2794_p9 }
  0xaf   : > { %2804 = shalt.err (!%p2801_p12)
}
  0xb0   : > { %2390 = dma.hbm_to_vmem [thread:$0]  (!%p3084_p6), %s4114_s6, 1024, %s322_s17, [#allocation12], %s4141_s25, %s4141_s25, %s2985_s20  }
  0xb1   : > { %s2805_s14 = scalar_lea.hbm %s4116_s8, 16 }
  0xb2   : > { %p2806_p13 = scmp.ne.s32.totalorder %s4116_s8, %s2805_s14  ;;  %p2812_p3 = scmp.lt.u32.totalorder %s2805_s14, %s4116_s8 }
  0xb4   : > { %p2808_p0 = pnand %p2806_p13, %p3100_p8 }
  0xb6   : > { %p2809_p1 = pneg %p2808_p0 }
  0xb8   : > { %p2814_p2 = pnand %p2812_p3, %p2809_p1 }
  0xba   : > { %2817 = shalt.err (!%p2814_p2)
}
  0xbb   : > { %s2818_s23 = scalar_lea.vmem %s347_s13, 16  ;;  %s2825_s20 = scalar_lea.vmem %s347_s13, 32 }
  0xbc   : > { %p2819_p5 = scmp.ne.s32.totalorder %s347_s13, %s2818_s23  ;;  %p2826_p4 = scmp.lt.s32.totalorder %s347_s13, %s347_s13 }
  0xbd   : > { %p2827_p10 = scmp.lt.s32.totalorder %s2825_s20, %s2818_s23 }
  0xbe   : > { %p2821_p7 = pnand %p2819_p5, %p3100_p8 }
  0xbf   : > { %p2828_p11 = por %p2827_p10, %p2826_p4 }
  0xc0   : > { %p2822_p9 = pneg %p2821_p7 }
  0xc2   : > { %p2829_p12 = pnand %p2828_p11, %p2822_p9 }
  0xc4   : > { %2832 = shalt.err (!%p2829_p12)
}
  0xc5   : > { %2396 = dma.hbm_to_vmem [thread:$0]  (!%p3084_p6), %s4116_s8, 16, %s347_s13, [#allocation15]  }
  0xc6   : > { %s1998_s27 = sadd.s32 4294967294, %s2979_s12   ;;  %s3252_s19 = sadd.s32 1, %s2979_s12  }
  0xc7   : > { %s38_s28 = sadd.s32 1, %s2975_s11  ;;  %s35_s2 = ssub.s32 %s2979_s12, %s3252_s19 }
  0xc8   : > { %p45_p8 = scmp.ne.s32.totalorder %s2975_s11, %s2971_s10  ;;  %p36_p13 = scmp.eq.s32.totalorder %s35_s2, 0 }
  0xc9   : > { %p46_p0 = scmp.eq.s32.totalorder %s2979_s12, 0  ;;  %p51_p1 = scmp.ne.s32.totalorder %s2971_s10, %s2967_s30 }
  0xca   : > { %p248_p3 = scmp.eq.s32.totalorder %s3068_s15, 1  ;;  %p4142_p5 = scmp.eq.s32.totalorder %s3068_s15, 0 }
  0xcb   : > { %s3264_s24 = scalar_select %p36_p13, %s2975_s11, %s38_s28  }
  0xcc   : > { %p47_p2 = por %p46_p0, %p45_p8  ;;  %p3268_p7 = por %p4142_p5, %p51_p1 }
  0xcd   : > { %p3272_p6 = por %p248_p3, %p45_p8  ;;  %p254_p9 = scmp.eq.s32.totalorder %s1998_s27, 1 }
  0xce   : > { %p2415_p4 = scmp.lt.s32.totalorder %s2979_s12, 2  ;;  %s357_s29 = sand.u32 1, %s2975_s11  }
  0xcf   : > { %s4144_s26 = scalar_select %p3272_p6, 1, 0 }
  0xd0   : > { %p3278_p10 = por %p254_p9, %p51_p1  ;;  %s3282_s18 = sshll.u32 %s357_s29, 7 }
  0xd1   : > { %s4123_s22 = sshll.u32 %s2979_s12, 11  ;;  %s4146_s0 = sld [smem:[#allocation25_spill]] }
  0xd2   : > { %s4145_s14 = scalar_select %p3278_p10, 1, 0 }
  0xd3   : > { %s361_s20 = scalar_lea.vmem [#allocation2], %s3282_s18  ;;  %p3293_p11 = pnand %p2415_p4, %p47_p2 }
  0xd4   : > { %s368_s25 = sshll.u32 %s361_s20, 4  ;;  %s3299_s27 = scalar_lea.sflag [#allocation3], %s357_s29  ;;  %s3297_s25 = int_to_ptr.vmem [resolvable:$true] %s368_s25 }
  0xd5   : > { %p2835_p8 = pneg %p3293_p11 }
  0xd7   : > { %s3290_s23 = scalar_lea.hbm %s4146_s0, %s4123_s22  ;;  %s2838_s21 = scalar_lea.hbm %s4146_s0, 4096 }
  0xd8   : > { %s2833_s28 = scalar_lea.hbm %s3290_s23, 2048  ;;  %p2839_p1 = scmp.lt.u32.totalorder %s3290_s23, %s4146_s0 }
  0xd9   : > { %p2834_p12 = scmp.ne.s32.totalorder %s3290_s23, %s2833_s28  ;;  %p2840_p3 = scmp.lt.u32.totalorder %s2838_s21, %s2833_s28 }
  0xda   : > { %p2842_p5 = scmp.lt.u32.totalorder %s2833_s28, %s3290_s23 }
  0xdb   : > { %p2836_p13 = pnand %p2835_p8, %p2834_p12  ;;  %p2841_p2 = por %p2840_p3, %p2839_p1 }
  0xdd   : > { %p2837_p0 = pneg %p2836_p13  ;;  %p2843_p9 = por %p2842_p5, %p2841_p2 }
  0xdf   : > { %p2844_p4 = pnand %p2843_p9, %p2837_p0 }
  0xe1   : > { %2847 = shalt.err (!%p2844_p4)
}
  0xe2   : > { %s2848_s29 = scalar_lea.vmem %s3297_s25, 2048  ;;  %s2990_s2 = smov [#allocation2]  }
  0xe3   : > { %p2849_p12 = scmp.ne.s32.totalorder %s3297_s25, %s2848_s29  ;;  %s2853_s9 = sshll.u32 %s2990_s2, 4  ;;  %s2854_s9 = int_to_ptr.vmem [resolvable:$false] %s2853_s9 }
  0xe4   : > { %s2855_s22 = scalar_lea.vmem %s2854_s9, 4096  ;;  %p2856_p6 = scmp.lt.s32.totalorder %s3297_s25, %s2854_s9 }
  0xe5   : > { %p2851_p13 = pnand %p2849_p12, %p2835_p8  ;;  %p2857_p1 = scmp.lt.s32.totalorder %s2855_s22, %s2848_s29 }
  0xe7   : > { %p2852_p10 = pneg %p2851_p13  ;;  %p2858_p3 = por %p2857_p1, %p2856_p6 }
  0xe9   : > { %p2859_p2 = pnand %p2858_p3, %p2852_p10 }
  0xeb   : > { %2862 = shalt.err (!%p2859_p2)
}
  0xec   : > { %s2991_s28 = smov 128   ;;  %s2992_s21 = smov 8  }
  0xed   : > { %2400 = dma.hbm_to_vmem [thread:$0]  (!%p3293_p11), %s3290_s23, 2048, %s3297_s25, %s3299_s27, %s2991_s28, %s2991_s28, %s2992_s21  }
  0xee   : > { %s4148_s20 = sshll.u32 %s2979_s12, 11  ;;  %s382_s22 = scalar_lea.vmem [#allocation5], %s3282_s18 }
  0xef   : > { %s3335_s9 = scalar_lea.hbm %s4109_s1, %s4148_s20  ;;  %s389_s0 = sshll.u32 %s382_s22, 4  ;;  %s3339_s0 = int_to_ptr.vmem [resolvable:$true] %s389_s0 }
  0xf0   : > { %s378_s3 = sand.u32 1, %s2979_s12   ;;  %s2863_s5 = scalar_lea.hbm %s3335_s9, 2048 }
  0xf1   : > { %s3341_s4 = scalar_lea.sflag [#allocation6], %s378_s3  ;;  %p2864_p6 = scmp.ne.s32.totalorder %s3335_s9, %s2863_s5 }
  0xf2   : > { %s2868_s27 = scalar_lea.hbm %s4109_s1, 4096  ;;  %p2869_p5 = scmp.lt.u32.totalorder %s3335_s9, %s4109_s1 }
  0xf3   : > { %p2866_p10 = pnand %p2864_p6, %p2835_p8  ;;  %p2870_p9 = scmp.lt.u32.totalorder %s2868_s27, %s2863_s5 }
  0xf4   : > { %p2872_p12 = scmp.lt.u32.totalorder %s2863_s5, %s3335_s9 }
  0xf5   : > { %p2867_p0 = pneg %p2866_p10  ;;  %p2871_p4 = por %p2870_p9, %p2869_p5 }
  0xf7   : > { %p2873_p13 = por %p2872_p12, %p2871_p4 }
  0xf9   : > { %p2874_p1 = pnand %p2873_p13, %p2867_p0 }
  0xfb   : > { %2877 = shalt.err (!%p2874_p1)
}
  0xfc   : > { %s2878_s3 = scalar_lea.vmem %s3339_s0, 2048  ;;  %s2993_s18 = smov [#allocation5]  }
  0xfd   : > { %p2879_p3 = scmp.ne.s32.totalorder %s3339_s0, %s2878_s3  ;;  %s2883_s2 = sshll.u32 %s2993_s18, 4  ;;  %s2884_s2 = int_to_ptr.vmem [resolvable:$false] %s2883_s2 }
  0xfe   : > { %s2885_s22 = scalar_lea.vmem %s2884_s2, 4096  ;;  %p2886_p10 = scmp.lt.s32.totalorder %s3339_s0, %s2884_s2 }
  0xff   : > { %p2881_p2 = pnand %p2879_p3, %p2835_p8  ;;  %p2887_p5 = scmp.lt.s32.totalorder %s2885_s22, %s2878_s3 }
 0x101   : > { %p2882_p6 = pneg %p2881_p2  ;;  %p2888_p9 = por %p2887_p5, %p2886_p10 }
 0x103   : > { %p2889_p4 = pnand %p2888_p9, %p2882_p6 }
 0x105   : > { %2892 = shalt.err (!%p2889_p4)
}
 0x106   : > { %2403 = dma.hbm_to_vmem [thread:$0]  (!%p3293_p11), %s3335_s9, 2048, %s3339_s0, %s3341_s4, %s2991_s28, %s2991_s28, %s2992_s21  }
 0x107   : > { %p4149_p8 = scmp.ne.s32.totalorder %s4134_s16, 0 }
 0x108   : > { %s3373_s5 = sand.u32 (!%p4149_p8), 1, %s2971_s10  }
 0x109   : > { %401 = sbr.rel (%p4149_p8) target bundleno = 1834 (0x72a), region = 56  ;;  %s3376_s23 = sshll.u32 (!%p4149_p8), %s3373_s5, 7 }
 0x10a   : > { %s404_s17 = scalar_lea.sflag (!%p4149_p8), [#allocation3], %s3373_s5  ;;  %s3380_s25 = scalar_lea.vmem (!%p4149_p8), [#allocation2], %s3376_s23 }
 0x110   : > { %2938 = dma.done.wait (%p3268_p7), %s404_s17, 2048  }
 0x111   : > { %2940 = vsyncadd (%p3268_p7), %s404_s17, 4294965248  ;;  %s412_s0 = sand.u32 1, %s3068_s15   ;;  %s3388_s16 = scalar_lea.vmem [#allocation5], %s3376_s23 }
 0x112   : > { %s413_s4 = scalar_lea.sflag [#allocation6], %s412_s0 }
 0x113   : > { %2942 = dma.done.wait (%p3268_p7), %s413_s4, 2048  }
 0x114   : > { %2944 = vsyncadd (%p3268_p7), %s413_s4, 4294965248  ;;  %p4150_p11 = scmp.eq.s32.totalorder %s3068_s15, 0 }
 0x116   : > { %2946 = dma.done.wait (%p4150_p11), [#allocation6], 1024   ;;  %p4151_p0 = pmov %p4150_p11 }
 0x118   : > { %2948 = vsyncadd (%p4151_p0), [#allocation6], 4294966272  ;;  %p4152_p12 = pmov %p4151_p0 }
 0x119   : > { %p4153_p13 = pmov %p4151_p0 }
 0x11a   : > { %2950 = dma.done.wait (%p4152_p12), [#allocation9], 1040  }
 0x11b   : > { %2952 = vsyncadd (%p4153_p13), [#allocation9], 4294966256  ;;  %p4154_p1 = pmov %p4151_p0 }
 0x11c   : > { %p4155_p3 = pmov %p4151_p0 }
 0x11d   : > { %2954 = dma.done.wait (%p4154_p1), [#allocation12], 1040  }
 0x11e   : > { %2956 = vsyncadd (%p4155_p3), [#allocation12], 4294966256  ;;  %p4156_p7 = pmov %p4151_p0 }
 0x11f   : > { %p4157_p2 = pmov %p4151_p0 }
 0x120   : > { %2958 = dma.done.wait (%p4156_p7), [#allocation15], 32  }
 0x121   : > { %2960 = vsyncadd (%p4157_p2), [#allocation15], 4294967264  ;;  %v2469_v0 = vld [vmem:[#allocation10] sm:$0xff]   ;;  %v2470_v1 = vld [vmem:[#allocation10 + $0x8] sm:$0xff]   ;;  %s3974_s13 = scalar_lea.vmem [#allocation17], %s3376_s23  ;;  %s2100_s28 = sshll.u32 %s3068_s15, 11 }
 0x122   : > { %2213 = vmatprep.subr.bf16.mxu1 %v2469_v0  ;;  %v2471_v2 = vld [vmem:[#allocation10 + $0x10] sm:$0xff]   ;;  %v2472_v3 = vld [vmem:[#allocation10 + $0x18] sm:$0xff]   ;;  %v486_v5 = vld [vmem:[%s3380_s25 + $0x8] sm:$0xff]  ;;  %s1836_s21 = sshll.u32 %s3974_s13, 4  ;;  %s4191_s20 = sld [smem:[#allocation30_spill]]  ;;  %s4061_s21 = int_to_ptr.vmem [resolvable:$true] %s1836_s21 }
 0x123   : > { %2214 = vmatpush3.bf16.msra.mxu1 %v2469_v0  ;;  %v485_v4 = vld [vmem:[%s3380_s25] sm:$0xff]  ;;  %v2478_v9 = vld [vmem:[#allocation7 + $0x8] sm:$0xff]   ;;  %v2479_v10 = vld [vmem:[#allocation7 + $0x10] sm:$0xff]   ;;  %s1823_s15 = scalar_lea.sflag [#allocation4], %s3373_s5  ;;  %s2893_s3 = scalar_lea.vmem %s4061_s21, 2048 }
 0x124   : > { %2215 = vmatprep.subr.bf16.mxu1 %v2470_v1  ;;  %v501_v6 = vpack.c.bf16 %v486_v5, %v485_v4  ;;  %v2477_v7 = vld [vmem:[#allocation7] sm:$0xff]   ;;  %v2474_v11 = vld [vmem:[#allocation10 + $0x28] sm:$0xff]   ;;  %v2480_v12 = vld [vmem:[#allocation7 + $0x18] sm:$0xff]   ;;  %p2894_p6 = scmp.ne.s32.totalorder %s4061_s21, %s2893_s3  ;;  %p4192_p10 = scmp.ne.s32.totalorder %s4144_s26, 0 }
 0x125   : > { %v2473_v8 = vld [vmem:[#allocation10 + $0x20] sm:$0xff]   ;;  %2181 = vmatprep.subr.bf16.mxu0 %v2477_v7  ;;  %v2475_v13 = vld [vmem:[#allocation10 + $0x30] sm:$0xff]   ;;  %v2476_v15 = vld [vmem:[#allocation10 + $0x38] sm:$0xff]   ;;  %s2994_s18 = smov [#allocation17]  }
 0x126   : > { %2229 = vmatprep.mubr.bf16.mxu1 %v501_v6  ;;  %2197 = vmatprep.mubr.bf16.mxu0 %v501_v6  ;;  %v2481_v14 = vld [vmem:[#allocation7 + $0x20] sm:$0xff]   ;;  %v487_v16 = vld [vmem:[%s3380_s25 + $0x10] sm:$0xff]  ;;  %v488_v17 = vld [vmem:[%s3380_s25 + $0x18] sm:$0xff]  ;;  %p2895_p5 = pnand %p2894_p6, %p4192_p10  ;;  %s2897_s2 = sshll.u32 %s2994_s18, 4  ;;  %s2898_s2 = int_to_ptr.vmem [resolvable:$false] %s2897_s2 }
 0x127   : > { %2216 = vmatpush3.bf16.msra.mxu1 %v2470_v1  ;;  %2182 = vmatpush3.bf16.msra.mxu0 %v2477_v7  ;;  %v2482_v18 = vld [vmem:[#allocation7 + $0x28] sm:$0xff]   ;;  %v489_v19 = vld [vmem:[%s3380_s25 + $0x20] sm:$0xff]  ;;  %v502_v21 = vpack.c.bf16 %v488_v17, %v487_v16  ;;  %v2483_v23 = vld [vmem:[#allocation7 + $0x30] sm:$0xff]   ;;  %s2899_s22 = scalar_lea.vmem %s2898_s2, 4096  ;;  %p2900_p4 = scmp.lt.s32.totalorder %s4061_s21, %s2898_s2 }
 0x128   : > { %2217 = vmatprep.subr.bf16.mxu1 %v2471_v2  ;;  %2183 = vmatprep.subr.bf16.mxu0 %v2478_v9  ;;  %v490_v20 = vld [vmem:[%s3380_s25 + $0x28] sm:$0xff]  ;;  %v491_v24 = vld [vmem:[%s3380_s25 + $0x30] sm:$0xff]  ;;  %v492_v25 = vld [vmem:[%s3380_s25 + $0x38] sm:$0xff]  ;;  %s4059_s29 = scalar_lea.hbm %s4191_s20, %s2100_s28  ;;  %p2896_p9 = pneg %p2895_p5 }
 0x129   : > { %v503_v22 = vpack.c.bf16 %v490_v20, %v489_v19  ;;  %v2484_v26 = vld [vmem:[#allocation7 + $0x38] sm:$0xff]   ;;  %v493_v27 = vld [vmem:[%s3380_s25 + $0x40] sm:$0xff]  ;;  %v494_v28 = vld [vmem:[%s3380_s25 + $0x48] sm:$0xff]  ;;  %v504_v29 = vpack.c.bf16 %v492_v25, %v491_v24  ;;  %p2901_p8 = scmp.lt.s32.totalorder %s2899_s22, %s2893_s3 }
 0x12a   : > { %v505_v30 = vpack.c.bf16 %v494_v28, %v493_v27  ;;  %v495_v31 = vld [vmem:[%s3380_s25 + $0x50] sm:$0xff]  ;;  %v496_v32 = vld [vmem:[%s3380_s25 + $0x58] sm:$0xff]  ;;  %v497_v33 = vld [vmem:[%s3380_s25 + $0x60] sm:$0xff] }
 0x12b   : > { %2218 = vmatpush3.bf16.msra.mxu1 %v2471_v2  ;;  %2184 = vmatpush3.bf16.msra.mxu0 %v2478_v9  ;;  %v498_v34 = vld [vmem:[%s3380_s25 + $0x68] sm:$0xff]  ;;  %v506_v35 = vpack.c.bf16 %v496_v32, %v495_v31  ;;  %v499_v37 = vld [vmem:[%s3380_s25 + $0x70] sm:$0xff]  ;;  %v500_v38 = vld [vmem:[%s3380_s25 + $0x78] sm:$0xff]  ;;  %p2902_p11 = por %p2901_p8, %p2900_p4 }
 0x12c   : > { %2219 = vmatprep.subr.bf16.mxu1 %v2472_v3  ;;  %2185 = vmatprep.subr.bf16.mxu0 %v2479_v10  ;;  %v507_v36 = vpack.c.bf16 %v498_v34, %v497_v33  ;;  %v508_v39 = vpack.c.bf16 %v500_v38, %v499_v37  ;;  %v3426_v41 = vld [vmem:[#allocation11] ss:$0 sm:$0xff]  ;;  %v3433_v54 = vld [vmem:[#allocation8] ss:$0 sm:$0xff] }
 0x12d   : > { %p2903_p0 = pnand %p2902_p11, %p2896_p9 }
 0x12f   : > { %2220 = vmatpush3.bf16.msra.mxu1 %v2472_v3  ;;  %2186 = vmatpush3.bf16.msra.mxu0 %v2479_v10 }
 0x130   : > { %2221 = vmatprep.subr.bf16.mxu1 %v2473_v8  ;;  %2187 = vmatprep.subr.bf16.mxu0 %v2480_v12 }
 0x133   : > { %2222 = vmatpush3.bf16.msra.mxu1 %v2473_v8  ;;  %2188 = vmatpush3.bf16.msra.mxu0 %v2480_v12 }
 0x134   : > { %2223 = vmatprep.subr.bf16.mxu1 %v2474_v11  ;;  %2189 = vmatprep.subr.bf16.mxu0 %v2481_v14 }
 0x137   : > { %2224 = vmatpush3.bf16.msra.mxu1 %v2474_v11  ;;  %2190 = vmatpush3.bf16.msra.mxu0 %v2481_v14 }
 0x138   : > { %2225 = vmatprep.subr.bf16.mxu1 %v2475_v13  ;;  %2191 = vmatprep.subr.bf16.mxu0 %v2482_v18 }
 0x13b   : > { %2226 = vmatpush3.bf16.msra.mxu1 %v2475_v13  ;;  %2192 = vmatpush3.bf16.msra.mxu0 %v2482_v18 }
 0x13c   : > { %2227 = vmatprep.subr.bf16.mxu1 %v2476_v15  ;;  %2193 = vmatprep.subr.bf16.mxu0 %v2483_v23 }
 0x13f   : > { %2228 = vmatpush3.bf16.msra.mxu1 %v2476_v15  ;;  %2194 = vmatpush3.bf16.msra.mxu0 %v2483_v23 }
 0x140   : > { %2277 = vmatprep.subr.bf16.mxu1 %v501_v6  ;;  %2195 = vmatprep.subr.bf16.mxu0 %v2484_v26 }
 0x142   : > { %2230 = vmatmul.mubr.bf16.vlgmr.msra.gmra.mrb[0].mxu1 %v502_v21 }
 0x143   : > { %2233 = vmatprep.mubr.bf16.mxu1 %v503_v22  ;;  %2278 = vmatpush3.bf16.msra.mxu1 %v501_v6 }
 0x144   : > { %2279 = vmatprep.subr.bf16.mxu1 %v502_v21  ;;  %2196 = vmatpush3.bf16.msra.mxu0 %v2484_v26 }
 0x147   : > { %2280 = vmatpush3.bf16.msra.mxu1 %v502_v21  ;;  %2198 = vmatmul.mubr.bf16.vlgmr.msra.gmra.mrb[0].mxu0 %v502_v21 }
 0x148   : > { %2281 = vmatprep.subr.bf16.mxu1 %v503_v22  ;;  %2201 = vmatprep.mubr.bf16.mxu0 %v503_v22 }
 0x14a   : > { %2234 = vmatmul.mubr.bf16.gmra.mrb[4].mxu1 %v504_v29 }
 0x14b   : > { %2237 = vmatprep.mubr.bf16.mxu1 %v505_v30  ;;  %2282 = vmatpush3.bf16.msra.mxu1 %v503_v22 }
 0x14c   : > { %2283 = vmatprep.subr.bf16.mxu1 %v504_v29 }
 0x14f   : > { %2284 = vmatpush3.bf16.msra.mxu1 %v504_v29  ;;  %2202 = vmatmul.mubr.bf16.gmra.mrb[4].mxu0 %v504_v29 }
 0x150   : > { %2285 = vmatprep.subr.bf16.mxu1 %v505_v30  ;;  %2205 = vmatprep.mubr.bf16.mxu0 %v505_v30 }
 0x152   : > { %2238 = vmatmul.mubr.bf16.gmra.mrb[8].mxu1 %v506_v35 }
 0x153   : > { %2241 = vmatprep.mubr.bf16.mxu1 %v507_v36  ;;  %2286 = vmatpush3.bf16.msra.mxu1 %v505_v30 }
 0x154   : > { %2287 = vmatprep.subr.bf16.mxu1 %v506_v35 }
 0x157   : > { %2288 = vmatpush3.bf16.msra.mxu1 %v506_v35  ;;  %2206 = vmatmul.mubr.bf16.gmra.mrb[8].mxu0 %v506_v35 }
 0x158   : > { %2289 = vmatprep.subr.bf16.mxu1 %v507_v36  ;;  %2209 = vmatprep.mubr.bf16.mxu0 %v507_v36 }
 0x15a   : > { %2242 = vmatmul.mubr.bf16.gmra.mrb[12].mxu1 %v508_v39 }
 0x15b   : > { %2290 = vmatpush3.bf16.msra.mxu1 %v507_v36 }
 0x15c   : > { %2291 = vmatprep.subr.bf16.mxu1 %v508_v39 }
 0x15f   : > { %2292 = vmatpush3.bf16.msra.mxu1 %v508_v39  ;;  %2210 = vmatmul.mubr.bf16.gmra.mrb[12].mxu0 %v508_v39 }
 0x215   : > { %v2231_v40 = vpop.f32.mrb[0].mxu1 }
 0x216   : > { %v782_v42 = vpop.f32.mrb[1].mxu1  ;;  %v791_v44 = vadd.f32 %v2231_v40, %v3426_v41 }
 0x217   : > { %v2232_v43 = vpop.f32.mrb[2].mxu1  ;;  %v783_v47 = vadd.f32 %v3426_v41, %v782_v42 }
 0x218   : > { %v794_v45 = vadd.f32 %v2232_v43, %v3426_v41  ;;  %v785_v46 = vpop.f32.mrb[3].mxu1 }
 0x219   : > { %v786_v48 = vadd.f32 %v3426_v41, %v785_v46 }
 0x21a   : > { %v854_v49 = vpack.c.bf16 %v794_v45, %v791_v44  ;;  %v2199_v59 = vpop.f32.mrb[0].mxu0 }
 0x21b   : > { %v853_v50 = vpack.c.bf16 %v786_v48, %v783_v47  ;;  %v3439_v61 = vadd.f32 %v2199_v59, %v3433_v54  ;;  %v614_v62 = vpop.f32.mrb[1].mxu0  ;;  %v3475_v59 = vld [vmem:[%s3388_s16] sm:$0xff] }
 0x21c   : > { %v615_v0 = vadd.f32 %v3433_v54, %v614_v62  ;;  %v2200_v1 = vpop.f32.mrb[2].mxu0  ;;  %vm990_vm1 = vcmp.eq.f32.partialorder %v3475_v59, 0.0 }
 0x21d   : > { %2245 = vmatprep.subr.bf16.mxu0 %v853_v50  ;;  %v2235_v51 = vpop.f32.mrb[4].mxu1  ;;  %v3443_v3 = vadd.f32 %v2200_v1, %v3433_v54  ;;  %v617_v4 = vpop.f32.mrb[3].mxu0 }
 0x21e   : > { %2246 = vmatpush3.bf16.xpose.msra.mxu0 %v853_v50  ;;  %v807_v52 = vadd.f32 %v2235_v51, %v3426_v41  ;;  %v798_v53 = vpop.f32.mrb[5].mxu1  ;;  %v618_v5 = vadd.f32 %v3433_v54, %v617_v4 }
 0x21f   : > { %2247 = vmatprep.subr.bf16.mxu0 %v854_v49  ;;  %v799_v55 = vadd.f32 %v3426_v41, %v798_v53  ;;  %v2236_v56 = vpop.f32.mrb[6].mxu1  ;;  %v846_v7 = vpack.c.bf16 %v3443_v3, %v3439_v61  ;;  %v3480_v61 = vld [vmem:[%s3388_s16 + $0x18] sm:$0xff] }
 0x220   : > { %v810_v57 = vadd.f32 %v2236_v56, %v3426_v41  ;;  %v801_v58 = vpop.f32.mrb[7].mxu1  ;;  %v845_v10 = vpack.c.bf16 %v618_v5, %v615_v0  ;;  %vm993_vm2 = vcmp.eq.f32.partialorder %v3480_v61, 0.0 }
 0x221   : > { %v802_v60 = vadd.f32 %v3426_v41, %v801_v58 }
 0x222   : > { %v856_v63 = vpack.c.bf16 %v810_v57, %v807_v52  ;;  %2261 = vmatprep.mubr.bf16.mxu0 %v845_v10  ;;  %v2203_v15 = vpop.f32.mrb[4].mxu0 }
 0x223   : > { %v855_v2 = vpack.c.bf16 %v802_v60, %v799_v55  ;;  %v639_v17 = vadd.f32 %v2203_v15, %v3433_v54  ;;  %v630_v18 = vpop.f32.mrb[5].mxu0 }
 0x224   : > { %v631_v20 = vadd.f32 %v3433_v54, %v630_v18  ;;  %v2204_v21 = vpop.f32.mrb[6].mxu0  ;;  %v3518_v18 = vld [vmem:[%s3388_s16 + $0x38] sm:$0xff] }
 0x225   : > { %v2239_v6 = vpop.f32.mrb[8].mxu1  ;;  %v642_v23 = vadd.f32 %v2204_v21, %v3433_v54  ;;  %v633_v24 = vpop.f32.mrb[7].mxu0  ;;  %vm997_vm7 = vcmp.eq.f32.partialorder %v3518_v18, 0.0 }
 0x226   : > { %2248 = vmatpush3.bf16.xpose.msra.mxu0 %v854_v49  ;;  %v823_v8 = vadd.f32 %v2239_v6, %v3426_v41  ;;  %v814_v9 = vpop.f32.mrb[9].mxu1  ;;  %v634_v25 = vadd.f32 %v3433_v54, %v633_v24 }
 0x227   : > { %2249 = vmatprep.subr.bf16.mxu0 %v855_v2  ;;  %v815_v11 = vadd.f32 %v3426_v41, %v814_v9  ;;  %v2240_v12 = vpop.f32.mrb[10].mxu1  ;;  %v848_v27 = vpack.c.bf16 %v642_v23, %v639_v17 }
 0x228   : > { %v826_v13 = vadd.f32 %v2240_v12, %v3426_v41  ;;  %v817_v14 = vpop.f32.mrb[11].mxu1  ;;  %v847_v30 = vpack.c.bf16 %v634_v25, %v631_v20  ;;  %v3510_v12 = vld [vmem:[%s3388_s16 + $0x28] sm:$0xff]  ;;  %v3537_v25 = vld [vmem:[%s3388_s16 + $0x40] sm:$0xff] }
 0x229   : > { %v818_v16 = vadd.f32 %v3426_v41, %v817_v14  ;;  %vm995_vm5 = vcmp.eq.f32.partialorder %v3510_v12, 0.0  ;;  %vm998_vm8 = vcmp.eq.f32.partialorder %v3537_v25, 0.0  ;;  %v2623_v25 = vld [vmem:[%s3380_s25 + $0x18] sm:$0xff] }
 0x22a   : > { %v858_v19 = vpack.c.bf16 %v826_v13, %v823_v8  ;;  %v2207_v35 = vpop.f32.mrb[8].mxu0  ;;  %v3498_v8 = vld [vmem:[%s3388_s16 + $0x20] sm:$0xff]  ;;  %v3513_v13 = vld [vmem:[%s3388_s16 + $0x30] sm:$0xff] }
 0x22b   : > { %v857_v22 = vpack.c.bf16 %v818_v16, %v815_v11  ;;  %v655_v37 = vadd.f32 %v2207_v35, %v3433_v54  ;;  %v646_v38 = vpop.f32.mrb[9].mxu0  ;;  %vm994_vm4 = vcmp.eq.f32.partialorder %v3498_v8, 0.0  ;;  %vm996_vm6 = vcmp.eq.f32.partialorder %v3513_v13, 0.0 }
 0x22c   : > { %v647_v40 = vadd.f32 %v3433_v54, %v646_v38  ;;  %v2208_v42 = vpop.f32.mrb[10].mxu0 }
 0x22d   : > { %v2243_v26 = vpop.f32.mrb[12].mxu1  ;;  %v658_v44 = vadd.f32 %v2208_v42, %v3433_v54  ;;  %v649_v45 = vpop.f32.mrb[11].mxu0  ;;  %v3573_v42 = vld [vmem:[%s3388_s16 + $0x60] sm:$0xff] }
 0x22e   : > { %2250 = vmatpush3.bf16.xpose.msra.mxu0 %v855_v2  ;;  %v839_v28 = vadd.f32 %v2243_v26, %v3426_v41  ;;  %v830_v29 = vpop.f32.mrb[13].mxu1  ;;  %v650_v46 = vadd.f32 %v3433_v54, %v649_v45  ;;  %v3483_v2 = vld [vmem:[%s3388_s16 + $0x8] sm:$0xff]  ;;  %vm1002_vm12 = vcmp.eq.f32.partialorder %v3573_v42, 0.0  ;;  %v2627_v42 = vld [vmem:[%s3380_s25 + $0x20] sm:$0xff] }
 0x22f   : > { %2251 = vmatprep.subr.bf16.mxu0 %v856_v63  ;;  %v831_v31 = vadd.f32 %v3426_v41, %v830_v29  ;;  %v2244_v32 = vpop.f32.mrb[14].mxu1  ;;  %v850_v47 = vpack.c.bf16 %v658_v44, %v655_v37  ;;  %vm991_vm3 = vcmp.eq.f32.partialorder %v3483_v2, 0.0  ;;  %v3548_v29 = vld [vmem:[%s3388_s16 + $0x50] sm:$0xff]  ;;  %v3581_v45 = vld [vmem:[%s3388_s16 + $0x68] sm:$0xff] }
 0x230   : > { %v842_v33 = vadd.f32 %v2244_v32, %v3426_v41  ;;  %v833_v34 = vpop.f32.mrb[15].mxu1  ;;  %v849_v48 = vpack.c.bf16 %v650_v46, %v647_v40  ;;  %vm1000_vm10 = vcmp.eq.f32.partialorder %v3548_v29, 0.0  ;;  %v3584_v46 = vld [vmem:[%s3388_s16 + $0x70] sm:$0xff]  ;;  %vm4127_vm13 = vcmp.eq.f32.partialorder %v3581_v45, 0.0 }
 0x231   : > { %v834_v36 = vadd.f32 %v3426_v41, %v833_v34  ;;  %v3553_v34 = vld [vmem:[%s3388_s16 + $0x58] sm:$0xff]  ;;  %vm4126_vm14 = vcmp.eq.f32.partialorder %v3584_v46, 0.0  ;;  %v2625_v29 = vld [vmem:[%s3380_s25 + $0x30] sm:$0xff] }
 0x232   : > { %v860_v39 = vpack.c.bf16 %v842_v33, %v839_v28  ;;  %v2211_v49 = vpop.f32.mrb[12].mxu0  ;;  %v3545_v28 = vld [vmem:[%s3388_s16 + $0x48] sm:$0xff]  ;;  %vm1001_vm11 = vcmp.eq.f32.partialorder %v3553_v34, 0.0 }
 0x233   : > { %v859_v43 = vpack.c.bf16 %v834_v36, %v831_v31  ;;  %v671_v41 = vadd.f32 %v2211_v49, %v3433_v54  ;;  %v662_v50 = vpop.f32.mrb[13].mxu0  ;;  %vm999_vm9 = vcmp.eq.f32.partialorder %v3545_v28, 0.0 }
 0x234   : > { %v663_v51 = vadd.f32 %v3433_v54, %v662_v50  ;;  %v2212_v52 = vpop.f32.mrb[14].mxu0  ;;  %v3589_v50 = vld [vmem:[%s3388_s16 + $0x78] sm:$0xff] }
 0x235   : > { %v674_v53 = vadd.f32 %v2212_v52, %v3433_v54  ;;  %v665_v55 = vpop.f32.mrb[15].mxu0  ;;  %vm4125_vm15 = vcmp.eq.f32.partialorder %v3589_v50, 0.0 }
 0x236   : > { %2252 = vmatpush3.bf16.xpose.msra.mxu0 %v856_v63  ;;  %v666_v56 = vadd.f32 %v3433_v54, %v665_v55  ;;  %v3472_v54 = vld [vmem:[%s3388_s16 + $0x10] sm:$0xff] }
 0x237   : > { %2253 = vmatprep.subr.bf16.mxu0 %v857_v22  ;;  %v852_v57 = vpack.c.bf16 %v674_v53, %v671_v41  ;;  %vm992_vm0 = vcmp.eq.f32.partialorder %v3472_v54, 0.0 }
 0x238   : > { %v851_v58 = vpack.c.bf16 %v666_v56, %v663_v51 }
 0x23e   : > { %2254 = vmatpush3.bf16.xpose.msra.mxu0 %v857_v22 }
 0x23f   : > { %2255 = vmatprep.subr.bf16.mxu0 %v858_v19 }
 0x246   : > { %2256 = vmatpush3.bf16.xpose.msra.mxu0 %v858_v19 }
 0x247   : > { %2257 = vmatprep.subr.bf16.mxu0 %v859_v43 }
 0x24e   : > { %2258 = vmatpush3.bf16.xpose.msra.mxu0 %v859_v43 }
 0x24f   : > { %2259 = vmatprep.subr.bf16.mxu0 %v860_v39 }
 0x256   : > { %2260 = vmatpush3.bf16.xpose.msra.mxu0 %v860_v39 }
 0x25d   : > { %2262 = vmatmul.mubr.bf16.vlgmr.msra.gmra.mrb[16].mxu0 %v846_v7 }
 0x25e   : > { %2265 = vmatprep.mubr.bf16.mxu0 %v847_v30 }
 0x265   : > { %2266 = vmatmul.mubr.bf16.gmra.mrb[20].mxu0 %v848_v27 }
 0x266   : > { %2269 = vmatprep.mubr.bf16.mxu0 %v849_v48 }
 0x26d   : > { %2270 = vmatmul.mubr.bf16.gmra.mrb[24].mxu0 %v850_v47 }
 0x26e   : > { %2273 = vmatprep.mubr.bf16.mxu0 %v851_v58 }
 0x275   : > { %2274 = vmatmul.mubr.bf16.gmra.mrb[28].mxu0 %v852_v57 }
 0x330   : > { %v2263_v60 = vpop.f32.mrb[16].mxu0 }
 0x331   : > { %v960_v62 = vmul.f32 0.25, %v2263_v60  ;;  %v895_v63 = vpop.f32.mrb[17].mxu0 }
 0x332   : > { %v958_v0 = vmul.f32 0.25, %v895_v63  ;;  %v2264_v1 = vpop.f32.mrb[18].mxu0 }
 0x333   : > { %v961_v3 = vmul.f32 0.25, %v2264_v1  ;;  %v898_v4 = vpop.f32.mrb[19].mxu0  ;;  %v3487_v5 = vsel %vm992_vm0, -32752.0, %v960_v62 }
 0x334   : > { %v959_v6 = vmul.f32 0.25, %v898_v4  ;;  %1026 = vmax.xlane.f32.xlu1 %v3487_v5  ;;  %v3492_v7 = vsel %vm990_vm1, -32752.0, %v958_v0 }
 0x335   : > { %1022 = vmax.xlane.f32.xlu0 %v3492_v7  ;;  %v3502_v9 = vsel %vm993_vm2, -32752.0, %v961_v3 }
 0x336   : > { %v3507_v11 = vsel %vm991_vm3, -32752.0, %v959_v6 }
 0x338   : > { %1028 = vmax.xlane.f32.xlu1 %v3502_v9  ;;  %v2267_v10 = vpop.f32.mrb[20].mxu0 }
 0x339   : > { %1024 = vmax.xlane.f32.xlu0 %v3507_v11  ;;  %v911_v14 = vpop.f32.mrb[21].mxu0  ;;  %v964_v15 = vmul.f32 0.25, %v2267_v10 }
 0x33a   : > { %v962_v16 = vmul.f32 0.25, %v911_v14  ;;  %v2268_v17 = vpop.f32.mrb[22].mxu0 }
 0x33b   : > { %v914_v19 = vpop.f32.mrb[23].mxu0  ;;  %v965_v20 = vmul.f32 0.25, %v2268_v17  ;;  %v3534_v24 = vsel %vm996_vm6, -32752.0, %v964_v15 }
 0x33c   : > { %v963_v21 = vmul.f32 0.25, %v914_v19  ;;  %v3524_v22 = vsel %vm994_vm4, -32752.0, %v962_v16 }
 0x33d   : > { %1030 = vmax.xlane.f32.xlu0 %v3524_v22  ;;  %v3542_v27 = vsel %vm997_vm7, -32752.0, %v965_v20 }
 0x33e   : > { %v3530_v23 = vsel %vm995_vm5, -32752.0, %v963_v21 }
 0x33f   : > { %1032 = vmax.xlane.f32.xlu1 %v3530_v23 }
 0x340   : > { %v2271_v26 = vpop.f32.mrb[24].mxu0 }
 0x341   : > { %1034 = vmax.xlane.f32.xlu0 %v3534_v24  ;;  %v927_v30 = vpop.f32.mrb[25].mxu0  ;;  %v968_v31 = vmul.f32 0.25, %v2271_v26 }
 0x342   : > { %v966_v32 = vmul.f32 0.25, %v927_v30  ;;  %v2272_v33 = vpop.f32.mrb[26].mxu0 }
 0x343   : > { %1036 = vmax.xlane.f32.xlu1 %v3542_v27  ;;  %v930_v35 = vpop.f32.mrb[27].mxu0  ;;  %v969_v36 = vmul.f32 0.25, %v2272_v33  ;;  %v3570_v40 = vsel %vm1000_vm10, -32752.0, %v968_v31 }
 0x344   : > { %v967_v37 = vmul.f32 0.25, %v930_v35  ;;  %v3560_v38 = vsel %vm998_vm8, -32752.0, %v966_v32 }
 0x345   : > { %1038 = vmax.xlane.f32.xlu0 %v3560_v38  ;;  %v3578_v44 = vsel %vm1001_vm11, -32752.0, %v969_v36 }
 0x346   : > { %v3566_v39 = vsel %vm999_vm9, -32752.0, %v967_v37 }
 0x347   : > { %1040 = vmax.xlane.f32.xlu1 %v3566_v39 }
 0x348   : > { %v2275_v43 = vpop.f32.mrb[28].mxu0 }
 0x349   : > { %1042 = vmax.xlane.f32.xlu0 %v3570_v40  ;;  %v943_v47 = vpop.f32.mrb[29].mxu0  ;;  %v972_v48 = vmul.f32 0.25, %v2275_v43 }
 0x34a   : > { %v970_v49 = vmul.f32 0.25, %v943_v47  ;;  %v2276_v41 = vpop.f32.mrb[30].mxu0 }
 0x34b   : > { %1044 = vmax.xlane.f32.xlu1 %v3578_v44  ;;  %v946_v51 = vpop.f32.mrb[31].mxu0  ;;  %v973_v52 = vmul.f32 0.25, %v2276_v41  ;;  %v3606_v57 = vsel %vm4126_vm14, -32752.0, %v972_v48  ;;  %vm3687_vm14 = vmneg %vm991_vm3 }
 0x34c   : > { %v971_v53 = vmul.f32 0.25, %v946_v51  ;;  %v3596_v55 = vsel %vm1002_vm12, -32752.0, %v970_v49  ;;  %vm3717_vm3 = vmneg %vm994_vm4 }
 0x34d   : > { %1046 = vmax.xlane.f32.xlu0 %v3596_v55  ;;  %v3611_v58 = vsel %vm4125_vm15, -32752.0, %v973_v52  ;;  %vm3681_vm15 = vmneg %vm990_vm1 }
 0x34e   : > { %v3602_v56 = vsel %vm4127_vm13, -32752.0, %v971_v53  ;;  %vm3693_vm13 = vmneg %vm992_vm0 }
 0x34f   : > { %1048 = vmax.xlane.f32.xlu1 %v3602_v56  ;;  %vm3699_vm1 = vmneg %vm993_vm2 }
 0x350   : > { %vm2045_vm0 = vmpackc.low %vm3687_vm14, %vm3681_vm15 }
 0x351   : > { %1050 = vmax.xlane.f32.xlu0 %v3606_v57  ;;  %vm2050_vm2 = vmpackc.low %vm3699_vm1, %vm3693_vm13 }
 0x352   : > { %vm3723_vm14 = vmneg %vm995_vm5 }
 0x353   : > { %1052 = vmax.xlane.f32.xlu1 %v3611_v58  ;;  %vm3729_vm13 = vmneg %vm996_vm6 }
 0x354   : > { %vm2055_vm4 = vmpackc.low %vm3723_vm14, %vm3717_vm3 }
 0x355   : > { %vm3741_vm5 = vmneg %vm997_vm7 }
 0x356   : > { %vm3747_vm6 = vmneg %vm998_vm8 }
 0x357   : > { %vm2060_vm7 = vmpackc.low %vm3741_vm5, %vm3729_vm13  ;;  %vm4190_vm13 = vcmp.eq.f32.partialorder %v3589_v50, 0.0 }
 0x358   : > { %vm3759_vm15 = vmneg %vm999_vm9 }
 0x359   : > { %vm3765_vm8 = vmneg %vm1000_vm10 }
 0x35a   : > { %vm2065_vm9 = vmpackc.low %vm3759_vm15, %vm3747_vm6 }
 0x35b   : > { %vm3777_vm1 = vmneg %vm1001_vm11 }
 0x35c   : > { %vm3783_vm10 = vmneg %vm1002_vm12  ;;  %vm4187_vm12 = vcmp.eq.f32.partialorder %v3584_v46, 0.0 }
 0x35d   : > { %vm2070_vm11 = vmpackc.low %vm3777_vm1, %vm3765_vm8 }
 0x35e   : > { %vm3801_vm3 = vmneg %vm4187_vm12 }
 0x3c1   : > { %v1027_v60 = vpop.xlane.xlu1 %1026 }
 0x3c2   : > { %v1056_v62 = vsub.f32 %v3487_v5, %v1027_v60  ;;  %v1023_v63 = vpop.xlane.xlu0 %1022 }
 0x3c3   : > { %v1054_v0 = vsub.f32 %v3492_v7, %v1023_v63 }
 0x3c4   : > { %v1074_v4 = vmul.f32 1.442695, %v1056_v62 }
 0x3c5   : > { %v1070_v1 = vmul.f32 1.442695, %v1054_v0  ;;  %v1029_v3 = vpop.xlane.xlu1 %1028 }
 0x3c6   : > { %v1057_v6 = vsub.f32 %v3502_v9, %v1029_v3  ;;  %v1025_v10 = vpop.xlane.xlu0 %1024 }
 0x3c7   : > { %2493 = vpow2.f32 %v1070_v1  ;;  %v1055_v14 = vsub.f32 %v3507_v11, %v1025_v10 }
 0x3c8   : > { %2495 = vpow2.f32 %v1074_v4  ;;  %v1076_v16 = vmul.f32 1.442695, %v1057_v6 }
 0x3c9   : > { %v1072_v15 = vmul.f32 1.442695, %v1055_v14 }
 0x3ca   : > { %v1031_v17 = vpop.xlane.xlu0 %1030 }
 0x3cb   : > { %2497 = vpow2.f32 %v1072_v15  ;;  %v1058_v19 = vsub.f32 %v3524_v22, %v1031_v17 }
 0x3cc   : > { %v1033_v5 = vpop.xlane.xlu1 %1032  ;;  %2499 = vpow2.f32 %v1076_v16 }
 0x3cd   : > { %v1078_v20 = vmul.f32 1.442695, %v1058_v19  ;;  %v1059_v7 = vsub.f32 %v3530_v23, %v1033_v5 }
 0x3ce   : > { %v1035_v21 = vpop.xlane.xlu0 %1034 }
 0x3cf   : > { %2501 = vpow2.f32 %v1078_v20  ;;  %v1080_v26 = vmul.f32 1.442695, %v1059_v7  ;;  %v1060_v9 = vsub.f32 %v3534_v24, %v1035_v21  ;;  %v2485_v7 = vld [vmem:[#allocation13] sm:$0xff]  }
 0x3d0   : > { %v1037_v30 = vpop.xlane.xlu1 %1036  ;;  %2309 = vmatprep.subr.bf16.mxu1 %v2485_v7 }
 0x3d1   : > { %v3622_v31 = vpop.eup %2493  ;;  %v1082_v11 = vmul.f32 1.442695, %v1060_v9  ;;  %v1061_v32 = vsub.f32 %v3542_v27, %v1037_v30  ;;  %2503 = vpow2.f32 %v1080_v26 }
 0x3d2   : > { %v1039_v33 = vpop.xlane.xlu0 %1038  ;;  %1102 = vadd.xlane.f32.xlu0 %v3622_v31  ;;  %v3627_v35 = vpop.eup %2495 }
 0x3d3   : > { %2505 = vpow2.f32 %v1082_v11  ;;  %v1084_v22 = vmul.f32 1.442695, %v1061_v32  ;;  %v1062_v23 = vsub.f32 %v3560_v38, %v1039_v33 }
 0x3d4   : > { %v1041_v36 = vpop.xlane.xlu1 %1040 }
 0x3d5   : > { %v3629_v37 = vpop.eup %2497  ;;  %v1086_v24 = vmul.f32 1.442695, %v1062_v23  ;;  %v1063_v43 = vsub.f32 %v3566_v39, %v1041_v36  ;;  %2507 = vpow2.f32 %v1084_v22 }
 0x3d6   : > { %v1043_v47 = vpop.xlane.xlu0 %1042  ;;  %1106 = vadd.xlane.f32.xlu0 %v3627_v35  ;;  %1104 = vadd.xlane.f32.xlu1 %v3629_v37  ;;  %v3635_v49 = vpop.eup %2499 }
 0x3d7   : > { %2509 = vpow2.f32 %v1086_v24  ;;  %v1088_v27 = vmul.f32 1.442695, %v1063_v43  ;;  %v1064_v48 = vsub.f32 %v3570_v40, %v1043_v47 }
 0x3d8   : > { %v1045_v38 = vpop.xlane.xlu1 %1044 }
 0x3d9   : > { %v3637_v41 = vpop.eup %2501  ;;  %v1090_v51 = vmul.f32 1.442695, %v1064_v48  ;;  %v1065_v52 = vsub.f32 %v3578_v44, %v1045_v38  ;;  %2511 = vpow2.f32 %v1088_v27  ;;  %v2491_v27 = vld [vmem:[#allocation13 + $0x30] sm:$0xff]  }
 0x3da   : > { %1110 = vadd.xlane.f32.xlu0 %v3637_v41  ;;  %v1047_v39 = vpop.xlane.xlu0 %1046  ;;  %1108 = vadd.xlane.f32.xlu1 %v3635_v49 }
 0x3db   : > { %2513 = vpow2.f32 %v1090_v51  ;;  %v1092_v53 = vmul.f32 1.442695, %v1065_v52  ;;  %v1066_v60 = vsub.f32 %v3596_v55, %v1047_v39  ;;  %v3643_v62 = vpop.eup %2503 }
 0x3dc   : > { %v1049_v40 = vpop.xlane.xlu1 %1048 }
 0x3dd   : > { %v3645_v63 = vpop.eup %2505  ;;  %v1094_v0 = vmul.f32 1.442695, %v1066_v60  ;;  %v1067_v1 = vsub.f32 %v3602_v56, %v1049_v40  ;;  %2515 = vpow2.f32 %v1092_v53 }
 0x3de   : > { %1114 = vadd.xlane.f32.xlu0 %v3645_v63  ;;  %v1051_v44 = vpop.xlane.xlu0 %1050  ;;  %1112 = vadd.xlane.f32.xlu1 %v3643_v62 }
 0x3df   : > { %2517 = vpow2.f32 %v1094_v0  ;;  %v1096_v3 = vmul.f32 1.442695, %v1067_v1  ;;  %v1068_v4 = vsub.f32 %v3606_v57, %v1051_v44  ;;  %v3651_v6 = vpop.eup %2507  ;;  %v2486_v0 = vld [vmem:[#allocation13 + $0x8] sm:$0xff]  }
 0x3e0   : > { %v1053_v55 = vpop.xlane.xlu1 %1052 }
 0x3e1   : > { %v3653_v10 = vpop.eup %2509  ;;  %v1098_v14 = vmul.f32 1.442695, %v1068_v4  ;;  %v1069_v15 = vsub.f32 %v3611_v58, %v1053_v55  ;;  %2519 = vpow2.f32 %v1096_v3  ;;  %v2487_v55 = vld [vmem:[#allocation13 + $0x10] sm:$0xff]  }
 0x3e2   : > { %1118 = vadd.xlane.f32.xlu0 %v3653_v10  ;;  %1116 = vadd.xlane.f32.xlu1 %v3651_v6 }
 0x3e3   : > { %2521 = vpow2.f32 %v1098_v14  ;;  %v1100_v56 = vmul.f32 1.442695, %v1069_v15  ;;  %v3658_v16 = vpop.eup %2511  ;;  %v2622_v15 = vld [vmem:[%s3380_s25] sm:$0xff] }
 0x3e5   : > { %v3660_v17 = vpop.eup %2513  ;;  %2523 = vpow2.f32 %v1100_v56 }
 0x3e6   : > { %1122 = vadd.xlane.f32.xlu0 %v3660_v17  ;;  %1120 = vadd.xlane.f32.xlu1 %v3658_v16 }
 0x3e7   : > { %v3664_v57 = vpop.eup %2515 }
 0x3e9   : > { %v3666_v19 = vpop.eup %2517 }
 0x3ea   : > { %1126 = vadd.xlane.f32.xlu0 %v3666_v19  ;;  %1124 = vadd.xlane.f32.xlu1 %v3664_v57 }
 0x3eb   : > { %v3670_v58 = vpop.eup %2519 }
 0x3ed   : > { %v3672_v5 = vpop.eup %2521 }
 0x3ee   : > { %1130 = vadd.xlane.f32.xlu0 %v3672_v5  ;;  %1128 = vadd.xlane.f32.xlu1 %v3670_v58 }
 0x3ef   : > { %v3676_v20 = vpop.eup %2523 }
 0x3f2   : > { %1132 = vadd.xlane.f32.xlu1 %v3676_v20 }
 0x45f   : > { %v1103_v21 = vpop.xlane.xlu0 %1102 }
 0x460   : > { %2525 = vrcp.f32 %v1103_v21 }
 0x463   : > { %v1107_v26 = vpop.xlane.xlu0 %1106  ;;  %v1105_v9 = vpop.xlane.xlu1 %1104 }
 0x464   : > { %2527 = vrcp.f32 %v1105_v9 }
 0x465   : > { %2529 = vrcp.f32 %v1107_v26 }
 0x467   : > { %v1111_v30 = vpop.xlane.xlu0 %1110  ;;  %v1109_v11 = vpop.xlane.xlu1 %1108 }
 0x468   : > { %2531 = vrcp.f32 %v1109_v11 }
 0x469   : > { %2533 = vrcp.f32 %v1111_v30 }
 0x46a   : > { %v2526_v22 = vpop.eup %2525 }
 0x46b   : > { %v1115_v32 = vpop.xlane.xlu0 %1114  ;;  %v1113_v33 = vpop.xlane.xlu1 %1112  ;;  %v1150_v2 = vmul.f32 %v2526_v22, %v3622_v31 }
 0x46c   : > { %2535 = vrcp.f32 %v1113_v33  ;;  %v2489_v33 = vld [vmem:[#allocation13 + $0x20] sm:$0xff]  }
 0x46d   : > { %2537 = vrcp.f32 %v1115_v32 }
 0x46e   : > { %v2528_v24 = vpop.eup %2527 }
 0x46f   : > { %v1119_v59 = vpop.xlane.xlu0 %1118  ;;  %v1117_v47 = vpop.xlane.xlu1 %1116  ;;  %v1151_v48 = vmul.f32 %v2528_v24, %v3629_v37  ;;  %v2490_v24 = vld [vmem:[#allocation13 + $0x28] sm:$0xff]  }
 0x470   : > { %v2530_v38 = vpop.eup %2529  ;;  %2539 = vrcp.f32 %v1117_v47 }
 0x471   : > { %v2046_v54 = vpack.c.bf16 %v1151_v48, %v1150_v2  ;;  %2541 = vrcp.f32 %v1119_v59  ;;  %v1152_v31 = vmul.f32 %v2530_v38, %v3627_v35 }
 0x472   : > { %v2532_v51 = vpop.eup %2531 }
 0x473   : > { %v1123_v52 = vpop.xlane.xlu0 %1122  ;;  %v1121_v61 = vpop.xlane.xlu1 %1120  ;;  %v1153_v37 = vmul.f32 %v2532_v51, %v3635_v49  ;;  %2293 = vmatprep.mubr.msk.bf16.mxu1 %vm2045_vm0, %v2046_v54  ;;  %vm4184_vm0 = vcmp.eq.f32.partialorder %v3581_v45, 0.0 }
 0x474   : > { %v2534_v39 = vpop.eup %2533  ;;  %2543 = vrcp.f32 %v1121_v61 }
 0x475   : > { %v2051_v40 = vpack.c.bf16 %v1153_v37, %v1152_v31  ;;  %2545 = vrcp.f32 %v1123_v52  ;;  %v1154_v44 = vmul.f32 %v2534_v39, %v3637_v41 }
 0x476   : > { %v2536_v35 = vpop.eup %2535 }
 0x477   : > { %v1127_v49 = vpop.xlane.xlu0 %1126  ;;  %v1125_v1 = vpop.xlane.xlu1 %1124  ;;  %2294 = vmatmul.mubr.msk.bf16.vlgmr.msra.gmra.mrb[16].mxu1 %vm2050_vm2, %v2051_v40  ;;  %v1155_v12 = vmul.f32 %v2536_v35, %v3643_v62  ;;  %vm3795_vm2 = vmneg %vm4184_vm0 }
 0x478   : > { %v2538_v3 = vpop.eup %2537  ;;  %2547 = vrcp.f32 %v1125_v1  ;;  %2310 = vmatpush3.bf16.msra.mxu1 %v2485_v7  ;;  %vm2075_vm14 = vmpackc.low %vm3795_vm2, %vm3783_vm10 }
 0x479   : > { %v2056_v4 = vpack.c.bf16 %v1155_v12, %v1154_v44  ;;  %2311 = vmatprep.subr.bf16.mxu1 %v2486_v0  ;;  %2549 = vrcp.f32 %v1127_v49  ;;  %v1156_v18 = vmul.f32 %v2538_v3, %v3645_v63  ;;  %v2488_v63 = vld [vmem:[#allocation13 + $0x18] sm:$0xff]  }
 0x47a   : > { %v2540_v41 = vpop.eup %2539 }
 0x47b   : > { %v1131_v62 = vpop.xlane.xlu0 %1130  ;;  %v1129_v14 = vpop.xlane.xlu1 %1128  ;;  %2297 = vmatprep.mubr.msk.bf16.mxu1 %vm2055_vm4, %v2056_v4  ;;  %v1157_v56 = vmul.f32 %v2540_v41, %v3651_v6  ;;  %vm2078_vm4 = vmneg %vm4190_vm13  ;;  %v2621_v41 = vld [vmem:[%s3380_s25 + $0x10] sm:$0xff] }
 0x47c   : > { %v2542_v7 = vpop.eup %2541  ;;  %2551 = vrcp.f32 %v1129_v14  ;;  %2312 = vmatpush3.bf16.msra.mxu1 %v2486_v0  ;;  %vm2080_vm5 = vmpackc.low %vm2078_vm4, %vm3801_vm3 }
 0x47d   : > { %2553 = vrcp.f32 %v1131_v62  ;;  %v2061_v21 = vpack.c.bf16 %v1157_v56, %v1156_v18  ;;  %2313 = vmatprep.subr.bf16.mxu1 %v2487_v55  ;;  %v1158_v28 = vmul.f32 %v2542_v7, %v3653_v10  ;;  %v2626_v10 = vld [vmem:[%s3380_s25 + $0x38] sm:$0xff] }
 0x47e   : > { %v2544_v26 = vpop.eup %2543 }
 0x47f   : > { %v1133_v6 = vpop.xlane.xlu1 %1132  ;;  %2298 = vmatmul.mubr.msk.bf16.gmra.mrb[20].mxu1 %vm2060_vm7, %v2061_v21  ;;  %v1159_v30 = vmul.f32 %v2544_v26, %v3658_v16  ;;  %v2546_v11 = vpop.eup %2545 }
 0x480   : > { %2555 = vrcp.f32 %v1133_v6  ;;  %2314 = vmatpush3.bf16.msra.mxu1 %v2487_v55  ;;  %v1160_v16 = vmul.f32 %v2546_v11, %v3660_v17  ;;  %v2624_v6 = vld [vmem:[%s3380_s25 + $0x8] sm:$0xff] }
 0x481   : > { %v2066_v32 = vpack.c.bf16 %v1159_v30, %v1158_v28  ;;  %2315 = vmatprep.subr.bf16.mxu1 %v2488_v63 }
 0x482   : > { %v2548_v22 = vpop.eup %2547 }
 0x483   : > { %2301 = vmatprep.mubr.msk.bf16.mxu1 %vm2065_vm9, %v2066_v32  ;;  %v1161_v23 = vmul.f32 %v2548_v22, %v3664_v57  ;;  %v2550_v34 = vpop.eup %2549 }
 0x484   : > { %2316 = vmatpush3.bf16.msra.mxu1 %v2488_v63  ;;  %v1162_v59 = vmul.f32 %v2550_v34, %v3666_v19 }
 0x485   : > { %v2071_v36 = vpack.c.bf16 %v1161_v23, %v1160_v16  ;;  %2317 = vmatprep.subr.bf16.mxu1 %v2489_v33 }
 0x486   : > { %v2552_v43 = vpop.eup %2551 }
 0x487   : > { %v2554_v17 = vpop.eup %2553  ;;  %2302 = vmatmul.mubr.msk.bf16.gmra.mrb[24].mxu1 %vm2070_vm11, %v2071_v36  ;;  %v1163_v45 = vmul.f32 %v2552_v43, %v3670_v58  ;;  %v2492_v58 = vld [vmem:[#allocation13 + $0x38] sm:$0xff]  }
 0x488   : > { %2318 = vmatpush3.bf16.msra.mxu1 %v2489_v33  ;;  %v1164_v2 = vmul.f32 %v2554_v17, %v3672_v5  ;;  %v2628_v17 = vld [vmem:[%s3380_s25 + $0x28] sm:$0xff] }
 0x489   : > { %v2076_v46 = vpack.c.bf16 %v1163_v45, %v1162_v59  ;;  %2319 = vmatprep.subr.bf16.mxu1 %v2490_v24 }
 0x48a   : > { %v2556_v47 = vpop.eup %2555 }
 0x48b   : > { %v1165_v48 = vmul.f32 %v2556_v47, %v3676_v20  ;;  %2305 = vmatprep.mubr.msk.bf16.mxu1 %vm2075_vm14, %v2076_v46 }
 0x48c   : > { %2320 = vmatpush3.bf16.msra.mxu1 %v2490_v24 }
 0x48d   : > { %v2081_v19 = vpack.c.bf16 %v1165_v48, %v1164_v2  ;;  %2321 = vmatprep.subr.bf16.mxu1 %v2491_v27 }
 0x48f   : > { %2306 = vmatmul.mubr.msk.bf16.gmra.mrb[28].mxu1 %vm2080_vm5, %v2081_v19 }
 0x490   : > { %2322 = vmatpush3.bf16.msra.mxu1 %v2491_v27 }
 0x491   : > { %2323 = vmatprep.subr.bf16.mxu1 %v2492_v58 }
 0x494   : > { %2324 = vmatpush3.bf16.msra.mxu1 %v2492_v58 }
 0x54a   : > { %v2295_v50 = vpop.f32.mrb[16].mxu1 }
 0x54b   : > { %v1224_v38 = vpop.f32.mrb[17].mxu1 }
 0x54c   : > { %v2296_v54 = vpop.f32.mrb[18].mxu1 }
 0x54d   : > { %v1288_v51 = vpack.c.bf16 %v2296_v54, %v2295_v50  ;;  %v1227_v52 = vpop.f32.mrb[19].mxu1 }
 0x54e   : > { %v1287_v5 = vpack.c.bf16 %v1227_v52, %v1224_v38 }
 0x550   : > { %2325 = vmatprep.mubr.bf16.mxu1 %v1287_v5 }
 0x551   : > { %2326 = vmatmul.mubr.bf16.vlgmr.msra.gmra.mrb[32].mxu1 %v1288_v51 }
 0x552   : > { %v2299_v20 = vpop.f32.mrb[20].mxu1 }
 0x553   : > { %v1240_v61 = vpop.f32.mrb[21].mxu1 }
 0x554   : > { %v2300_v31 = vpop.f32.mrb[22].mxu1 }
 0x555   : > { %v1290_v37 = vpack.c.bf16 %v2300_v31, %v2299_v20  ;;  %v1243_v39 = vpop.f32.mrb[23].mxu1 }
 0x556   : > { %v1289_v53 = vpack.c.bf16 %v1243_v39, %v1240_v61 }
 0x558   : > { %2329 = vmatprep.mubr.bf16.mxu1 %v1289_v53 }
 0x559   : > { %2330 = vmatmul.mubr.bf16.gmra.mrb[36].mxu1 %v1290_v37 }
 0x55a   : > { %v2303_v60 = vpop.f32.mrb[24].mxu1 }
 0x55b   : > { %v1256_v40 = vpop.f32.mrb[25].mxu1 }
 0x55c   : > { %v2304_v0 = vpop.f32.mrb[26].mxu1 }
 0x55d   : > { %v1292_v35 = vpack.c.bf16 %v2304_v0, %v2303_v60  ;;  %v1259_v49 = vpop.f32.mrb[27].mxu1 }
 0x55e   : > { %v1291_v1 = vpack.c.bf16 %v1259_v49, %v1256_v40  ;;  %v2629_v40 = vld [vmem:[%s3380_s25 + $0x50] sm:$0xff] }
 0x560   : > { %2333 = vmatprep.mubr.bf16.mxu1 %v1291_v1 }
 0x561   : > { %2334 = vmatmul.mubr.bf16.gmra.mrb[40].mxu1 %v1292_v35 }
 0x562   : > { %v2307_v8 = vpop.f32.mrb[28].mxu1 }
 0x563   : > { %v1272_v44 = vpop.f32.mrb[29].mxu1 }
 0x564   : > { %v2308_v12 = vpop.f32.mrb[30].mxu1 }
 0x565   : > { %v1294_v3 = vpack.c.bf16 %v2308_v12, %v2307_v8  ;;  %v1275_v13 = vpop.f32.mrb[31].mxu1 }
 0x566   : > { %v1293_v4 = vpack.c.bf16 %v1275_v13, %v1272_v44  ;;  %v2630_v44 = vld [vmem:[%s3380_s25 + $0x58] sm:$0xff] }
 0x568   : > { %2337 = vmatprep.mubr.bf16.mxu1 %v1293_v4 }
 0x569   : > { %2338 = vmatmul.mubr.bf16.gmra.mrb[44].mxu1 %v1294_v3 }
 0x624   : > { %v2327_v55 = vpop.f32.mrb[32].mxu1 }
 0x625   : > { %v1458_v62 = vadd.f32 %v2621_v41, %v2327_v55  ;;  %v1393_v14 = vpop.f32.mrb[33].mxu1  ;;  %v2631_v41 = vld [vmem:[%s3380_s25 + $0x40] sm:$0xff] }
 0x626   : > { %v1456_v18 = vadd.f32 %v2622_v15, %v1393_v14  ;;  %v2328_v56 = vpop.f32.mrb[34].mxu1 }
 0x627   : > { %v1490_v7 = vmul.f32 0.70710677, %v1458_v62  ;;  %v1459_v21 = vadd.f32 %v2623_v25, %v2328_v56  ;;  %v1396_v63 = vpop.f32.mrb[35].mxu1  ;;  %v1474_v45 = vmul.f32 0.5, %v1458_v62 }
 0x628   : > { %v1488_v26 = vmul.f32 0.70710677, %v1456_v18  ;;  %v1457_v9 = vadd.f32 %v2624_v6, %v1396_v63  ;;  %v1472_v20 = vmul.f32 0.5, %v1456_v18 }
 0x629   : > { %2557 = verf.f32 %v1490_v7  ;;  %v1491_v28 = vmul.f32 0.70710677, %v1459_v21  ;;  %v1475_v50 = vmul.f32 0.5, %v1459_v21  ;;  %v2632_v7 = vld [vmem:[%s3380_s25 + $0x48] sm:$0xff] }
 0x62a   : > { %2559 = verf.f32 %v1488_v26  ;;  %v1489_v30 = vmul.f32 0.70710677, %v1457_v9  ;;  %v1473_v37 = vmul.f32 0.5, %v1457_v9 }
 0x62b   : > { %2561 = verf.f32 %v1491_v28 }
 0x62c   : > { %2563 = verf.f32 %v1489_v30  ;;  %v2331_v11 = vpop.f32.mrb[36].mxu1 }
 0x62d   : > { %v3822_v32 = vadd.f32 %v2625_v29, %v2331_v11  ;;  %v1409_v33 = vpop.f32.mrb[37].mxu1 }
 0x62e   : > { %v2332_v22 = vpop.f32.mrb[38].mxu1  ;;  %v3829_v36 = vadd.f32 %v2627_v42, %v1409_v33 }
 0x62f   : > { %v3825_v16 = vadd.f32 %v2626_v10, %v2332_v22  ;;  %v1412_v23 = vpop.f32.mrb[39].mxu1  ;;  %v1494_v34 = vmul.f32 0.70710677, %v3822_v32  ;;  %v1478_v21 = vmul.f32 0.5, %v3822_v32 }
 0x630   : > { %v3833_v57 = vadd.f32 %v2628_v17, %v1412_v23  ;;  %v1492_v2 = vmul.f32 0.70710677, %v3829_v36  ;;  %v1476_v32 = vmul.f32 0.5, %v3829_v36 }
 0x631   : > { %v1495_v43 = vmul.f32 0.70710677, %v3825_v16  ;;  %2565 = verf.f32 %v1494_v34  ;;  %v1479_v30 = vmul.f32 0.5, %v3825_v16  ;;  %v2633_v34 = vld [vmem:[%s3380_s25 + $0x70] sm:$0xff] }
 0x632   : > { %v1493_v52 = vmul.f32 0.70710677, %v3833_v57  ;;  %v1477_v10 = vmul.f32 0.5, %v3833_v57 }
 0x633   : > { %v2558_v24 = vpop.eup %2557  ;;  %2567 = verf.f32 %v1495_v43  ;;  %v2634_v43 = vld [vmem:[%s3380_s25 + $0x78] sm:$0xff] }
 0x634   : > { %v2560_v59 = vpop.eup %2559  ;;  %v1522_v47 = vadd.f32 1.0, %v2558_v24  ;;  %v2335_v46 = vpop.f32.mrb[40].mxu1  ;;  %2569 = verf.f32 %v1492_v2 }
 0x635   : > { %v2562_v27 = vpop.eup %2561  ;;  %v1425_v48 = vpop.f32.mrb[41].mxu1  ;;  %v1520_v58 = vadd.f32 1.0, %v2560_v59  ;;  %2571 = verf.f32 %v1493_v52  ;;  %v3849_v0 = vadd.f32 %v2629_v40, %v2335_v46 }
 0x636   : > { %v2564_v19 = vpop.eup %2563  ;;  %v1523_v38 = vadd.f32 1.0, %v2562_v27  ;;  %v2336_v54 = vpop.f32.mrb[42].mxu1  ;;  %v3836_v51 = vmul.f32 %v1522_v47, %v1474_v45  ;;  %v3861_v62 = vadd.f32 %v2631_v41, %v1425_v48  ;;  %v2635_v47 = vld [vmem:[%s3380_s25 + $0x60] sm:$0xff] }
 0x637   : > { %v1428_v5 = vpop.f32.mrb[43].mxu1  ;;  %v1521_v61 = vadd.f32 1.0, %v2564_v19  ;;  %v3843_v39 = vmul.f32 %v1520_v58, %v1472_v20  ;;  %v3855_v12 = vadd.f32 %v2630_v44, %v2336_v54  ;;  %v1498_v55 = vmul.f32 0.70710677, %v3849_v0  ;;  %v2636_v58 = vld [vmem:[%s3380_s25 + $0x68] sm:$0xff] }
 0x638   : > { %1556 = vadd.xlane.f32.xlu0 %v3836_v51  ;;  %v3840_v31 = vmul.f32 %v1523_v38, %v1475_v50  ;;  %v1602_v1 = vmul.f32 %v3836_v51, %v3836_v51  ;;  %v1465_v25 = vadd.f32 %v2632_v7, %v1428_v5  ;;  %v1496_v9 = vmul.f32 0.70710677, %v3861_v62 }
 0x639   : > { %v3846_v60 = vmul.f32 %v1521_v61, %v1473_v37  ;;  %v1600_v15 = vmul.f32 %v3843_v39, %v3843_v39  ;;  %v1499_v56 = vmul.f32 0.70710677, %v3855_v12  ;;  %2573 = verf.f32 %v1498_v55 }
 0x63a   : > { %1558 = vadd.xlane.f32.xlu1 %v3840_v31  ;;  %v1603_v13 = vmul.f32 %v3840_v31, %v3840_v31  ;;  %v1497_v29 = vmul.f32 0.70710677, %v1465_v25  ;;  %v1482_v38 = vmul.f32 0.5, %v3849_v0  ;;  %v1483_v37 = vmul.f32 0.5, %v3855_v12 }
 0x63b   : > { %v2566_v8 = vpop.eup %2565  ;;  %v1601_v26 = vmul.f32 %v3846_v60, %v3846_v60  ;;  %2575 = verf.f32 %v1499_v56 }
 0x63c   : > { %1552 = vadd.xlane.f32.xlu0 %v3843_v39  ;;  %v2339_v53 = vpop.f32.mrb[44].mxu1  ;;  %v1526_v14 = vadd.f32 1.0, %v2566_v8  ;;  %2577 = verf.f32 %v1496_v9 }
 0x63d   : > { %v1441_v35 = vpop.f32.mrb[45].mxu1  ;;  %v2568_v4 = vpop.eup %2567  ;;  %2579 = verf.f32 %v1497_v29  ;;  %v1470_v42 = vadd.f32 %v2633_v34, %v2339_v53 }
 0x63e   : > { %1554 = vadd.xlane.f32.xlu1 %v3846_v60  ;;  %v2340_v49 = vpop.f32.mrb[46].mxu1  ;;  %v2570_v18 = vpop.eup %2569  ;;  %v1527_v63 = vadd.f32 1.0, %v2568_v4  ;;  %v3872_v11 = vmul.f32 %v1526_v14, %v1478_v21  ;;  %v1468_v46 = vadd.f32 %v2635_v47, %v1441_v35  ;;  %v1480_v35 = vmul.f32 0.5, %v3861_v62 }
 0x63f   : > { %v1444_v3 = vpop.f32.mrb[47].mxu1  ;;  %v2572_v6 = vpop.eup %2571  ;;  %v1524_v28 = vadd.f32 1.0, %v2570_v18  ;;  %v1471_v17 = vadd.f32 %v2634_v43, %v2340_v49  ;;  %v1502_v45 = vmul.f32 0.70710677, %v1470_v42  ;;  %v1486_v14 = vmul.f32 0.5, %v1470_v42 }
 0x640   : > { %1620 = vadd.xlane.f32.xlu0 %v1602_v1  ;;  %v1525_v33 = vadd.f32 1.0, %v2572_v6  ;;  %v3876_v22 = vmul.f32 %v1527_v63, %v1479_v30  ;;  %v1606_v36 = vmul.f32 %v3872_v11, %v3872_v11  ;;  %v1469_v50 = vadd.f32 %v2636_v58, %v1444_v3 }
 0x641   : > { %v3880_v16 = vmul.f32 %v1524_v28, %v1476_v32  ;;  %v1503_v19 = vmul.f32 0.70710677, %v1471_v17  ;;  %2581 = verf.f32 %v1502_v45  ;;  %v1500_v20 = vmul.f32 0.70710677, %v1468_v46 }
 0x642   : > { %1622 = vadd.xlane.f32.xlu1 %v1603_v13  ;;  %v3883_v23 = vmul.f32 %v1525_v33, %v1477_v10  ;;  %v1607_v57 = vmul.f32 %v3876_v22, %v3876_v22  ;;  %v1501_v40 = vmul.f32 0.70710677, %v1469_v50  ;;  %v1481_v1 = vmul.f32 0.5, %v1465_v25 }
 0x643   : > { %v2574_v24 = vpop.eup %2573  ;;  %v1604_v2 = vmul.f32 %v3880_v16, %v3880_v16  ;;  %2583 = verf.f32 %v1503_v19  ;;  %v1487_v25 = vmul.f32 0.5, %v1471_v17  ;;  %v1484_v63 = vmul.f32 0.5, %v1468_v46 }
 0x644   : > { %1616 = vadd.xlane.f32.xlu0 %v1600_v15  ;;  %v1530_v27 = vadd.f32 1.0, %v2574_v24  ;;  %v1605_v52 = vmul.f32 %v3883_v23, %v3883_v23  ;;  %2585 = verf.f32 %v1500_v20  ;;  %v1485_v9 = vmul.f32 0.5, %v1469_v50 }
 0x645   : > { %v2576_v59 = vpop.eup %2575  ;;  %2587 = verf.f32 %v1501_v40 }
 0x646   : > { %1618 = vadd.xlane.f32.xlu1 %v1601_v26  ;;  %v2578_v48 = vpop.eup %2577  ;;  %v1531_v54 = vadd.f32 1.0, %v2576_v59  ;;  %v3900_v53 = vmul.f32 %v1530_v27, %v1482_v38 }
 0x647   : > { %v2580_v5 = vpop.eup %2579  ;;  %v1528_v61 = vadd.f32 1.0, %v2578_v48 }
 0x648   : > { %1564 = vadd.xlane.f32.xlu0 %v3872_v11  ;;  %v1529_v49 = vadd.f32 1.0, %v2580_v5  ;;  %v3904_v0 = vmul.f32 %v1531_v54, %v1483_v37  ;;  %v1610_v12 = vmul.f32 %v3900_v53, %v3900_v53 }
 0x649   : > { %v3907_v8 = vmul.f32 %v1528_v61, %v1480_v35 }
 0x64a   : > { %1566 = vadd.xlane.f32.xlu1 %v3876_v22  ;;  %v3910_v44 = vmul.f32 %v1529_v49, %v1481_v1  ;;  %v1611_v13 = vmul.f32 %v3904_v0, %v3904_v0 }
 0x64b   : > { %v2582_v3 = vpop.eup %2581  ;;  %v1608_v41 = vmul.f32 %v3907_v8, %v3907_v8 }
 0x64c   : > { %1560 = vadd.xlane.f32.xlu0 %v3880_v16  ;;  %v1534_v55 = vadd.f32 1.0, %v2582_v3  ;;  %v1609_v18 = vmul.f32 %v3910_v44, %v3910_v44 }
 0x64d   : > { %v2584_v4 = vpop.eup %2583 }
 0x64e   : > { %1562 = vadd.xlane.f32.xlu1 %v3883_v23  ;;  %v2586_v62 = vpop.eup %2585  ;;  %v1535_v15 = vadd.f32 1.0, %v2584_v4  ;;  %v3921_v21 = vmul.f32 %v1534_v55, %v1486_v14 }
 0x64f   : > { %v2588_v56 = vpop.eup %2587  ;;  %v1532_v7 = vadd.f32 1.0, %v2586_v62 }
 0x650   : > { %1628 = vadd.xlane.f32.xlu0 %v1606_v36  ;;  %v1533_v26 = vadd.f32 1.0, %v2588_v56  ;;  %v3924_v6 = vmul.f32 %v1535_v15, %v1487_v25  ;;  %v1614_v33 = vmul.f32 %v3921_v21, %v3921_v21 }
 0x651   : > { %v3927_v28 = vmul.f32 %v1532_v7, %v1484_v63 }
 0x652   : > { %1630 = vadd.xlane.f32.xlu1 %v1607_v57  ;;  %v3930_v30 = vmul.f32 %v1533_v26, %v1485_v9  ;;  %v1615_v10 = vmul.f32 %v3924_v6, %v3924_v6 }
 0x653   : > { %v1612_v29 = vmul.f32 %v3927_v28, %v3927_v28 }
 0x654   : > { %1624 = vadd.xlane.f32.xlu0 %v1604_v2  ;;  %v1613_v32 = vmul.f32 %v3930_v30, %v3930_v30 }
 0x656   : > { %1626 = vadd.xlane.f32.xlu1 %v1605_v52 }
 0x658   : > { %1572 = vadd.xlane.f32.xlu0 %v3900_v53 }
 0x65a   : > { %1574 = vadd.xlane.f32.xlu1 %v3904_v0 }
 0x65c   : > { %1568 = vadd.xlane.f32.xlu0 %v3907_v8 }
 0x65e   : > { %1570 = vadd.xlane.f32.xlu1 %v3910_v44 }
 0x660   : > { %1636 = vadd.xlane.f32.xlu0 %v1610_v12 }
 0x662   : > { %1638 = vadd.xlane.f32.xlu1 %v1611_v13 }
 0x664   : > { %1632 = vadd.xlane.f32.xlu0 %v1608_v41 }
 0x666   : > { %1634 = vadd.xlane.f32.xlu1 %v1609_v18  ;;  %v3950_v18 = vld [vmem:[#allocation14] ss:$0 sm:$0xff] }
 0x668   : > { %1580 = vadd.xlane.f32.xlu0 %v3921_v21 }
 0x66a   : > { %1582 = vadd.xlane.f32.xlu1 %v3924_v6 }
 0x66c   : > { %1576 = vadd.xlane.f32.xlu0 %v3927_v28 }
 0x66e   : > { %1578 = vadd.xlane.f32.xlu1 %v3930_v30 }
 0x670   : > { %1640 = vadd.xlane.f32.xlu0 %v1612_v29 }
 0x672   : > { %1642 = vadd.xlane.f32.xlu1 %v1613_v32 }
 0x674   : > { %1644 = vadd.xlane.f32.xlu0 %v1614_v33  ;;  %v3959_v33 = vld [vmem:[#allocation16] ss:$0 sm:$0xff] }
 0x676   : > { %1646 = vadd.xlane.f32.xlu1 %v1615_v10 }
 0x6c5   : > { %v1557_v34 = vpop.xlane.xlu0 %1556 }
 0x6c6   : > { %v1586_v24 = vmul.f32 0.03125, %v1557_v34 }
 0x6c7   : > { %v1559_v42 = vpop.xlane.xlu1 %1558 }
 0x6c8   : > { %v1587_v17 = vmul.f32 0.03125, %v1559_v42  ;;  %v1666_v59 = vmul.f32 %v1586_v24, %v1586_v24  ;;  %v1698_v62 = vsub.f32 %v3836_v51, %v1586_v24 }
 0x6c9   : > { %v1553_v36 = vpop.xlane.xlu0 %1552 }
 0x6ca   : > { %v1584_v45 = vmul.f32 0.03125, %v1553_v36  ;;  %v1667_v2 = vmul.f32 %v1587_v17, %v1587_v17  ;;  %v1699_v63 = vsub.f32 %v3840_v31, %v1587_v17 }
 0x6cb   : > { %v1555_v43 = vpop.xlane.xlu1 %1554 }
 0x6cc   : > { %v3941_v46 = vmul.f32 0.03125, %v1555_v43  ;;  %v1664_v50 = vmul.f32 %v1584_v45, %v1584_v45  ;;  %v1696_v42 = vsub.f32 %v3843_v39, %v1584_v45 }
 0x6cd   : > { %v1621_v57 = vpop.xlane.xlu0 %1620 }
 0x6ce   : > { %v1650_v47 = vmul.f32 0.03125, %v1621_v57  ;;  %v1665_v5 = vmul.f32 %v3941_v46, %v3941_v46  ;;  %v1697_v36 = vsub.f32 %v3846_v60, %v3941_v46 }
 0x6cf   : > { %v1623_v27 = vpop.xlane.xlu1 %1622 }
 0x6d0   : > { %v1682_v48 = vsub.f32 %v1650_v47, %v1666_v59  ;;  %v1651_v19 = vmul.f32 0.03125, %v1623_v27 }
 0x6d1   : > { %v1617_v58 = vpop.xlane.xlu0 %1616 }
 0x6d2   : > { %v1714_v38 = vadd.f32 1e-05, %v1682_v48  ;;  %v1683_v54 = vsub.f32 %v1651_v19, %v1667_v2  ;;  %v1648_v52 = vmul.f32 0.03125, %v1617_v58 }
 0x6d3   : > { %v1619_v20 = vpop.xlane.xlu1 %1618 }
 0x6d4   : > { %2589 = vrsqrt.f32 %v1714_v38  ;;  %v1715_v61 = vadd.f32 1e-05, %v1683_v54  ;;  %v1680_v37 = vsub.f32 %v1648_v52, %v1664_v50  ;;  %v1649_v40 = vmul.f32 0.03125, %v1619_v20 }
 0x6d5   : > { %v1565_v35 = vpop.xlane.xlu0 %1564 }
 0x6d6   : > { %2591 = vrsqrt.f32 %v1715_v61  ;;  %v1712_v49 = vadd.f32 1e-05, %v1680_v37  ;;  %v1681_v1 = vsub.f32 %v1649_v40, %v1665_v5  ;;  %v3945_v4 = vmul.f32 0.03125, %v1565_v35 }
 0x6d7   : > { %v1567_v12 = vpop.xlane.xlu1 %1566 }
 0x6d8   : > { %2593 = vrsqrt.f32 %v1712_v49  ;;  %v1713_v3 = vadd.f32 1e-05, %v1681_v1  ;;  %v3947_v41 = vmul.f32 0.03125, %v1567_v12  ;;  %v1670_v56 = vmul.f32 %v3945_v4, %v3945_v4 }
 0x6d9   : > { %v1561_v13 = vpop.xlane.xlu0 %1560 }
 0x6da   : > { %2595 = vrsqrt.f32 %v1713_v3  ;;  %v3954_v7 = vmul.f32 0.03125, %v1561_v13  ;;  %v1671_v51 = vmul.f32 %v3947_v41, %v3947_v41 }
 0x6db   : > { %v1563_v55 = vpop.xlane.xlu1 %1562 }
 0x6dc   : > { %v3957_v9 = vmul.f32 0.03125, %v1563_v55  ;;  %v1668_v57 = vmul.f32 %v3954_v7, %v3954_v7 }
 0x6dd   : > { %v1629_v14 = vpop.xlane.xlu0 %1628 }
 0x6de   : > { %v2590_v15 = vpop.eup %2589  ;;  %v1654_v25 = vmul.f32 0.03125, %v1629_v14  ;;  %v1669_v60 = vmul.f32 %v3957_v9, %v3957_v9 }
 0x6df   : > { %v1746_v26 = vmul.f32 %v2590_v15, %v1698_v62  ;;  %v1631_v29 = vpop.xlane.xlu1 %1630  ;;  %v1702_v62 = vsub.f32 %v3872_v11, %v3945_v4 }
 0x6e0   : > { %v2592_v32 = vpop.eup %2591  ;;  %v1686_v10 = vsub.f32 %v1654_v25, %v1670_v56  ;;  %v1655_v34 = vmul.f32 0.03125, %v1631_v29 }
 0x6e1   : > { %v1769_v24 = vmul.f32 %v3950_v18, %v1746_v26  ;;  %v1747_v31 = vmul.f32 %v2592_v32, %v1699_v63  ;;  %v1625_v43 = vpop.xlane.xlu0 %1624  ;;  %v1703_v26 = vsub.f32 %v3876_v22, %v3947_v41 }
 0x6e2   : > { %v2594_v17 = vpop.eup %2593  ;;  %v1718_v59 = vadd.f32 1e-05, %v1686_v10  ;;  %v1687_v47 = vsub.f32 %v1655_v34, %v1671_v51  ;;  %v1652_v27 = vmul.f32 0.03125, %v1625_v43 }
 0x6e3   : > { %v1792_v2 = vadd.f32 %v3959_v33, %v1769_v24  ;;  %v1770_v48 = vmul.f32 %v3950_v18, %v1747_v31  ;;  %v1744_v39 = vmul.f32 %v2594_v17, %v1696_v42  ;;  %v1627_v45 = vpop.xlane.xlu1 %1626  ;;  %v1700_v42 = vsub.f32 %v3880_v16, %v3954_v7 }
 0x6e4   : > { %v2596_v46 = vpop.eup %2595  ;;  %2597 = vrsqrt.f32 %v1718_v59  ;;  %v1719_v19 = vadd.f32 1e-05, %v1687_v47  ;;  %v1684_v58 = vsub.f32 %v1652_v27, %v1668_v57  ;;  %v1653_v50 = vmul.f32 0.03125, %v1627_v45 }
 0x6e5   : > { %1808 = vst [vmem:[%s3974_s13 + $0x10] sm:$0xff] %v1792_v2  ;;  %v1793_v38 = vadd.f32 %v3959_v33, %v1770_v48  ;;  %v1767_v54 = vmul.f32 %v3950_v18, %v1744_v39  ;;  %v1745_v52 = vmul.f32 %v2596_v46, %v1697_v36  ;;  %v1573_v5 = vpop.xlane.xlu0 %1572  ;;  %v1701_v36 = vsub.f32 %v3883_v23, %v3957_v9 }
 0x6e6   : > { %2599 = vrsqrt.f32 %v1719_v19  ;;  %v1716_v20 = vadd.f32 1e-05, %v1684_v58  ;;  %v1685_v61 = vsub.f32 %v1653_v50, %v1669_v60  ;;  %v3984_v3 = vmul.f32 0.03125, %v1573_v5 }
 0x6e7   : > { %1809 = vst [vmem:[%s3974_s13 + $0x18] sm:$0xff] %v1793_v38  ;;  %v1790_v37 = vadd.f32 %v3959_v33, %v1767_v54  ;;  %v1768_v40 = vmul.f32 %v3950_v18, %v1745_v52  ;;  %v1575_v35 = vpop.xlane.xlu1 %1574 }
 0x6e8   : > { %2601 = vrsqrt.f32 %v1716_v20  ;;  %v1717_v49 = vadd.f32 1e-05, %v1685_v61  ;;  %v3987_v55 = vmul.f32 0.03125, %v1575_v35  ;;  %v1674_v56 = vmul.f32 %v3984_v3, %v3984_v3 }
 0x6e9   : > { %1806 = vst [vmem:[%s3974_s13] sm:$0xff] %v1790_v37  ;;  %v1791_v1 = vadd.f32 %v3959_v33, %v1768_v40  ;;  %v1569_v12 = vpop.xlane.xlu0 %1568 }
 0x6ea   : > { %2603 = vrsqrt.f32 %v1717_v49  ;;  %v3993_v25 = vmul.f32 0.03125, %v1569_v12  ;;  %v1675_v34 = vmul.f32 %v3987_v55, %v3987_v55  ;;  %v1706_v49 = vsub.f32 %v3900_v53, %v3984_v3 }
 0x6eb   : > { %1807 = vst [vmem:[%s3974_s13 + $0x8] sm:$0xff] %v1791_v1  ;;  %v1571_v13 = vpop.xlane.xlu1 %1570 }
 0x6ec   : > { %v3997_v32 = vmul.f32 0.03125, %v1571_v13  ;;  %v1672_v43 = vmul.f32 %v3993_v25, %v3993_v25 }
 0x6ed   : > { %v1637_v14 = vpop.xlane.xlu0 %1636 }
 0x6ee   : > { %v2598_v15 = vpop.eup %2597  ;;  %v1658_v63 = vmul.f32 0.03125, %v1637_v14  ;;  %v1673_v23 = vmul.f32 %v3997_v32, %v3997_v32  ;;  %v1705_v53 = vsub.f32 %v3910_v44, %v3997_v32 }
 0x6ef   : > { %v1750_v29 = vmul.f32 %v2598_v15, %v1702_v62  ;;  %v1639_v51 = vpop.xlane.xlu1 %1638  ;;  %v1707_v15 = vsub.f32 %v3904_v0, %v3987_v55 }
 0x6f0   : > { %v2600_v10 = vpop.eup %2599  ;;  %v1690_v11 = vsub.f32 %v1658_v63, %v1674_v56  ;;  %v1659_v4 = vmul.f32 0.03125, %v1639_v51 }
 0x6f1   : > { %v1773_v24 = vmul.f32 %v3950_v18, %v1750_v29  ;;  %v1751_v31 = vmul.f32 %v2600_v10, %v1703_v26  ;;  %v1633_v22 = vpop.xlane.xlu0 %1632 }
 0x6f2   : > { %v2602_v41 = vpop.eup %2601  ;;  %v1722_v17 = vadd.f32 1e-05, %v1690_v11  ;;  %v1691_v57 = vsub.f32 %v1659_v4, %v1675_v34  ;;  %v1656_v59 = vmul.f32 0.03125, %v1633_v22  ;;  %v1704_v11 = vsub.f32 %v3907_v8, %v3993_v25 }
 0x6f3   : > { %v1796_v47 = vadd.f32 %v3959_v33, %v1773_v24  ;;  %v1774_v27 = vmul.f32 %v3950_v18, %v1751_v31  ;;  %v1748_v16 = vmul.f32 %v2602_v41, %v1700_v42  ;;  %v1635_v7 = vpop.xlane.xlu1 %1634 }
 0x6f4   : > { %v2604_v9 = vpop.eup %2603  ;;  %2605 = vrsqrt.f32 %v1722_v17  ;;  %v1723_v2 = vadd.f32 1e-05, %v1691_v57  ;;  %v1688_v48 = vsub.f32 %v1656_v59, %v1672_v43  ;;  %v1657_v39 = vmul.f32 0.03125, %v1635_v7 }
 0x6f5   : > { %1812 = vst [vmem:[%s3974_s13 + $0x30] sm:$0xff] %v1796_v47  ;;  %v1797_v60 = vadd.f32 %v3959_v33, %v1774_v27  ;;  %v1771_v45 = vmul.f32 %v3950_v18, %v1748_v16  ;;  %v1749_v46 = vmul.f32 %v2604_v9, %v1701_v36  ;;  %v1581_v19 = vpop.xlane.xlu0 %1580 }
 0x6f6   : > { %2607 = vrsqrt.f32 %v1723_v2  ;;  %v1720_v58 = vadd.f32 1e-05, %v1688_v48  ;;  %v1689_v50 = vsub.f32 %v1657_v39, %v1673_v23  ;;  %v1598_v13 = vmul.f32 0.03125, %v1581_v19 }
 0x6f7   : > { %1813 = vst [vmem:[%s3974_s13 + $0x38] sm:$0xff] %v1797_v60  ;;  %v1794_v38 = vadd.f32 %v3959_v33, %v1771_v45  ;;  %v1772_v54 = vmul.f32 %v3950_v18, %v1749_v46  ;;  %v1583_v52 = vpop.xlane.xlu1 %1582 }
 0x6f8   : > { %2609 = vrsqrt.f32 %v1720_v58  ;;  %v1721_v5 = vadd.f32 1e-05, %v1689_v50  ;;  %v1599_v63 = vmul.f32 0.03125, %v1583_v52  ;;  %v1678_v0 = vmul.f32 %v1598_v13, %v1598_v13 }
 0x6f9   : > { %1810 = vst [vmem:[%s3974_s13 + $0x20] sm:$0xff] %v1794_v38  ;;  %v1795_v20 = vadd.f32 %v3959_v33, %v1772_v54  ;;  %v1577_v61 = vpop.xlane.xlu0 %1576  ;;  %v1710_v58 = vsub.f32 %v3921_v21, %v1598_v13 }
 0x6fa   : > { %2611 = vrsqrt.f32 %v1721_v5  ;;  %v1596_v37 = vmul.f32 0.03125, %v1577_v61  ;;  %v1679_v8 = vmul.f32 %v1599_v63, %v1599_v63  ;;  %v1711_v52 = vsub.f32 %v3924_v6, %v1599_v63 }
 0x6fb   : > { %1811 = vst [vmem:[%s3974_s13 + $0x28] sm:$0xff] %v1795_v20  ;;  %v1579_v40 = vpop.xlane.xlu1 %1578 }
 0x6fc   : > { %v1597_v35 = vmul.f32 0.03125, %v1579_v40  ;;  %v1676_v62 = vmul.f32 %v1596_v37, %v1596_v37  ;;  %v1708_v39 = vsub.f32 %v3927_v28, %v1596_v37 }
 0x6fd   : > { %v1641_v1 = vpop.xlane.xlu0 %1640 }
 0x6fe   : > { %v2606_v12 = vpop.eup %2605  ;;  %v1660_v14 = vmul.f32 0.03125, %v1641_v1  ;;  %v1677_v51 = vmul.f32 %v1597_v35, %v1597_v35  ;;  %v1709_v45 = vsub.f32 %v3930_v30, %v1597_v35 }
 0x6ff   : > { %v1754_v56 = vmul.f32 %v2606_v12, %v1706_v49  ;;  %v1643_v26 = vpop.xlane.xlu1 %1642 }
 0x700   : > { %v2608_v29 = vpop.eup %2607  ;;  %v1692_v10 = vsub.f32 %v1660_v14, %v1676_v62  ;;  %v1661_v34 = vmul.f32 0.03125, %v1643_v26 }
 0x701   : > { %v1777_v3 = vmul.f32 %v3950_v18, %v1754_v56  ;;  %v1755_v4 = vmul.f32 %v2608_v29, %v1707_v15  ;;  %v1645_v42 = vpop.xlane.xlu0 %1644 }
 0x702   : > { %v2610_v36 = vpop.eup %2609  ;;  %v1724_v55 = vadd.f32 1e-05, %v1692_v10  ;;  %v1693_v24 = vsub.f32 %v1661_v34, %v1677_v51  ;;  %v1662_v31 = vmul.f32 0.03125, %v1645_v42 }
 0x703   : > { %v1800_v22 = vadd.f32 %v3959_v33, %v1777_v3  ;;  %v1778_v41 = vmul.f32 %v3950_v18, %v1755_v4  ;;  %v1752_v43 = vmul.f32 %v2610_v36, %v1704_v11  ;;  %v1647_v25 = vpop.xlane.xlu1 %1646 }
 0x704   : > { %v2612_v17 = vpop.eup %2611  ;;  %2613 = vrsqrt.f32 %v1724_v55  ;;  %v1725_v44 = vadd.f32 1e-05, %v1693_v24  ;;  %v1694_v32 = vsub.f32 %v1662_v31, %v1678_v0  ;;  %v1663_v57 = vmul.f32 0.03125, %v1647_v25 }
 0x705   : > { %1816 = vst [vmem:[%s3974_s13 + $0x50] sm:$0xff] %v1800_v22  ;;  %v1801_v59 = vadd.f32 %v3959_v33, %v1778_v41  ;;  %v1775_v47 = vmul.f32 %v3950_v18, %v1752_v43  ;;  %v1753_v27 = vmul.f32 %v2612_v17, %v1705_v53 }
 0x706   : > { %2615 = vrsqrt.f32 %v1725_v44  ;;  %v1726_v16 = vadd.f32 1e-05, %v1694_v32  ;;  %v1695_v23 = vsub.f32 %v1663_v57, %v1679_v8 }
 0x707   : > { %1817 = vst [vmem:[%s3974_s13 + $0x58] sm:$0xff] %v1801_v59  ;;  %v1798_v7 = vadd.f32 %v3959_v33, %v1775_v47  ;;  %v1776_v9 = vmul.f32 %v3950_v18, %v1753_v27 }
 0x708   : > { %2617 = vrsqrt.f32 %v1726_v16  ;;  %v1727_v2 = vadd.f32 1e-05, %v1695_v23 }
 0x709   : > { %1814 = vst [vmem:[%s3974_s13 + $0x40] sm:$0xff] %v1798_v7  ;;  %v1799_v48 = vadd.f32 %v3959_v33, %v1776_v9 }
 0x70a   : > { %2619 = vrsqrt.f32 %v1727_v2 }
 0x70b   : > { %1815 = vst [vmem:[%s3974_s13 + $0x48] sm:$0xff] %v1799_v48 }
 0x70e   : > { %v2614_v60 = vpop.eup %2613 }
 0x70f   : > { %v1756_v46 = vmul.f32 %v2614_v60, %v1708_v39 }
 0x710   : > { %v2616_v19 = vpop.eup %2615 }
 0x711   : > { %v1779_v50 = vmul.f32 %v3950_v18, %v1756_v46  ;;  %v1757_v38 = vmul.f32 %v2616_v19, %v1709_v45 }
 0x712   : > { %v2618_v54 = vpop.eup %2617 }
 0x713   : > { %v1802_v5 = vadd.f32 %v3959_v33, %v1779_v50  ;;  %v1780_v28 = vmul.f32 %v3950_v18, %v1757_v38  ;;  %v1758_v30 = vmul.f32 %v2618_v54, %v1710_v58 }
 0x714   : > { %v2620_v20 = vpop.eup %2619 }
 0x715   : > { %1818 = vst [vmem:[%s3974_s13 + $0x60] sm:$0xff] %v1802_v5  ;;  %v1803_v61 = vadd.f32 %v3959_v33, %v1780_v28  ;;  %v1781_v21 = vmul.f32 %v3950_v18, %v1758_v30  ;;  %v1759_v37 = vmul.f32 %v2620_v20, %v1711_v52 }
 0x717   : > { %1819 = vst [vmem:[%s3974_s13 + $0x68] sm:$0xff] %v1803_v61  ;;  %v1804_v6 = vadd.f32 %v3959_v33, %v1781_v21  ;;  %v1782_v40 = vmul.f32 %v3950_v18, %v1759_v37 }
 0x719   : > { %1820 = vst [vmem:[%s3974_s13 + $0x70] sm:$0xff] %v1804_v6  ;;  %v1805_v35 = vadd.f32 %v3959_v33, %v1782_v40 }
 0x71b   : > { %1821 = vst [vmem:[%s3974_s13 + $0x78] sm:$0xff] %v1805_v35 }
 0x71c   : > { %2906 = shalt.err (!%p2903_p0)
}
 0x71d   : > { %s2907_s23 = scalar_lea.hbm %s4059_s29, 2048  ;;  %s2911_s0 = scalar_lea.hbm %s4191_s20, 4096 }
 0x71e   : > { %p2908_p12 = scmp.ne.s32.totalorder %s4059_s29, %s2907_s23  ;;  %p2912_p3 = scmp.lt.u32.totalorder %s4059_s29, %s4191_s20 }
 0x71f   : > { %p2913_p7 = scmp.lt.u32.totalorder %s2911_s0, %s2907_s23  ;;  %p2915_p6 = scmp.lt.u32.totalorder %s2907_s23, %s4059_s29 }
 0x720   : > { %p2909_p13 = pnand %p2908_p12, %p4192_p10 }
 0x721   : > { %p2914_p2 = por %p2913_p7, %p2912_p3 }
 0x722   : > { %p2910_p1 = pneg %p2909_p13 }
 0x723   : > { %p2916_p5 = por %p2915_p6, %p2914_p2 }
 0x725   : > { %p2917_p9 = pnand %p2916_p5, %p2910_p1 }
 0x727   : > { %2920 = shalt.err (!%p2917_p9)
}
 0x728   : > { %s2995_s13 = smov 128   ;;  %s2996_s28 = smov 8  }
 0x729   : > { %2373 = dma.vmem_to_hbm [thread:$0]  (%p4192_p10), %s4061_s21, 2048, %s4059_s29, %s1823_s15, %s2995_s13, %s2995_s13, %s2996_s28  }
 0x72a PF: > { %s1851_s9 = sand.u32 1, %s2967_s30   ;;  %p4193_p4 = scmp.ne.s32.totalorder %s4145_s14, 0 }
 0x72b   : > { %p4194_p8 = scmp.ge.s32.totalorder %s2979_s12, 2  ;;  %s1852_s27 = scalar_lea.sflag [#allocation4], %s1851_s9 }
 0x72d   : > { %p2405_p11 = pnand %p4194_p8, %p4193_p4 }
 0x72f   : > { %2962 = dma.done.wait (!%p2405_p11), %s1852_s27, 2048  }
 0x730   : > { %2964 = vsyncadd (!%p2405_p11), %s1852_s27, 4294965248  ;;  %p28_p0 = scmp.ge.s32.totalorder %s3252_s19, 4   ;;  %s4195_s30 = smov %s2971_s10 }
 0x731   : > { %s4196_s10 = smov %s2975_s11  ;;  %s4197_s11 = smov %s3264_s24 }
 0x732   : > { %s4198_s12 = smov %s3252_s19  ;;  %30 = sbr.rel (!%p28_p0) target bundleno = 17 (0x11), region = 142 }
 0x739   :  { %1857 = vsyncpa [#allocation3], 1 }
 0x73a   :  { %1859 = vsyncpa [#allocation3 + $0x1], 1 }
 0x73b   :  { %1860 = vsyncpa [#allocation6], 1 }
 0x73c   :  { %1862 = vsyncpa [#allocation6 + $0x1], 1 }
 0x73d   :  { %1863 = vsyncpa [#allocation9], 1 }
 0x73e   :  { %1864 = vsyncpa [#allocation12], 1 }
 0x73f   :  { %1865 = vsyncpa [#allocation15], 1 }
 0x740   :  { %1866 = vsyncpa [#allocation4], 1 }
 0x741   :  { %1868 = vsyncpa [#allocation4 + $0x1], 1 }

</bundles_post_ra>
